<compile_context>
chip_gen: v6e
topology: v6e:2x2x1
jax: 0.10.0
libtpu: 0.0.40
codegen_flags: <defaults>
</compile_context>

<pallas_src>
import functools

import numpy as np

import jax
import jax.numpy as jnp
from jax import lax
from jax.experimental import pallas as pl
from jax.experimental.pallas import tpu as pltpu


_VMEM_LIMIT = 32 * 1024 * 1024  # safe scoped-VMEM limit on v5e/v6e/v7x


def _fac_conv_kernel(x_ref, w1_ref, w2_ref, mask_ref, y_ref, ssum_ref, ssq_ref,
                     xp_ref, y1_ref, *, K, p):
    """ReLU -> Conv(Kx1) -> Conv(1xK) + BN partial stats for Nb packed images.

    x_ref   : (Nb, Ci, H, W)      VMEM input block (native NCHW)
    w1_ref  : (Ci*Ci*K,)          SMEM, flattened [co, ci, kh]
    w2_ref  : (Co*Ci*K,)          SMEM, flattened [co, ci, kw]
    mask_ref: (1, L)              1.0 on real per-image output columns
    y_ref   : (1, Co, H2, Nb*P)   pre-BN activations, images packed along lanes
    ssum_ref: (1, Co, 1, 1)       per-(block, channel) sum
    ssq_ref : (1, Co, 1, 1)       per-(block, channel) sum of squares
    xp_ref  : (Ci, H+2p, Nb*P)    scratch: packed, zero-haloed ReLU(x)
    y1_ref  : (Ci, H1,  Nb*P)     scratch: conv1 output == conv2's padded input
    """
    Nb, Ci, H, W = x_ref.shape
    Co = y_ref.shape[1]
    _, Hp, NbP = xp_ref.shape
    H1 = y1_ref.shape[1]
    P = NbP // Nb
    L = NbP - (K - 1)          # accumulated output width (last K-1 cols stay 0)

    # ---- stage 1: ReLU + zero-pad + pack the Nb images along the lane axis ----
    # per image: columns [2p, 2p+W) hold ReLU(x); [0,2p) & [2p+W, P) are the W halo
    # conv2 reads as zeros; rows [0,p) & [p+H, Hp) are the H halo conv1 reads as 0.
    if p > 0:
        zrows = jnp.zeros((Ci, p, NbP), jnp.float32)
        xp_ref[:, 0:p, :] = zrows                       # halo-only zeroing
        xp_ref[:, p + H:, :] = zrows
        zcols = jnp.zeros((Ci, H, 2 * p), jnp.float32)
    for b in range(Nb):                                 # input is the smallest tensor;
        base = b * P                                    # narrow per-image stores OK
        if p > 0:
            xp_ref[:, p:p + H, base:base + 2 * p] = zcols
            xp_ref[:, p:p + H, base + 2 * p + W:base + P] = zcols
        xp_ref[:, p:p + H, base + 2 * p:base + 2 * p + W] = (
            jnp.maximum(x_ref[b], 0.0))

    # ---- stage 2: Conv(Kx1) -- pure H taps, computed over the full packed width.
    # Kernel width 1 => conv1 over the pitch-P packed input directly yields conv2's
    # zero-padded input (columns included).  One lane-dense store per channel.
    for co in range(Ci):
        acc = jnp.zeros((H1, NbP), jnp.float32)
        for ci in range(Ci):
            for kh in range(K):
                w = w1_ref[(co * Ci + ci) * K + kh]
                acc = acc + w * xp_ref[ci, kh:kh + H1, :]
        y1_ref[co] = acc

    # ---- stage 3: Conv(1xK) + BN partial statistics ----
    # zero only the output regions the accumulation never touches (true zeros)
    if p > 0:
        zr = jnp.zeros((1, Co, p, NbP), jnp.float32)
        y_ref[:, :, 0:p, :] = zr
        y_ref[:, :, p + H1:, :] = zr
    if L < NbP:
        y_ref[:, :, p:p + H1, L:] = jnp.zeros((1, Co, H1, NbP - L), jnp.float32)

    mask = mask_ref[...]                                # hoisted once (1, L)
    for co in range(Co):
        acc = jnp.zeros((H1, L), jnp.float32)
        for ci in range(Ci):
            for kw in range(K):
                w = w2_ref[(co * Ci + ci) * K + kw]
                acc = acc + w * y1_ref[ci, :, kw:kw + L]   # uniform shift, all images
        y_ref[0, co, p:p + H1, 0:L] = acc
        masked = acc * mask                              # drop inter-image filler cols
        ssum_ref[0, co] = jnp.sum(masked, axis=(0, 1), keepdims=True)
        ssq_ref[0, co] = jnp.sum(masked * acc, axis=(0, 1), keepdims=True)


def fac_conv(x, w1, w2, gamma, beta, *, kernel_length, stride, padding, eps=1e-5):
    """FacConv forward (PyTorch train-mode BatchNorm semantics).

    x     : (N, C_in, H, W) NCHW
    w1    : (C_in, C_in, K)  Conv(Kx1) weight   w2 : (C_out, C_in, K) Conv(1xK) weight
    gamma : (C_out,)   beta : (C_out,)
    returns (N, C_out, H2, W2) float32
    """
    N, Ci, H, W = x.shape
    Co = w2.shape[0]
    K, s, p = kernel_length, stride, padding

    if s != 1:
        # TODO(synk): stride>1 needs a lane-axis deinterleave path (see perf review);
        # fall back to the XLA reference for that case, Pallas path covers stride=1.
        return _reference(x, w1, w2, gamma, beta, K, s, p, eps)

    # Conv output sizes (PyTorch Conv2d semantics, padding on both dims, stride 1).
    Hp = H + 2 * p
    H1 = Hp - K + 1            # Conv(Kx1) output height
    W1 = W + 2 * p             # Conv(Kx1) output width (kernel width 1)
    H2 = H1 + 2 * p            # Conv(1xK) output height
    W2 = W1 + 2 * p - K + 1    # Conv(1xK) output width
    assert H1 >= 1 and W2 >= 1, "kernel does not fit the padded input"

    P = W1 + 2 * p             # per-image lane pitch = conv2's padded input width

    # Images per grid step: aim for >=512 packed lanes; cap so a step's VMEM use
    # (double-buffered I/O blocks + scratch) stays ~8 MiB, well under the 32 MiB
    # scoped limit (v5e/v6e) and v7x's 64 MiB physical VMEM.
    bytes_per_img = 4 * (2 * Ci * H * W + Ci * Hp * P + Ci * H1 * P + 2 * Co * H2 * P)
    Nb = max(1, min(N, -(-512 // P), max(1, (8 << 20) // bytes_per_img)))
    while N % Nb:
        Nb -= 1
    G = N // Nb
    NbP = Nb * P
    L = NbP - (K - 1)

    x32 = x.astype(jnp.float32)
    w1_flat = w1.astype(jnp.float32).reshape(-1)   # [co, ci, kh]
    w2_flat = w2.astype(jnp.float32).reshape(-1)   # [co, ci, kw]
    # 1.0 on real per-image output columns [0, W2), 0.0 on inter-image filler.
    col_mask = jnp.asarray(
        np.tile(np.arange(P) < W2, Nb)[:L].astype(np.float32)).reshape(1, L)

    flops = 2 * N * K * Ci * (Ci * H1 * W1 + Co * H2 * W2)
    bytes_accessed = 4 * (x.size + G * Co * H2 * NbP + w1_flat.size + w2_flat.size
                          + 2 * G * Co + L)

    kernel = functools.partial(_fac_conv_kernel, K=K, p=p)
    y2p, ssum, ssq = pl.pallas_call(
        kernel,
        out_shape=(
            jax.ShapeDtypeStruct((G, Co, H2, NbP), jnp.float32),
            jax.ShapeDtypeStruct((G, Co, 1, 1), jnp.float32),
            jax.ShapeDtypeStruct((G, Co, 1, 1), jnp.float32),
        ),
        grid=(G,),
        in_specs=[
            pl.BlockSpec((Nb, Ci, H, W), lambda g: (g, 0, 0, 0)),
            pl.BlockSpec(memory_space=pltpu.MemorySpace.SMEM),
            pl.BlockSpec(memory_space=pltpu.MemorySpace.SMEM),
            pl.BlockSpec((1, L), lambda g: (0, 0)),
        ],
        out_specs=(
            pl.BlockSpec((1, Co, H2, NbP), lambda g: (g, 0, 0, 0)),
            pl.BlockSpec((1, Co, 1, 1), lambda g: (g, 0, 0, 0)),
            pl.BlockSpec((1, Co, 1, 1), lambda g: (g, 0, 0, 0)),
        ),
        scratch_shapes=[
            pltpu.VMEM((Ci, Hp, NbP), jnp.float32),   # packed ReLU(x) with zero halo
            pltpu.VMEM((Ci, H1, NbP), jnp.float32),   # conv1 out == conv2 padded input
        ],
        compiler_params=pltpu.CompilerParams(
            dimension_semantics=("parallel",),
            vmem_limit_bytes=_VMEM_LIMIT),
        cost_estimate=pl.CostEstimate(flops=flops, transcendentals=0,
                                      bytes_accessed=bytes_accessed),
    )(x32, w1_flat, w2_flat, col_mask)

    # ---- BatchNorm (train-mode batch statistics), tiny (Co,)-sized math ----
    cnt = N * H2 * W2
    mean = jnp.sum(ssum[:, :, 0, 0], axis=0) / cnt
    ex2 = jnp.sum(ssq[:, :, 0, 0], axis=0) / cnt
    # NOTE: E[x^2]-E[x]^2 in f32 (fine at the 5e-2 tolerance; see review concern).
    var = jnp.maximum(ex2 - mean * mean, 0.0)
    scale = gamma.astype(jnp.float32) * lax.rsqrt(var + eps)
    shift = beta.astype(jnp.float32) - mean * scale

    # ---- unpack (G, Co, H2, Nb*P) -> (N, Co, H2, W2); XLA fuses the BN affine ----
    y = y2p.reshape(G, Co, H2, Nb, P)[..., :W2]
    y = jnp.transpose(y, (0, 3, 1, 2, 4)).reshape(N, Co, H2, W2)
    return y * scale.reshape(1, Co, 1, 1) + shift.reshape(1, Co, 1, 1)


# ------------------------- pure-JAX reference -------------------------


def _reference(x, w1, w2, gamma, beta, K, s, p, eps):
    x = jnp.maximum(x.astype(jnp.float32), 0.0)
    w1_oihw = w1.astype(jnp.float32)[:, :, :, None]   # (Cin, Cin, K, 1)
    w2_oihw = w2.astype(jnp.float32)[:, :, None, :]   # (Cout, Cin, 1, K)
    dn = ("NCHW", "OIHW", "NCHW")
    y = lax.conv_general_dilated(x, w1_oihw, (s, s), ((p, p), (p, p)),
                                 dimension_numbers=dn)
    y = lax.conv_general_dilated(y, w2_oihw, (s, s), ((p, p), (p, p)),
                                 dimension_numbers=dn)
    mean = jnp.mean(y, axis=(0, 2, 3), keepdims=True)
    var = jnp.mean((y - mean) ** 2, axis=(0, 2, 3), keepdims=True)
    yn = (y - mean) * lax.rsqrt(var + eps)
    return yn * gamma.reshape(1, -1, 1, 1) + beta.reshape(1, -1, 1, 1)


# ------------------------- demo -------------------------

if __name__ == "__main__":
    key = jax.random.PRNGKey(0)
    kx, k1, k2, kg, kb = jax.random.split(key, 5)

    N, C_in, H, W = 2, 4, 16, 16
    C_out, K, stride, padding = 8, 3, 1, 1

    x = jax.random.normal(kx, (N, C_in, H, W), jnp.float32)
    # synthetic deterministic parameters (shapes per FacConv.__init__)
    w1 = 0.3 * jax.random.normal(k1, (C_in, C_in, K), jnp.float32)    # Conv(Kx1)
    w2 = 0.3 * jax.random.normal(k2, (C_out, C_in, K), jnp.float32)   # Conv(1xK)
    gamma = 1.0 + 0.1 * jax.random.normal(kg, (C_out,), jnp.float32)  # BN weight
    beta = 0.1 * jax.random.normal(kb, (C_out,), jnp.float32)         # BN bias

    fn = jax.jit(functools.partial(fac_conv, kernel_length=K, stride=stride,
                                   padding=padding))
    out = jax.block_until_ready(fn(x, w1, w2, gamma, beta))

    ref = _reference(x, w1, w2, gamma, beta, K, stride, padding, 1e-5)
    assert out.shape == ref.shape, (out.shape, ref.shape)
    err = float(jnp.max(jnp.abs(out - ref)))
    if err < 5e-2:
        print("KERNEL_OK")
    else:
        print("max_abs_err", err)
</pallas_src>

<mosaic_0001>
module attributes {stable_mosaic.version = 11 : i64} {
  func.func @_fac_conv_kernel(%arg0: i32, %arg1: memref<2x4x16x16xf32, #tpu.memory_space<vmem>>, %arg2: memref<48xf32, #tpu.memory_space<smem>>, %arg3: memref<96xf32, #tpu.memory_space<smem>>, %arg4: memref<1x38xf32, #tpu.memory_space<vmem>>, %arg5: memref<1x8x18x40xf32, #tpu.memory_space<vmem>>, %arg6: memref<1x8x1x1xf32, #tpu.memory_space<vmem>>, %arg7: memref<1x8x1x1xf32, #tpu.memory_space<vmem>>, %arg8: memref<4x18x40xf32, #tpu.memory_space<vmem>>, %arg9: memref<4x16x40xf32, #tpu.memory_space<vmem>>) attributes {dimension_semantics = [#tpu.dimension_semantics<parallel>], iteration_bounds = array<i64: 1>, scalar_prefetch = 0 : i64, scratch_operands = 2 : i64, tpu.core_type = #tpu.core_type<tc>, window_params = [{transform_indices = @transform_0, window_bounds = array<i64: 2, 4, 16, 16>}, {transform_indices = @transform_1, window_bounds = array<i64: 48>}, {transform_indices = @transform_2, window_bounds = array<i64: 96>}, {pipeline_mode = #tpu.pipeline_mode<synchronous>, transform_indices = @transform_3, window_bounds = array<i64: 1, 38>}, {transform_indices = @transform_4, window_bounds = array<i64: 1, 8, 18, 40>}, {transform_indices = @transform_5, window_bounds = array<i64: 1, 8, 1, 1>}, {transform_indices = @transform_6, window_bounds = array<i64: 1, 8, 1, 1>}]} {
    %cst = arith.constant 0.000000e+00 : f32
    %0 = vector.broadcast %cst : f32 to vector<4x1x40xf32>
    %c0 = arith.constant 0 : index
    %c0_0 = arith.constant 0 : index
    %c0_1 = arith.constant 0 : index
    %1 = vector.load %arg8[%c0, %c0_0, %c0_1] : memref<4x18x40xf32, #tpu.memory_space<vmem>>, vector<4x1x40xf32>
    tpu.vector_store %arg8[%c0, %c0_0, %c0_1], %0 {strides = array<i32>} : memref<4x18x40xf32, #tpu.memory_space<vmem>>, vector<4x1x40xf32>,
    %c0_2 = arith.constant 0 : index
    %c17 = arith.constant 17 : index
    %c0_3 = arith.constant 0 : index
    %2 = vector.load %arg8[%c0_2, %c17, %c0_3] : memref<4x18x40xf32, #tpu.memory_space<vmem>>, vector<4x1x40xf32>
    tpu.vector_store %arg8[%c0_2, %c17, %c0_3], %0 {strides = array<i32>} : memref<4x18x40xf32, #tpu.memory_space<vmem>>, vector<4x1x40xf32>,
    %cst_4 = arith.constant 0.000000e+00 : f32
    %3 = vector.broadcast %cst_4 : f32 to vector<4x16x2xf32>
    %c0_5 = arith.constant 0 : index
    %c1 = arith.constant 1 : index
    %c0_6 = arith.constant 0 : index
    %4 = vector.load %arg8[%c0_5, %c1, %c0_6] : memref<4x18x40xf32, #tpu.memory_space<vmem>>, vector<4x16x2xf32>
    tpu.vector_store %arg8[%c0_5, %c1, %c0_6], %3 {strides = array<i32>} : memref<4x18x40xf32, #tpu.memory_space<vmem>>, vector<4x16x2xf32>,
    %c0_7 = arith.constant 0 : index
    %c1_8 = arith.constant 1 : index
    %c18 = arith.constant 18 : index
    %5 = vector.load %arg8[%c0_7, %c1_8, %c18] : memref<4x18x40xf32, #tpu.memory_space<vmem>>, vector<4x16x2xf32>
    tpu.vector_store %arg8[%c0_7, %c1_8, %c18], %3 {strides = array<i32>} : memref<4x18x40xf32, #tpu.memory_space<vmem>>, vector<4x16x2xf32>,
    %c0_9 = arith.constant 0 : index
    %c0_10 = arith.constant 0 : index
    %c0_11 = arith.constant 0 : index
    %c0_12 = arith.constant 0 : index
    %6 = vector.load %arg1[%c0_9, %c0_10, %c0_11, %c0_12] : memref<2x4x16x16xf32, #tpu.memory_space<vmem>>, vector<1x4x16x16xf32>
    %7 = vector.shape_cast %6 : vector<1x4x16x16xf32> to vector<4x16x16xf32>
    %cst_13 = arith.constant 0.000000e+00 : f32
    %8 = vector.broadcast %cst_13 : f32 to vector<4x16x16xf32>
    %9 = arith.maximumf %7, %8 : vector<4x16x16xf32>
    %c0_14 = arith.constant 0 : index
    %c1_15 = arith.constant 1 : index
    %c2 = arith.constant 2 : index
    %10 = vector.load %arg8[%c0_14, %c1_15, %c2] : memref<4x18x40xf32, #tpu.memory_space<vmem>>, vector<4x16x16xf32>
    tpu.vector_store %arg8[%c0_14, %c1_15, %c2], %9 {strides = array<i32>} : memref<4x18x40xf32, #tpu.memory_space<vmem>>, vector<4x16x16xf32>,
    %c0_16 = arith.constant 0 : index
    %c1_17 = arith.constant 1 : index
    %c20 = arith.constant 20 : index
    %11 = vector.load %arg8[%c0_16, %c1_17, %c20] : memref<4x18x40xf32, #tpu.memory_space<vmem>>, vector<4x16x2xf32>
    tpu.vector_store %arg8[%c0_16, %c1_17, %c20], %3 {strides = array<i32>} : memref<4x18x40xf32, #tpu.memory_space<vmem>>, vector<4x16x2xf32>,
    %c0_18 = arith.constant 0 : index
    %c1_19 = arith.constant 1 : index
    %c38 = arith.constant 38 : index
    %12 = vector.load %arg8[%c0_18, %c1_19, %c38] : memref<4x18x40xf32, #tpu.memory_space<vmem>>, vector<4x16x2xf32>
    tpu.vector_store %arg8[%c0_18, %c1_19, %c38], %3 {strides = array<i32>} : memref<4x18x40xf32, #tpu.memory_space<vmem>>, vector<4x16x2xf32>,
    %c1_20 = arith.constant 1 : index
    %c0_21 = arith.constant 0 : index
    %c0_22 = arith.constant 0 : index
    %c0_23 = arith.constant 0 : index
    %13 = vector.load %arg1[%c1_20, %c0_21, %c0_22, %c0_23] : memref<2x4x16x16xf32, #tpu.memory_space<vmem>>, vector<1x4x16x16xf32>
    %14 = vector.shape_cast %13 : vector<1x4x16x16xf32> to vector<4x16x16xf32>
    %cst_24 = arith.constant 0.000000e+00 : f32
    %15 = vector.broadcast %cst_24 : f32 to vector<4x16x16xf32>
    %16 = arith.maximumf %14, %15 : vector<4x16x16xf32>
    %c0_25 = arith.constant 0 : index
    %c1_26 = arith.constant 1 : index
    %c22 = arith.constant 22 : index
    %17 = vector.load %arg8[%c0_25, %c1_26, %c22] : memref<4x18x40xf32, #tpu.memory_space<vmem>>, vector<4x16x16xf32>
    tpu.vector_store %arg8[%c0_25, %c1_26, %c22], %16 {strides = array<i32>} : memref<4x18x40xf32, #tpu.memory_space<vmem>>, vector<4x16x16xf32>,
    %cst_27 = arith.constant 0.000000e+00 : f32
    %18 = vector.broadcast %cst_27 : f32 to vector<16x40xf32>
    %c0_28 = arith.constant 0 : index
    %19 = memref.load %arg2[%c0_28] : memref<48xf32, #tpu.memory_space<smem>>
    %c0_29 = arith.constant 0 : index
    %c0_30 = arith.constant 0 : index
    %c0_31 = arith.constant 0 : index
    %20 = vector.load %arg8[%c0_29, %c0_30, %c0_31] : memref<4x18x40xf32, #tpu.memory_space<vmem>>, vector<1x16x40xf32>
    %21 = vector.shape_cast %20 : vector<1x16x40xf32> to vector<16x40xf32>
    %22 = vector.broadcast %19 : f32 to vector<16x40xf32>
    %23 = arith.mulf %22, %21 : vector<16x40xf32>
    %24 = arith.addf %18, %23 : vector<16x40xf32>
    %c1_32 = arith.constant 1 : index
    %25 = memref.load %arg2[%c1_32] : memref<48xf32, #tpu.memory_space<smem>>
    %c0_33 = arith.constant 0 : index
    %c1_34 = arith.constant 1 : index
    %c0_35 = arith.constant 0 : index
    %26 = vector.load %arg8[%c0_33, %c1_34, %c0_35] : memref<4x18x40xf32, #tpu.memory_space<vmem>>, vector<1x16x40xf32>
    %27 = vector.shape_cast %26 : vector<1x16x40xf32> to vector<16x40xf32>
    %28 = vector.broadcast %25 : f32 to vector<16x40xf32>
    %29 = arith.mulf %28, %27 : vector<16x40xf32>
    %30 = arith.addf %24, %29 : vector<16x40xf32>
    %c2_36 = arith.constant 2 : index
    %31 = memref.load %arg2[%c2_36] : memref<48xf32, #tpu.memory_space<smem>>
    %c0_37 = arith.constant 0 : index
    %c2_38 = arith.constant 2 : index
    %c0_39 = arith.constant 0 : index
    %32 = vector.load %arg8[%c0_37, %c2_38, %c0_39] : memref<4x18x40xf32, #tpu.memory_space<vmem>>, vector<1x16x40xf32>
    %33 = vector.shape_cast %32 : vector<1x16x40xf32> to vector<16x40xf32>
    %34 = vector.broadcast %31 : f32 to vector<16x40xf32>
    %35 = arith.mulf %34, %33 : vector<16x40xf32>
    %36 = arith.addf %30, %35 : vector<16x40xf32>
    %c3 = arith.constant 3 : index
    %37 = memref.load %arg2[%c3] : memref<48xf32, #tpu.memory_space<smem>>
    %c1_40 = arith.constant 1 : index
    %c0_41 = arith.constant 0 : index
    %c0_42 = arith.constant 0 : index
    %38 = vector.load %arg8[%c1_40, %c0_41, %c0_42] : memref<4x18x40xf32, #tpu.memory_space<vmem>>, vector<1x16x40xf32>
    %39 = vector.shape_cast %38 : vector<1x16x40xf32> to vector<16x40xf32>
    %40 = vector.broadcast %37 : f32 to vector<16x40xf32>
    %41 = arith.mulf %40, %39 : vector<16x40xf32>
    %42 = arith.addf %36, %41 : vector<16x40xf32>
    %c4 = arith.constant 4 : index
    %43 = memref.load %arg2[%c4] : memref<48xf32, #tpu.memory_space<smem>>
    %c1_43 = arith.constant 1 : index
    %c1_44 = arith.constant 1 : index
    %c0_45 = arith.constant 0 : index
    %44 = vector.load %arg8[%c1_43, %c1_44, %c0_45] : memref<4x18x40xf32, #tpu.memory_space<vmem>>, vector<1x16x40xf32>
    %45 = vector.shape_cast %44 : vector<1x16x40xf32> to vector<16x40xf32>
    %46 = vector.broadcast %43 : f32 to vector<16x40xf32>
    %47 = arith.mulf %46, %45 : vector<16x40xf32>
    %48 = arith.addf %42, %47 : vector<16x40xf32>
    %c5 = arith.constant 5 : index
    %49 = memref.load %arg2[%c5] : memref<48xf32, #tpu.memory_space<smem>>
    %c1_46 = arith.constant 1 : index
    %c2_47 = arith.constant 2 : index
    %c0_48 = arith.constant 0 : index
    %50 = vector.load %arg8[%c1_46, %c2_47, %c0_48] : memref<4x18x40xf32, #tpu.memory_space<vmem>>, vector<1x16x40xf32>
    %51 = vector.shape_cast %50 : vector<1x16x40xf32> to vector<16x40xf32>
    %52 = vector.broadcast %49 : f32 to vector<16x40xf32>
    %53 = arith.mulf %52, %51 : vector<16x40xf32>
    %54 = arith.addf %48, %53 : vector<16x40xf32>
    %c6 = arith.constant 6 : index
    %55 = memref.load %arg2[%c6] : memref<48xf32, #tpu.memory_space<smem>>
    %c2_49 = arith.constant 2 : index
    %c0_50 = arith.constant 0 : index
    %c0_51 = arith.constant 0 : index
    %56 = vector.load %arg8[%c2_49, %c0_50, %c0_51] : memref<4x18x40xf32, #tpu.memory_space<vmem>>, vector<1x16x40xf32>
    %57 = vector.shape_cast %56 : vector<1x16x40xf32> to vector<16x40xf32>
    %58 = vector.broadcast %55 : f32 to vector<16x40xf32>
    %59 = arith.mulf %58, %57 : vector<16x40xf32>
    %60 = arith.addf %54, %59 : vector<16x40xf32>
    %c7 = arith.constant 7 : index
    %61 = memref.load %arg2[%c7] : memref<48xf32, #tpu.memory_space<smem>>
    %c2_52 = arith.constant 2 : index
    %c1_53 = arith.constant 1 : index
    %c0_54 = arith.constant 0 : index
    %62 = vector.load %arg8[%c2_52, %c1_53, %c0_54] : memref<4x18x40xf32, #tpu.memory_space<vmem>>, vector<1x16x40xf32>
    %63 = vector.shape_cast %62 : vector<1x16x40xf32> to vector<16x40xf32>
    %64 = vector.broadcast %61 : f32 to vector<16x40xf32>
    %65 = arith.mulf %64, %63 : vector<16x40xf32>
    %66 = arith.addf %60, %65 : vector<16x40xf32>
    %c8 = arith.constant 8 : index
    %67 = memref.load %arg2[%c8] : memref<48xf32, #tpu.memory_space<smem>>
    %c2_55 = arith.constant 2 : index
    %c2_56 = arith.constant 2 : index
    %c0_57 = arith.constant 0 : index
    %68 = vector.load %arg8[%c2_55, %c2_56, %c0_57] : memref<4x18x40xf32, #tpu.memory_space<vmem>>, vector<1x16x40xf32>
    %69 = vector.shape_cast %68 : vector<1x16x40xf32> to vector<16x40xf32>
    %70 = vector.broadcast %67 : f32 to vector<16x40xf32>
    %71 = arith.mulf %70, %69 : vector<16x40xf32>
    %72 = arith.addf %66, %71 : vector<16x40xf32>
    %c9 = arith.constant 9 : index
    %73 = memref.load %arg2[%c9] : memref<48xf32, #tpu.memory_space<smem>>
    %c3_58 = arith.constant 3 : index
    %c0_59 = arith.constant 0 : index
    %c0_60 = arith.constant 0 : index
    %74 = vector.load %arg8[%c3_58, %c0_59, %c0_60] : memref<4x18x40xf32, #tpu.memory_space<vmem>>, vector<1x16x40xf32>
    %75 = vector.shape_cast %74 : vector<1x16x40xf32> to vector<16x40xf32>
    %76 = vector.broadcast %73 : f32 to vector<16x40xf32>
    %77 = arith.mulf %76, %75 : vector<16x40xf32>
    %78 = arith.addf %72, %77 : vector<16x40xf32>
    %c10 = arith.constant 10 : index
    %79 = memref.load %arg2[%c10] : memref<48xf32, #tpu.memory_space<smem>>
    %c3_61 = arith.constant 3 : index
    %c1_62 = arith.constant 1 : index
    %c0_63 = arith.constant 0 : index
    %80 = vector.load %arg8[%c3_61, %c1_62, %c0_63] : memref<4x18x40xf32, #tpu.memory_space<vmem>>, vector<1x16x40xf32>
    %81 = vector.shape_cast %80 : vector<1x16x40xf32> to vector<16x40xf32>
    %82 = vector.broadcast %79 : f32 to vector<16x40xf32>
    %83 = arith.mulf %82, %81 : vector<16x40xf32>
    %84 = arith.addf %78, %83 : vector<16x40xf32>
    %c11 = arith.constant 11 : index
    %85 = memref.load %arg2[%c11] : memref<48xf32, #tpu.memory_space<smem>>
    %c3_64 = arith.constant 3 : index
    %c2_65 = arith.constant 2 : index
    %c0_66 = arith.constant 0 : index
    %86 = vector.load %arg8[%c3_64, %c2_65, %c0_66] : memref<4x18x40xf32, #tpu.memory_space<vmem>>, vector<1x16x40xf32>
    %87 = vector.shape_cast %86 : vector<1x16x40xf32> to vector<16x40xf32>
    %88 = vector.broadcast %85 : f32 to vector<16x40xf32>
    %89 = arith.mulf %88, %87 : vector<16x40xf32>
    %90 = arith.addf %84, %89 : vector<16x40xf32>
    %c0_67 = arith.constant 0 : index
    %c0_68 = arith.constant 0 : index
    %c0_69 = arith.constant 0 : index
    %91 = vector.load %arg9[%c0_67, %c0_68, %c0_69] : memref<4x16x40xf32, #tpu.memory_space<vmem>>, vector<1x16x40xf32>
    %92 = vector.shape_cast %91 : vector<1x16x40xf32> to vector<16x40xf32>
    %93 = vector.shape_cast %90 : vector<16x40xf32> to vector<1x16x40xf32>
    tpu.vector_store %arg9[%c0_67, %c0_68, %c0_69], %93 {strides = array<i32>} : memref<4x16x40xf32, #tpu.memory_space<vmem>>, vector<1x16x40xf32>,
    %cst_70 = arith.constant 0.000000e+00 : f32
    %94 = vector.broadcast %cst_70 : f32 to vector<16x40xf32>
    %c12 = arith.constant 12 : index
    %95 = memref.load %arg2[%c12] : memref<48xf32, #tpu.memory_space<smem>>
    %c0_71 = arith.constant 0 : index
    %c0_72 = arith.constant 0 : index
    %c0_73 = arith.constant 0 : index
    %96 = vector.load %arg8[%c0_71, %c0_72, %c0_73] : memref<4x18x40xf32, #tpu.memory_space<vmem>>, vector<1x16x40xf32>
    %97 = vector.shape_cast %96 : vector<1x16x40xf32> to vector<16x40xf32>
    %98 = vector.broadcast %95 : f32 to vector<16x40xf32>
    %99 = arith.mulf %98, %97 : vector<16x40xf32>
    %100 = arith.addf %94, %99 : vector<16x40xf32>
    %c13 = arith.constant 13 : index
    %101 = memref.load %arg2[%c13] : memref<48xf32, #tpu.memory_space<smem>>
    %c0_74 = arith.constant 0 : index
    %c1_75 = arith.constant 1 : index
    %c0_76 = arith.constant 0 : index
    %102 = vector.load %arg8[%c0_74, %c1_75, %c0_76] : memref<4x18x40xf32, #tpu.memory_space<vmem>>, vector<1x16x40xf32>
    %103 = vector.shape_cast %102 : vector<1x16x40xf32> to vector<16x40xf32>
    %104 = vector.broadcast %101 : f32 to vector<16x40xf32>
    %105 = arith.mulf %104, %103 : vector<16x40xf32>
    %106 = arith.addf %100, %105 : vector<16x40xf32>
    %c14 = arith.constant 14 : index
    %107 = memref.load %arg2[%c14] : memref<48xf32, #tpu.memory_space<smem>>
    %c0_77 = arith.constant 0 : index
    %c2_78 = arith.constant 2 : index
    %c0_79 = arith.constant 0 : index
    %108 = vector.load %arg8[%c0_77, %c2_78, %c0_79] : memref<4x18x40xf32, #tpu.memory_space<vmem>>, vector<1x16x40xf32>
    %109 = vector.shape_cast %108 : vector<1x16x40xf32> to vector<16x40xf32>
    %110 = vector.broadcast %107 : f32 to vector<16x40xf32>
    %111 = arith.mulf %110, %109 : vector<16x40xf32>
    %112 = arith.addf %106, %111 : vector<16x40xf32>
    %c15 = arith.constant 15 : index
    %113 = memref.load %arg2[%c15] : memref<48xf32, #tpu.memory_space<smem>>
    %c1_80 = arith.constant 1 : index
    %c0_81 = arith.constant 0 : index
    %c0_82 = arith.constant 0 : index
    %114 = vector.load %arg8[%c1_80, %c0_81, %c0_82] : memref<4x18x40xf32, #tpu.memory_space<vmem>>, vector<1x16x40xf32>
    %115 = vector.shape_cast %114 : vector<1x16x40xf32> to vector<16x40xf32>
    %116 = vector.broadcast %113 : f32 to vector<16x40xf32>
    %117 = arith.mulf %116, %115 : vector<16x40xf32>
    %118 = arith.addf %112, %117 : vector<16x40xf32>
    %c16 = arith.constant 16 : index
    %119 = memref.load %arg2[%c16] : memref<48xf32, #tpu.memory_space<smem>>
    %c1_83 = arith.constant 1 : index
    %c1_84 = arith.constant 1 : index
    %c0_85 = arith.constant 0 : index
    %120 = vector.load %arg8[%c1_83, %c1_84, %c0_85] : memref<4x18x40xf32, #tpu.memory_space<vmem>>, vector<1x16x40xf32>
    %121 = vector.shape_cast %120 : vector<1x16x40xf32> to vector<16x40xf32>
    %122 = vector.broadcast %119 : f32 to vector<16x40xf32>
    %123 = arith.mulf %122, %121 : vector<16x40xf32>
    %124 = arith.addf %118, %123 : vector<16x40xf32>
    %c17_86 = arith.constant 17 : index
    %125 = memref.load %arg2[%c17_86] : memref<48xf32, #tpu.memory_space<smem>>
    %c1_87 = arith.constant 1 : index
    %c2_88 = arith.constant 2 : index
    %c0_89 = arith.constant 0 : index
    %126 = vector.load %arg8[%c1_87, %c2_88, %c0_89] : memref<4x18x40xf32, #tpu.memory_space<vmem>>, vector<1x16x40xf32>
    %127 = vector.shape_cast %126 : vector<1x16x40xf32> to vector<16x40xf32>
    %128 = vector.broadcast %125 : f32 to vector<16x40xf32>
    %129 = arith.mulf %128, %127 : vector<16x40xf32>
    %130 = arith.addf %124, %129 : vector<16x40xf32>
    %c18_90 = arith.constant 18 : index
    %131 = memref.load %arg2[%c18_90] : memref<48xf32, #tpu.memory_space<smem>>
    %c2_91 = arith.constant 2 : index
    %c0_92 = arith.constant 0 : index
    %c0_93 = arith.constant 0 : index
    %132 = vector.load %arg8[%c2_91, %c0_92, %c0_93] : memref<4x18x40xf32, #tpu.memory_space<vmem>>, vector<1x16x40xf32>
    %133 = vector.shape_cast %132 : vector<1x16x40xf32> to vector<16x40xf32>
    %134 = vector.broadcast %131 : f32 to vector<16x40xf32>
    %135 = arith.mulf %134, %133 : vector<16x40xf32>
    %136 = arith.addf %130, %135 : vector<16x40xf32>
    %c19 = arith.constant 19 : index
    %137 = memref.load %arg2[%c19] : memref<48xf32, #tpu.memory_space<smem>>
    %c2_94 = arith.constant 2 : index
    %c1_95 = arith.constant 1 : index
    %c0_96 = arith.constant 0 : index
    %138 = vector.load %arg8[%c2_94, %c1_95, %c0_96] : memref<4x18x40xf32, #tpu.memory_space<vmem>>, vector<1x16x40xf32>
    %139 = vector.shape_cast %138 : vector<1x16x40xf32> to vector<16x40xf32>
    %140 = vector.broadcast %137 : f32 to vector<16x40xf32>
    %141 = arith.mulf %140, %139 : vector<16x40xf32>
    %142 = arith.addf %136, %141 : vector<16x40xf32>
    %c20_97 = arith.constant 20 : index
    %143 = memref.load %arg2[%c20_97] : memref<48xf32, #tpu.memory_space<smem>>
    %c2_98 = arith.constant 2 : index
    %c2_99 = arith.constant 2 : index
    %c0_100 = arith.constant 0 : index
    %144 = vector.load %arg8[%c2_98, %c2_99, %c0_100] : memref<4x18x40xf32, #tpu.memory_space<vmem>>, vector<1x16x40xf32>
    %145 = vector.shape_cast %144 : vector<1x16x40xf32> to vector<16x40xf32>
    %146 = vector.broadcast %143 : f32 to vector<16x40xf32>
    %147 = arith.mulf %146, %145 : vector<16x40xf32>
    %148 = arith.addf %142, %147 : vector<16x40xf32>
    %c21 = arith.constant 21 : index
    %149 = memref.load %arg2[%c21] : memref<48xf32, #tpu.memory_space<smem>>
    %c3_101 = arith.constant 3 : index
    %c0_102 = arith.constant 0 : index
    %c0_103 = arith.constant 0 : index
    %150 = vector.load %arg8[%c3_101, %c0_102, %c0_103] : memref<4x18x40xf32, #tpu.memory_space<vmem>>, vector<1x16x40xf32>
    %151 = vector.shape_cast %150 : vector<1x16x40xf32> to vector<16x40xf32>
    %152 = vector.broadcast %149 : f32 to vector<16x40xf32>
    %153 = arith.mulf %152, %151 : vector<16x40xf32>
    %154 = arith.addf %148, %153 : vector<16x40xf32>
    %c22_104 = arith.constant 22 : index
    %155 = memref.load %arg2[%c22_104] : memref<48xf32, #tpu.memory_space<smem>>
    %c3_105 = arith.constant 3 : index
    %c1_106 = arith.constant 1 : index
    %c0_107 = arith.constant 0 : index
    %156 = vector.load %arg8[%c3_105, %c1_106, %c0_107] : memref<4x18x40xf32, #tpu.memory_space<vmem>>, vector<1x16x40xf32>
    %157 = vector.shape_cast %156 : vector<1x16x40xf32> to vector<16x40xf32>
    %158 = vector.broadcast %155 : f32 to vector<16x40xf32>
    %159 = arith.mulf %158, %157 : vector<16x40xf32>
    %160 = arith.addf %154, %159 : vector<16x40xf32>
    %c23 = arith.constant 23 : index
    %161 = memref.load %arg2[%c23] : memref<48xf32, #tpu.memory_space<smem>>
    %c3_108 = arith.constant 3 : index
    %c2_109 = arith.constant 2 : index
    %c0_110 = arith.constant 0 : index
    %162 = vector.load %arg8[%c3_108, %c2_109, %c0_110] : memref<4x18x40xf32, #tpu.memory_space<vmem>>, vector<1x16x40xf32>
    %163 = vector.shape_cast %162 : vector<1x16x40xf32> to vector<16x40xf32>
    %164 = vector.broadcast %161 : f32 to vector<16x40xf32>
    %165 = arith.mulf %164, %163 : vector<16x40xf32>
    %166 = arith.addf %160, %165 : vector<16x40xf32>
    %c1_111 = arith.constant 1 : index
    %c0_112 = arith.constant 0 : index
    %c0_113 = arith.constant 0 : index
    %167 = vector.load %arg9[%c1_111, %c0_112, %c0_113] : memref<4x16x40xf32, #tpu.memory_space<vmem>>, vector<1x16x40xf32>
    %168 = vector.shape_cast %167 : vector<1x16x40xf32> to vector<16x40xf32>
    %169 = vector.shape_cast %166 : vector<16x40xf32> to vector<1x16x40xf32>
    tpu.vector_store %arg9[%c1_111, %c0_112, %c0_113], %169 {strides = array<i32>} : memref<4x16x40xf32, #tpu.memory_space<vmem>>, vector<1x16x40xf32>,
    %cst_114 = arith.constant 0.000000e+00 : f32
    %170 = vector.broadcast %cst_114 : f32 to vector<16x40xf32>
    %c24 = arith.constant 24 : index
    %171 = memref.load %arg2[%c24] : memref<48xf32, #tpu.memory_space<smem>>
    %c0_115 = arith.constant 0 : index
    %c0_116 = arith.constant 0 : index
    %c0_117 = arith.constant 0 : index
    %172 = vector.load %arg8[%c0_115, %c0_116, %c0_117] : memref<4x18x40xf32, #tpu.memory_space<vmem>>, vector<1x16x40xf32>
    %173 = vector.shape_cast %172 : vector<1x16x40xf32> to vector<16x40xf32>
    %174 = vector.broadcast %171 : f32 to vector<16x40xf32>
    %175 = arith.mulf %174, %173 : vector<16x40xf32>
    %176 = arith.addf %170, %175 : vector<16x40xf32>
    %c25 = arith.constant 25 : index
    %177 = memref.load %arg2[%c25] : memref<48xf32, #tpu.memory_space<smem>>
    %c0_118 = arith.constant 0 : index
    %c1_119 = arith.constant 1 : index
    %c0_120 = arith.constant 0 : index
    %178 = vector.load %arg8[%c0_118, %c1_119, %c0_120] : memref<4x18x40xf32, #tpu.memory_space<vmem>>, vector<1x16x40xf32>
    %179 = vector.shape_cast %178 : vector<1x16x40xf32> to vector<16x40xf32>
    %180 = vector.broadcast %177 : f32 to vector<16x40xf32>
    %181 = arith.mulf %180, %179 : vector<16x40xf32>
    %182 = arith.addf %176, %181 : vector<16x40xf32>
    %c26 = arith.constant 26 : index
    %183 = memref.load %arg2[%c26] : memref<48xf32, #tpu.memory_space<smem>>
    %c0_121 = arith.constant 0 : index
    %c2_122 = arith.constant 2 : index
    %c0_123 = arith.constant 0 : index
    %184 = vector.load %arg8[%c0_121, %c2_122, %c0_123] : memref<4x18x40xf32, #tpu.memory_space<vmem>>, vector<1x16x40xf32>
    %185 = vector.shape_cast %184 : vector<1x16x40xf32> to vector<16x40xf32>
    %186 = vector.broadcast %183 : f32 to vector<16x40xf32>
    %187 = arith.mulf %186, %185 : vector<16x40xf32>
    %188 = arith.addf %182, %187 : vector<16x40xf32>
    %c27 = arith.constant 27 : index
    %189 = memref.load %arg2[%c27] : memref<48xf32, #tpu.memory_space<smem>>
    %c1_124 = arith.constant 1 : index
    %c0_125 = arith.constant 0 : index
    %c0_126 = arith.constant 0 : index
    %190 = vector.load %arg8[%c1_124, %c0_125, %c0_126] : memref<4x18x40xf32, #tpu.memory_space<vmem>>, vector<1x16x40xf32>
    %191 = vector.shape_cast %190 : vector<1x16x40xf32> to vector<16x40xf32>
    %192 = vector.broadcast %189 : f32 to vector<16x40xf32>
    %193 = arith.mulf %192, %191 : vector<16x40xf32>
    %194 = arith.addf %188, %193 : vector<16x40xf32>
    %c28 = arith.constant 28 : index
    %195 = memref.load %arg2[%c28] : memref<48xf32, #tpu.memory_space<smem>>
    %c1_127 = arith.constant 1 : index
    %c1_128 = arith.constant 1 : index
    %c0_129 = arith.constant 0 : index
    %196 = vector.load %arg8[%c1_127, %c1_128, %c0_129] : memref<4x18x40xf32, #tpu.memory_space<vmem>>, vector<1x16x40xf32>
    %197 = vector.shape_cast %196 : vector<1x16x40xf32> to vector<16x40xf32>
    %198 = vector.broadcast %195 : f32 to vector<16x40xf32>
    %199 = arith.mulf %198, %197 : vector<16x40xf32>
    %200 = arith.addf %194, %199 : vector<16x40xf32>
    %c29 = arith.constant 29 : index
    %201 = memref.load %arg2[%c29] : memref<48xf32, #tpu.memory_space<smem>>
    %c1_130 = arith.constant 1 : index
    %c2_131 = arith.constant 2 : index
    %c0_132 = arith.constant 0 : index
    %202 = vector.load %arg8[%c1_130, %c2_131, %c0_132] : memref<4x18x40xf32, #tpu.memory_space<vmem>>, vector<1x16x40xf32>
    %203 = vector.shape_cast %202 : vector<1x16x40xf32> to vector<16x40xf32>
    %204 = vector.broadcast %201 : f32 to vector<16x40xf32>
    %205 = arith.mulf %204, %203 : vector<16x40xf32>
    %206 = arith.addf %200, %205 : vector<16x40xf32>
    %c30 = arith.constant 30 : index
    %207 = memref.load %arg2[%c30] : memref<48xf32, #tpu.memory_space<smem>>
    %c2_133 = arith.constant 2 : index
    %c0_134 = arith.constant 0 : index
    %c0_135 = arith.constant 0 : index
    %208 = vector.load %arg8[%c2_133, %c0_134, %c0_135] : memref<4x18x40xf32, #tpu.memory_space<vmem>>, vector<1x16x40xf32>
    %209 = vector.shape_cast %208 : vector<1x16x40xf32> to vector<16x40xf32>
    %210 = vector.broadcast %207 : f32 to vector<16x40xf32>
    %211 = arith.mulf %210, %209 : vector<16x40xf32>
    %212 = arith.addf %206, %211 : vector<16x40xf32>
    %c31 = arith.constant 31 : index
    %213 = memref.load %arg2[%c31] : memref<48xf32, #tpu.memory_space<smem>>
    %c2_136 = arith.constant 2 : index
    %c1_137 = arith.constant 1 : index
    %c0_138 = arith.constant 0 : index
    %214 = vector.load %arg8[%c2_136, %c1_137, %c0_138] : memref<4x18x40xf32, #tpu.memory_space<vmem>>, vector<1x16x40xf32>
    %215 = vector.shape_cast %214 : vector<1x16x40xf32> to vector<16x40xf32>
    %216 = vector.broadcast %213 : f32 to vector<16x40xf32>
    %217 = arith.mulf %216, %215 : vector<16x40xf32>
    %218 = arith.addf %212, %217 : vector<16x40xf32>
    %c32 = arith.constant 32 : index
    %219 = memref.load %arg2[%c32] : memref<48xf32, #tpu.memory_space<smem>>
    %c2_139 = arith.constant 2 : index
    %c2_140 = arith.constant 2 : index
    %c0_141 = arith.constant 0 : index
    %220 = vector.load %arg8[%c2_139, %c2_140, %c0_141] : memref<4x18x40xf32, #tpu.memory_space<vmem>>, vector<1x16x40xf32>
    %221 = vector.shape_cast %220 : vector<1x16x40xf32> to vector<16x40xf32>
    %222 = vector.broadcast %219 : f32 to vector<16x40xf32>
    %223 = arith.mulf %222, %221 : vector<16x40xf32>
    %224 = arith.addf %218, %223 : vector<16x40xf32>
    %c33 = arith.constant 33 : index
    %225 = memref.load %arg2[%c33] : memref<48xf32, #tpu.memory_space<smem>>
    %c3_142 = arith.constant 3 : index
    %c0_143 = arith.constant 0 : index
    %c0_144 = arith.constant 0 : index
    %226 = vector.load %arg8[%c3_142, %c0_143, %c0_144] : memref<4x18x40xf32, #tpu.memory_space<vmem>>, vector<1x16x40xf32>
    %227 = vector.shape_cast %226 : vector<1x16x40xf32> to vector<16x40xf32>
    %228 = vector.broadcast %225 : f32 to vector<16x40xf32>
    %229 = arith.mulf %228, %227 : vector<16x40xf32>
    %230 = arith.addf %224, %229 : vector<16x40xf32>
    %c34 = arith.constant 34 : index
    %231 = memref.load %arg2[%c34] : memref<48xf32, #tpu.memory_space<smem>>
    %c3_145 = arith.constant 3 : index
    %c1_146 = arith.constant 1 : index
    %c0_147 = arith.constant 0 : index
    %232 = vector.load %arg8[%c3_145, %c1_146, %c0_147] : memref<4x18x40xf32, #tpu.memory_space<vmem>>, vector<1x16x40xf32>
    %233 = vector.shape_cast %232 : vector<1x16x40xf32> to vector<16x40xf32>
    %234 = vector.broadcast %231 : f32 to vector<16x40xf32>
    %235 = arith.mulf %234, %233 : vector<16x40xf32>
    %236 = arith.addf %230, %235 : vector<16x40xf32>
    %c35 = arith.constant 35 : index
    %237 = memref.load %arg2[%c35] : memref<48xf32, #tpu.memory_space<smem>>
    %c3_148 = arith.constant 3 : index
    %c2_149 = arith.constant 2 : index
    %c0_150 = arith.constant 0 : index
    %238 = vector.load %arg8[%c3_148, %c2_149, %c0_150] : memref<4x18x40xf32, #tpu.memory_space<vmem>>, vector<1x16x40xf32>
    %239 = vector.shape_cast %238 : vector<1x16x40xf32> to vector<16x40xf32>
    %240 = vector.broadcast %237 : f32 to vector<16x40xf32>
    %241 = arith.mulf %240, %239 : vector<16x40xf32>
    %242 = arith.addf %236, %241 : vector<16x40xf32>
    %c2_151 = arith.constant 2 : index
    %c0_152 = arith.constant 0 : index
    %c0_153 = arith.constant 0 : index
    %243 = vector.load %arg9[%c2_151, %c0_152, %c0_153] : memref<4x16x40xf32, #tpu.memory_space<vmem>>, vector<1x16x40xf32>
    %244 = vector.shape_cast %243 : vector<1x16x40xf32> to vector<16x40xf32>
    %245 = vector.shape_cast %242 : vector<16x40xf32> to vector<1x16x40xf32>
    tpu.vector_store %arg9[%c2_151, %c0_152, %c0_153], %245 {strides = array<i32>} : memref<4x16x40xf32, #tpu.memory_space<vmem>>, vector<1x16x40xf32>,
    %cst_154 = arith.constant 0.000000e+00 : f32
    %246 = vector.broadcast %cst_154 : f32 to vector<16x40xf32>
    %c36 = arith.constant 36 : index
    %247 = memref.load %arg2[%c36] : memref<48xf32, #tpu.memory_space<smem>>
    %c0_155 = arith.constant 0 : index
    %c0_156 = arith.constant 0 : index
    %c0_157 = arith.constant 0 : index
    %248 = vector.load %arg8[%c0_155, %c0_156, %c0_157] : memref<4x18x40xf32, #tpu.memory_space<vmem>>, vector<1x16x40xf32>
    %249 = vector.shape_cast %248 : vector<1x16x40xf32> to vector<16x40xf32>
    %250 = vector.broadcast %247 : f32 to vector<16x40xf32>
    %251 = arith.mulf %250, %249 : vector<16x40xf32>
    %252 = arith.addf %246, %251 : vector<16x40xf32>
    %c37 = arith.constant 37 : index
    %253 = memref.load %arg2[%c37] : memref<48xf32, #tpu.memory_space<smem>>
    %c0_158 = arith.constant 0 : index
    %c1_159 = arith.constant 1 : index
    %c0_160 = arith.constant 0 : index
    %254 = vector.load %arg8[%c0_158, %c1_159, %c0_160] : memref<4x18x40xf32, #tpu.memory_space<vmem>>, vector<1x16x40xf32>
    %255 = vector.shape_cast %254 : vector<1x16x40xf32> to vector<16x40xf32>
    %256 = vector.broadcast %253 : f32 to vector<16x40xf32>
    %257 = arith.mulf %256, %255 : vector<16x40xf32>
    %258 = arith.addf %252, %257 : vector<16x40xf32>
    %c38_161 = arith.constant 38 : index
    %259 = memref.load %arg2[%c38_161] : memref<48xf32, #tpu.memory_space<smem>>
    %c0_162 = arith.constant 0 : index
    %c2_163 = arith.constant 2 : index
    %c0_164 = arith.constant 0 : index
    %260 = vector.load %arg8[%c0_162, %c2_163, %c0_164] : memref<4x18x40xf32, #tpu.memory_space<vmem>>, vector<1x16x40xf32>
    %261 = vector.shape_cast %260 : vector<1x16x40xf32> to vector<16x40xf32>
    %262 = vector.broadcast %259 : f32 to vector<16x40xf32>
    %263 = arith.mulf %262, %261 : vector<16x40xf32>
    %264 = arith.addf %258, %263 : vector<16x40xf32>
    %c39 = arith.constant 39 : index
    %265 = memref.load %arg2[%c39] : memref<48xf32, #tpu.memory_space<smem>>
    %c1_165 = arith.constant 1 : index
    %c0_166 = arith.constant 0 : index
    %c0_167 = arith.constant 0 : index
    %266 = vector.load %arg8[%c1_165, %c0_166, %c0_167] : memref<4x18x40xf32, #tpu.memory_space<vmem>>, vector<1x16x40xf32>
    %267 = vector.shape_cast %266 : vector<1x16x40xf32> to vector<16x40xf32>
    %268 = vector.broadcast %265 : f32 to vector<16x40xf32>
    %269 = arith.mulf %268, %267 : vector<16x40xf32>
    %270 = arith.addf %264, %269 : vector<16x40xf32>
    %c40 = arith.constant 40 : index
    %271 = memref.load %arg2[%c40] : memref<48xf32, #tpu.memory_space<smem>>
    %c1_168 = arith.constant 1 : index
    %c1_169 = arith.constant 1 : index
    %c0_170 = arith.constant 0 : index
    %272 = vector.load %arg8[%c1_168, %c1_169, %c0_170] : memref<4x18x40xf32, #tpu.memory_space<vmem>>, vector<1x16x40xf32>
    %273 = vector.shape_cast %272 : vector<1x16x40xf32> to vector<16x40xf32>
    %274 = vector.broadcast %271 : f32 to vector<16x40xf32>
    %275 = arith.mulf %274, %273 : vector<16x40xf32>
    %276 = arith.addf %270, %275 : vector<16x40xf32>
    %c41 = arith.constant 41 : index
    %277 = memref.load %arg2[%c41] : memref<48xf32, #tpu.memory_space<smem>>
    %c1_171 = arith.constant 1 : index
    %c2_172 = arith.constant 2 : index
    %c0_173 = arith.constant 0 : index
    %278 = vector.load %arg8[%c1_171, %c2_172, %c0_173] : memref<4x18x40xf32, #tpu.memory_space<vmem>>, vector<1x16x40xf32>
    %279 = vector.shape_cast %278 : vector<1x16x40xf32> to vector<16x40xf32>
    %280 = vector.broadcast %277 : f32 to vector<16x40xf32>
    %281 = arith.mulf %280, %279 : vector<16x40xf32>
    %282 = arith.addf %276, %281 : vector<16x40xf32>
    %c42 = arith.constant 42 : index
    %283 = memref.load %arg2[%c42] : memref<48xf32, #tpu.memory_space<smem>>
    %c2_174 = arith.constant 2 : index
    %c0_175 = arith.constant 0 : index
    %c0_176 = arith.constant 0 : index
    %284 = vector.load %arg8[%c2_174, %c0_175, %c0_176] : memref<4x18x40xf32, #tpu.memory_space<vmem>>, vector<1x16x40xf32>
    %285 = vector.shape_cast %284 : vector<1x16x40xf32> to vector<16x40xf32>
    %286 = vector.broadcast %283 : f32 to vector<16x40xf32>
    %287 = arith.mulf %286, %285 : vector<16x40xf32>
    %288 = arith.addf %282, %287 : vector<16x40xf32>
    %c43 = arith.constant 43 : index
    %289 = memref.load %arg2[%c43] : memref<48xf32, #tpu.memory_space<smem>>
    %c2_177 = arith.constant 2 : index
    %c1_178 = arith.constant 1 : index
    %c0_179 = arith.constant 0 : index
    %290 = vector.load %arg8[%c2_177, %c1_178, %c0_179] : memref<4x18x40xf32, #tpu.memory_space<vmem>>, vector<1x16x40xf32>
    %291 = vector.shape_cast %290 : vector<1x16x40xf32> to vector<16x40xf32>
    %292 = vector.broadcast %289 : f32 to vector<16x40xf32>
    %293 = arith.mulf %292, %291 : vector<16x40xf32>
    %294 = arith.addf %288, %293 : vector<16x40xf32>
    %c44 = arith.constant 44 : index
    %295 = memref.load %arg2[%c44] : memref<48xf32, #tpu.memory_space<smem>>
    %c2_180 = arith.constant 2 : index
    %c2_181 = arith.constant 2 : index
    %c0_182 = arith.constant 0 : index
    %296 = vector.load %arg8[%c2_180, %c2_181, %c0_182] : memref<4x18x40xf32, #tpu.memory_space<vmem>>, vector<1x16x40xf32>
    %297 = vector.shape_cast %296 : vector<1x16x40xf32> to vector<16x40xf32>
    %298 = vector.broadcast %295 : f32 to vector<16x40xf32>
    %299 = arith.mulf %298, %297 : vector<16x40xf32>
    %300 = arith.addf %294, %299 : vector<16x40xf32>
    %c45 = arith.constant 45 : index
    %301 = memref.load %arg2[%c45] : memref<48xf32, #tpu.memory_space<smem>>
    %c3_183 = arith.constant 3 : index
    %c0_184 = arith.constant 0 : index
    %c0_185 = arith.constant 0 : index
    %302 = vector.load %arg8[%c3_183, %c0_184, %c0_185] : memref<4x18x40xf32, #tpu.memory_space<vmem>>, vector<1x16x40xf32>
    %303 = vector.shape_cast %302 : vector<1x16x40xf32> to vector<16x40xf32>
    %304 = vector.broadcast %301 : f32 to vector<16x40xf32>
    %305 = arith.mulf %304, %303 : vector<16x40xf32>
    %306 = arith.addf %300, %305 : vector<16x40xf32>
    %c46 = arith.constant 46 : index
    %307 = memref.load %arg2[%c46] : memref<48xf32, #tpu.memory_space<smem>>
    %c3_186 = arith.constant 3 : index
    %c1_187 = arith.constant 1 : index
    %c0_188 = arith.constant 0 : index
    %308 = vector.load %arg8[%c3_186, %c1_187, %c0_188] : memref<4x18x40xf32, #tpu.memory_space<vmem>>, vector<1x16x40xf32>
    %309 = vector.shape_cast %308 : vector<1x16x40xf32> to vector<16x40xf32>
    %310 = vector.broadcast %307 : f32 to vector<16x40xf32>
    %311 = arith.mulf %310, %309 : vector<16x40xf32>
    %312 = arith.addf %306, %311 : vector<16x40xf32>
    %c47 = arith.constant 47 : index
    %313 = memref.load %arg2[%c47] : memref<48xf32, #tpu.memory_space<smem>>
    %c3_189 = arith.constant 3 : index
    %c2_190 = arith.constant 2 : index
    %c0_191 = arith.constant 0 : index
    %314 = vector.load %arg8[%c3_189, %c2_190, %c0_191] : memref<4x18x40xf32, #tpu.memory_space<vmem>>, vector<1x16x40xf32>
    %315 = vector.shape_cast %314 : vector<1x16x40xf32> to vector<16x40xf32>
    %316 = vector.broadcast %313 : f32 to vector<16x40xf32>
    %317 = arith.mulf %316, %315 : vector<16x40xf32>
    %318 = arith.addf %312, %317 : vector<16x40xf32>
    %c3_192 = arith.constant 3 : index
    %c0_193 = arith.constant 0 : index
    %c0_194 = arith.constant 0 : index
    %319 = vector.load %arg9[%c3_192, %c0_193, %c0_194] : memref<4x16x40xf32, #tpu.memory_space<vmem>>, vector<1x16x40xf32>
    %320 = vector.shape_cast %319 : vector<1x16x40xf32> to vector<16x40xf32>
    %321 = vector.shape_cast %318 : vector<16x40xf32> to vector<1x16x40xf32>
    tpu.vector_store %arg9[%c3_192, %c0_193, %c0_194], %321 {strides = array<i32>} : memref<4x16x40xf32, #tpu.memory_space<vmem>>, vector<1x16x40xf32>,
    %cst_195 = arith.constant 0.000000e+00 : f32
    %322 = vector.broadcast %cst_195 : f32 to vector<1x8x1x40xf32>
    %c0_196 = arith.constant 0 : index
    %c0_197 = arith.constant 0 : index
    %c0_198 = arith.constant 0 : index
    %c0_199 = arith.constant 0 : index
    %323 = vector.load %arg5[%c0_196, %c0_197, %c0_198, %c0_199] : memref<1x8x18x40xf32, #tpu.memory_space<vmem>>, vector<1x8x1x40xf32>
    tpu.vector_store %arg5[%c0_196, %c0_197, %c0_198, %c0_199], %322 {strides = array<i32>} : memref<1x8x18x40xf32, #tpu.memory_space<vmem>>, vector<1x8x1x40xf32>,
    %c0_200 = arith.constant 0 : index
    %c0_201 = arith.constant 0 : index
    %c17_202 = arith.constant 17 : index
    %c0_203 = arith.constant 0 : index
    %324 = vector.load %arg5[%c0_200, %c0_201, %c17_202, %c0_203] : memref<1x8x18x40xf32, #tpu.memory_space<vmem>>, vector<1x8x1x40xf32>
    tpu.vector_store %arg5[%c0_200, %c0_201, %c17_202, %c0_203], %322 {strides = array<i32>} : memref<1x8x18x40xf32, #tpu.memory_space<vmem>>, vector<1x8x1x40xf32>,
    %cst_204 = arith.constant 0.000000e+00 : f32
    %325 = vector.broadcast %cst_204 : f32 to vector<1x8x16x2xf32>
    %c0_205 = arith.constant 0 : index
    %c0_206 = arith.constant 0 : index
    %c1_207 = arith.constant 1 : index
    %c38_208 = arith.constant 38 : index
    %326 = vector.load %arg5[%c0_205, %c0_206, %c1_207, %c38_208] : memref<1x8x18x40xf32, #tpu.memory_space<vmem>>, vector<1x8x16x2xf32>
    tpu.vector_store %arg5[%c0_205, %c0_206, %c1_207, %c38_208], %325 {strides = array<i32>} : memref<1x8x18x40xf32, #tpu.memory_space<vmem>>, vector<1x8x16x2xf32>,
    %c0_209 = arith.constant 0 : index
    %c0_210 = arith.constant 0 : index
    %327 = vector.load %arg4[%c0_209, %c0_210] : memref<1x38xf32, #tpu.memory_space<vmem>>, vector<1x38xf32>
    %cst_211 = arith.constant 0.000000e+00 : f32
    %328 = vector.broadcast %cst_211 : f32 to vector<16x38xf32>
    %c0_212 = arith.constant 0 : index
    %329 = memref.load %arg3[%c0_212] : memref<96xf32, #tpu.memory_space<smem>>
    %c0_213 = arith.constant 0 : index
    %c0_214 = arith.constant 0 : index
    %c0_215 = arith.constant 0 : index
    %330 = vector.load %arg9[%c0_213, %c0_214, %c0_215] : memref<4x16x40xf32, #tpu.memory_space<vmem>>, vector<1x16x38xf32>
    %331 = vector.shape_cast %330 : vector<1x16x38xf32> to vector<16x38xf32>
    %332 = vector.broadcast %329 : f32 to vector<16x38xf32>
    %333 = arith.mulf %332, %331 : vector<16x38xf32>
    %334 = arith.addf %328, %333 : vector<16x38xf32>
    %c1_216 = arith.constant 1 : index
    %335 = memref.load %arg3[%c1_216] : memref<96xf32, #tpu.memory_space<smem>>
    %c0_217 = arith.constant 0 : index
    %c0_218 = arith.constant 0 : index
    %c1_219 = arith.constant 1 : index
    %336 = vector.load %arg9[%c0_217, %c0_218, %c1_219] : memref<4x16x40xf32, #tpu.memory_space<vmem>>, vector<1x16x38xf32>
    %337 = vector.shape_cast %336 : vector<1x16x38xf32> to vector<16x38xf32>
    %338 = vector.broadcast %335 : f32 to vector<16x38xf32>
    %339 = arith.mulf %338, %337 : vector<16x38xf32>
    %340 = arith.addf %334, %339 : vector<16x38xf32>
    %c2_220 = arith.constant 2 : index
    %341 = memref.load %arg3[%c2_220] : memref<96xf32, #tpu.memory_space<smem>>
    %c0_221 = arith.constant 0 : index
    %c0_222 = arith.constant 0 : index
    %c2_223 = arith.constant 2 : index
    %342 = vector.load %arg9[%c0_221, %c0_222, %c2_223] : memref<4x16x40xf32, #tpu.memory_space<vmem>>, vector<1x16x38xf32>
    %343 = vector.shape_cast %342 : vector<1x16x38xf32> to vector<16x38xf32>
    %344 = vector.broadcast %341 : f32 to vector<16x38xf32>
    %345 = arith.mulf %344, %343 : vector<16x38xf32>
    %346 = arith.addf %340, %345 : vector<16x38xf32>
    %c3_224 = arith.constant 3 : index
    %347 = memref.load %arg3[%c3_224] : memref<96xf32, #tpu.memory_space<smem>>
    %c1_225 = arith.constant 1 : index
    %c0_226 = arith.constant 0 : index
    %c0_227 = arith.constant 0 : index
    %348 = vector.load %arg9[%c1_225, %c0_226, %c0_227] : memref<4x16x40xf32, #tpu.memory_space<vmem>>, vector<1x16x38xf32>
    %349 = vector.shape_cast %348 : vector<1x16x38xf32> to vector<16x38xf32>
    %350 = vector.broadcast %347 : f32 to vector<16x38xf32>
    %351 = arith.mulf %350, %349 : vector<16x38xf32>
    %352 = arith.addf %346, %351 : vector<16x38xf32>
    %c4_228 = arith.constant 4 : index
    %353 = memref.load %arg3[%c4_228] : memref<96xf32, #tpu.memory_space<smem>>
    %c1_229 = arith.constant 1 : index
    %c0_230 = arith.constant 0 : index
    %c1_231 = arith.constant 1 : index
    %354 = vector.load %arg9[%c1_229, %c0_230, %c1_231] : memref<4x16x40xf32, #tpu.memory_space<vmem>>, vector<1x16x38xf32>
    %355 = vector.shape_cast %354 : vector<1x16x38xf32> to vector<16x38xf32>
    %356 = vector.broadcast %353 : f32 to vector<16x38xf32>
    %357 = arith.mulf %356, %355 : vector<16x38xf32>
    %358 = arith.addf %352, %357 : vector<16x38xf32>
    %c5_232 = arith.constant 5 : index
    %359 = memref.load %arg3[%c5_232] : memref<96xf32, #tpu.memory_space<smem>>
    %c1_233 = arith.constant 1 : index
    %c0_234 = arith.constant 0 : index
    %c2_235 = arith.constant 2 : index
    %360 = vector.load %arg9[%c1_233, %c0_234, %c2_235] : memref<4x16x40xf32, #tpu.memory_space<vmem>>, vector<1x16x38xf32>
    %361 = vector.shape_cast %360 : vector<1x16x38xf32> to vector<16x38xf32>
    %362 = vector.broadcast %359 : f32 to vector<16x38xf32>
    %363 = arith.mulf %362, %361 : vector<16x38xf32>
    %364 = arith.addf %358, %363 : vector<16x38xf32>
    %c6_236 = arith.constant 6 : index
    %365 = memref.load %arg3[%c6_236] : memref<96xf32, #tpu.memory_space<smem>>
    %c2_237 = arith.constant 2 : index
    %c0_238 = arith.constant 0 : index
    %c0_239 = arith.constant 0 : index
    %366 = vector.load %arg9[%c2_237, %c0_238, %c0_239] : memref<4x16x40xf32, #tpu.memory_space<vmem>>, vector<1x16x38xf32>
    %367 = vector.shape_cast %366 : vector<1x16x38xf32> to vector<16x38xf32>
    %368 = vector.broadcast %365 : f32 to vector<16x38xf32>
    %369 = arith.mulf %368, %367 : vector<16x38xf32>
    %370 = arith.addf %364, %369 : vector<16x38xf32>
    %c7_240 = arith.constant 7 : index
    %371 = memref.load %arg3[%c7_240] : memref<96xf32, #tpu.memory_space<smem>>
    %c2_241 = arith.constant 2 : index
    %c0_242 = arith.constant 0 : index
    %c1_243 = arith.constant 1 : index
    %372 = vector.load %arg9[%c2_241, %c0_242, %c1_243] : memref<4x16x40xf32, #tpu.memory_space<vmem>>, vector<1x16x38xf32>
    %373 = vector.shape_cast %372 : vector<1x16x38xf32> to vector<16x38xf32>
    %374 = vector.broadcast %371 : f32 to vector<16x38xf32>
    %375 = arith.mulf %374, %373 : vector<16x38xf32>
    %376 = arith.addf %370, %375 : vector<16x38xf32>
    %c8_244 = arith.constant 8 : index
    %377 = memref.load %arg3[%c8_244] : memref<96xf32, #tpu.memory_space<smem>>
    %c2_245 = arith.constant 2 : index
    %c0_246 = arith.constant 0 : index
    %c2_247 = arith.constant 2 : index
    %378 = vector.load %arg9[%c2_245, %c0_246, %c2_247] : memref<4x16x40xf32, #tpu.memory_space<vmem>>, vector<1x16x38xf32>
    %379 = vector.shape_cast %378 : vector<1x16x38xf32> to vector<16x38xf32>
    %380 = vector.broadcast %377 : f32 to vector<16x38xf32>
    %381 = arith.mulf %380, %379 : vector<16x38xf32>
    %382 = arith.addf %376, %381 : vector<16x38xf32>
    %c9_248 = arith.constant 9 : index
    %383 = memref.load %arg3[%c9_248] : memref<96xf32, #tpu.memory_space<smem>>
    %c3_249 = arith.constant 3 : index
    %c0_250 = arith.constant 0 : index
    %c0_251 = arith.constant 0 : index
    %384 = vector.load %arg9[%c3_249, %c0_250, %c0_251] : memref<4x16x40xf32, #tpu.memory_space<vmem>>, vector<1x16x38xf32>
    %385 = vector.shape_cast %384 : vector<1x16x38xf32> to vector<16x38xf32>
    %386 = vector.broadcast %383 : f32 to vector<16x38xf32>
    %387 = arith.mulf %386, %385 : vector<16x38xf32>
    %388 = arith.addf %382, %387 : vector<16x38xf32>
    %c10_252 = arith.constant 10 : index
    %389 = memref.load %arg3[%c10_252] : memref<96xf32, #tpu.memory_space<smem>>
    %c3_253 = arith.constant 3 : index
    %c0_254 = arith.constant 0 : index
    %c1_255 = arith.constant 1 : index
    %390 = vector.load %arg9[%c3_253, %c0_254, %c1_255] : memref<4x16x40xf32, #tpu.memory_space<vmem>>, vector<1x16x38xf32>
    %391 = vector.shape_cast %390 : vector<1x16x38xf32> to vector<16x38xf32>
    %392 = vector.broadcast %389 : f32 to vector<16x38xf32>
    %393 = arith.mulf %392, %391 : vector<16x38xf32>
    %394 = arith.addf %388, %393 : vector<16x38xf32>
    %c11_256 = arith.constant 11 : index
    %395 = memref.load %arg3[%c11_256] : memref<96xf32, #tpu.memory_space<smem>>
    %c3_257 = arith.constant 3 : index
    %c0_258 = arith.constant 0 : index
    %c2_259 = arith.constant 2 : index
    %396 = vector.load %arg9[%c3_257, %c0_258, %c2_259] : memref<4x16x40xf32, #tpu.memory_space<vmem>>, vector<1x16x38xf32>
    %397 = vector.shape_cast %396 : vector<1x16x38xf32> to vector<16x38xf32>
    %398 = vector.broadcast %395 : f32 to vector<16x38xf32>
    %399 = arith.mulf %398, %397 : vector<16x38xf32>
    %400 = arith.addf %394, %399 : vector<16x38xf32>
    %c0_260 = arith.constant 0 : index
    %c0_261 = arith.constant 0 : index
    %c1_262 = arith.constant 1 : index
    %c0_263 = arith.constant 0 : index
    %401 = vector.load %arg5[%c0_260, %c0_261, %c1_262, %c0_263] : memref<1x8x18x40xf32, #tpu.memory_space<vmem>>, vector<1x1x16x38xf32>
    %402 = vector.shape_cast %401 : vector<1x1x16x38xf32> to vector<16x38xf32>
    %403 = vector.shape_cast %400 : vector<16x38xf32> to vector<1x1x16x38xf32>
    tpu.vector_store %arg5[%c0_260, %c0_261, %c1_262, %c0_263], %403 {strides = array<i32>} : memref<1x8x18x40xf32, #tpu.memory_space<vmem>>, vector<1x1x16x38xf32>,
    %404 = vector.broadcast %327 : vector<1x38xf32> to vector<16x38xf32>
    %405 = arith.mulf %400, %404 : vector<16x38xf32>
    %406 = vector.shape_cast %405 : vector<16x38xf32> to vector<1x16x38xf32>
    %cst_264 = arith.constant dense<0.000000e+00> : vector<1xf32>
    %407 = vector.multi_reduction <add>, %406, %cst_264 [1, 2] : vector<1x16x38xf32> to vector<1xf32>
    %408 = vector.shape_cast %407 : vector<1xf32> to vector<1x1x1xf32>
    %409 = vector.extract %408[0, 0, 0] : f32 from vector<1x1x1xf32>
    %410 = vector.broadcast %409 : f32 to vector<1x1xf32>
    %c0_265 = arith.constant 0 : index
    %c0_266 = arith.constant 0 : index
    %c0_267 = arith.constant 0 : index
    %c0_268 = arith.constant 0 : index
    %411 = vector.load %arg6[%c0_265, %c0_266, %c0_267, %c0_268] : memref<1x8x1x1xf32, #tpu.memory_space<vmem>>, vector<1x1x1x1xf32>
    %412 = vector.shape_cast %411 : vector<1x1x1x1xf32> to vector<1x1xf32>
    %413 = vector.shape_cast %410 : vector<1x1xf32> to vector<1x1x1x1xf32>
    tpu.vector_store %arg6[%c0_265, %c0_266, %c0_267, %c0_268], %413 {strides = array<i32>} : memref<1x8x1x1xf32, #tpu.memory_space<vmem>>, vector<1x1x1x1xf32>,
    %414 = arith.mulf %405, %400 : vector<16x38xf32>
    %415 = vector.shape_cast %414 : vector<16x38xf32> to vector<1x16x38xf32>
    %cst_269 = arith.constant dense<0.000000e+00> : vector<1xf32>
    %416 = vector.multi_reduction <add>, %415, %cst_269 [1, 2] : vector<1x16x38xf32> to vector<1xf32>
    %417 = vector.shape_cast %416 : vector<1xf32> to vector<1x1x1xf32>
    %418 = vector.extract %417[0, 0, 0] : f32 from vector<1x1x1xf32>
    %419 = vector.broadcast %418 : f32 to vector<1x1xf32>
    %c0_270 = arith.constant 0 : index
    %c0_271 = arith.constant 0 : index
    %c0_272 = arith.constant 0 : index
    %c0_273 = arith.constant 0 : index
    %420 = vector.load %arg7[%c0_270, %c0_271, %c0_272, %c0_273] : memref<1x8x1x1xf32, #tpu.memory_space<vmem>>, vector<1x1x1x1xf32>
    %421 = vector.shape_cast %420 : vector<1x1x1x1xf32> to vector<1x1xf32>
    %422 = vector.shape_cast %419 : vector<1x1xf32> to vector<1x1x1x1xf32>
    tpu.vector_store %arg7[%c0_270, %c0_271, %c0_272, %c0_273], %422 {strides = array<i32>} : memref<1x8x1x1xf32, #tpu.memory_space<vmem>>, vector<1x1x1x1xf32>,
    %cst_274 = arith.constant 0.000000e+00 : f32
    %423 = vector.broadcast %cst_274 : f32 to vector<16x38xf32>
    %c12_275 = arith.constant 12 : index
    %424 = memref.load %arg3[%c12_275] : memref<96xf32, #tpu.memory_space<smem>>
    %c0_276 = arith.constant 0 : index
    %c0_277 = arith.constant 0 : index
    %c0_278 = arith.constant 0 : index
    %425 = vector.load %arg9[%c0_276, %c0_277, %c0_278] : memref<4x16x40xf32, #tpu.memory_space<vmem>>, vector<1x16x38xf32>
    %426 = vector.shape_cast %425 : vector<1x16x38xf32> to vector<16x38xf32>
    %427 = vector.broadcast %424 : f32 to vector<16x38xf32>
    %428 = arith.mulf %427, %426 : vector<16x38xf32>
    %429 = arith.addf %423, %428 : vector<16x38xf32>
    %c13_279 = arith.constant 13 : index
    %430 = memref.load %arg3[%c13_279] : memref<96xf32, #tpu.memory_space<smem>>
    %c0_280 = arith.constant 0 : index
    %c0_281 = arith.constant 0 : index
    %c1_282 = arith.constant 1 : index
    %431 = vector.load %arg9[%c0_280, %c0_281, %c1_282] : memref<4x16x40xf32, #tpu.memory_space<vmem>>, vector<1x16x38xf32>
    %432 = vector.shape_cast %431 : vector<1x16x38xf32> to vector<16x38xf32>
    %433 = vector.broadcast %430 : f32 to vector<16x38xf32>
    %434 = arith.mulf %433, %432 : vector<16x38xf32>
    %435 = arith.addf %429, %434 : vector<16x38xf32>
    %c14_283 = arith.constant 14 : index
    %436 = memref.load %arg3[%c14_283] : memref<96xf32, #tpu.memory_space<smem>>
    %c0_284 = arith.constant 0 : index
    %c0_285 = arith.constant 0 : index
    %c2_286 = arith.constant 2 : index
    %437 = vector.load %arg9[%c0_284, %c0_285, %c2_286] : memref<4x16x40xf32, #tpu.memory_space<vmem>>, vector<1x16x38xf32>
    %438 = vector.shape_cast %437 : vector<1x16x38xf32> to vector<16x38xf32>
    %439 = vector.broadcast %436 : f32 to vector<16x38xf32>
    %440 = arith.mulf %439, %438 : vector<16x38xf32>
    %441 = arith.addf %435, %440 : vector<16x38xf32>
    %c15_287 = arith.constant 15 : index
    %442 = memref.load %arg3[%c15_287] : memref<96xf32, #tpu.memory_space<smem>>
    %c1_288 = arith.constant 1 : index
    %c0_289 = arith.constant 0 : index
    %c0_290 = arith.constant 0 : index
    %443 = vector.load %arg9[%c1_288, %c0_289, %c0_290] : memref<4x16x40xf32, #tpu.memory_space<vmem>>, vector<1x16x38xf32>
    %444 = vector.shape_cast %443 : vector<1x16x38xf32> to vector<16x38xf32>
    %445 = vector.broadcast %442 : f32 to vector<16x38xf32>
    %446 = arith.mulf %445, %444 : vector<16x38xf32>
    %447 = arith.addf %441, %446 : vector<16x38xf32>
    %c16_291 = arith.constant 16 : index
    %448 = memref.load %arg3[%c16_291] : memref<96xf32, #tpu.memory_space<smem>>
    %c1_292 = arith.constant 1 : index
    %c0_293 = arith.constant 0 : index
    %c1_294 = arith.constant 1 : index
    %449 = vector.load %arg9[%c1_292, %c0_293, %c1_294] : memref<4x16x40xf32, #tpu.memory_space<vmem>>, vector<1x16x38xf32>
    %450 = vector.shape_cast %449 : vector<1x16x38xf32> to vector<16x38xf32>
    %451 = vector.broadcast %448 : f32 to vector<16x38xf32>
    %452 = arith.mulf %451, %450 : vector<16x38xf32>
    %453 = arith.addf %447, %452 : vector<16x38xf32>
    %c17_295 = arith.constant 17 : index
    %454 = memref.load %arg3[%c17_295] : memref<96xf32, #tpu.memory_space<smem>>
    %c1_296 = arith.constant 1 : index
    %c0_297 = arith.constant 0 : index
    %c2_298 = arith.constant 2 : index
    %455 = vector.load %arg9[%c1_296, %c0_297, %c2_298] : memref<4x16x40xf32, #tpu.memory_space<vmem>>, vector<1x16x38xf32>
    %456 = vector.shape_cast %455 : vector<1x16x38xf32> to vector<16x38xf32>
    %457 = vector.broadcast %454 : f32 to vector<16x38xf32>
    %458 = arith.mulf %457, %456 : vector<16x38xf32>
    %459 = arith.addf %453, %458 : vector<16x38xf32>
    %c18_299 = arith.constant 18 : index
    %460 = memref.load %arg3[%c18_299] : memref<96xf32, #tpu.memory_space<smem>>
    %c2_300 = arith.constant 2 : index
    %c0_301 = arith.constant 0 : index
    %c0_302 = arith.constant 0 : index
    %461 = vector.load %arg9[%c2_300, %c0_301, %c0_302] : memref<4x16x40xf32, #tpu.memory_space<vmem>>, vector<1x16x38xf32>
    %462 = vector.shape_cast %461 : vector<1x16x38xf32> to vector<16x38xf32>
    %463 = vector.broadcast %460 : f32 to vector<16x38xf32>
    %464 = arith.mulf %463, %462 : vector<16x38xf32>
    %465 = arith.addf %459, %464 : vector<16x38xf32>
    %c19_303 = arith.constant 19 : index
    %466 = memref.load %arg3[%c19_303] : memref<96xf32, #tpu.memory_space<smem>>
    %c2_304 = arith.constant 2 : index
    %c0_305 = arith.constant 0 : index
    %c1_306 = arith.constant 1 : index
    %467 = vector.load %arg9[%c2_304, %c0_305, %c1_306] : memref<4x16x40xf32, #tpu.memory_space<vmem>>, vector<1x16x38xf32>
    %468 = vector.shape_cast %467 : vector<1x16x38xf32> to vector<16x38xf32>
    %469 = vector.broadcast %466 : f32 to vector<16x38xf32>
    %470 = arith.mulf %469, %468 : vector<16x38xf32>
    %471 = arith.addf %465, %470 : vector<16x38xf32>
    %c20_307 = arith.constant 20 : index
    %472 = memref.load %arg3[%c20_307] : memref<96xf32, #tpu.memory_space<smem>>
    %c2_308 = arith.constant 2 : index
    %c0_309 = arith.constant 0 : index
    %c2_310 = arith.constant 2 : index
    %473 = vector.load %arg9[%c2_308, %c0_309, %c2_310] : memref<4x16x40xf32, #tpu.memory_space<vmem>>, vector<1x16x38xf32>
    %474 = vector.shape_cast %473 : vector<1x16x38xf32> to vector<16x38xf32>
    %475 = vector.broadcast %472 : f32 to vector<16x38xf32>
    %476 = arith.mulf %475, %474 : vector<16x38xf32>
    %477 = arith.addf %471, %476 : vector<16x38xf32>
    %c21_311 = arith.constant 21 : index
    %478 = memref.load %arg3[%c21_311] : memref<96xf32, #tpu.memory_space<smem>>
    %c3_312 = arith.constant 3 : index
    %c0_313 = arith.constant 0 : index
    %c0_314 = arith.constant 0 : index
    %479 = vector.load %arg9[%c3_312, %c0_313, %c0_314] : memref<4x16x40xf32, #tpu.memory_space<vmem>>, vector<1x16x38xf32>
    %480 = vector.shape_cast %479 : vector<1x16x38xf32> to vector<16x38xf32>
    %481 = vector.broadcast %478 : f32 to vector<16x38xf32>
    %482 = arith.mulf %481, %480 : vector<16x38xf32>
    %483 = arith.addf %477, %482 : vector<16x38xf32>
    %c22_315 = arith.constant 22 : index
    %484 = memref.load %arg3[%c22_315] : memref<96xf32, #tpu.memory_space<smem>>
    %c3_316 = arith.constant 3 : index
    %c0_317 = arith.constant 0 : index
    %c1_318 = arith.constant 1 : index
    %485 = vector.load %arg9[%c3_316, %c0_317, %c1_318] : memref<4x16x40xf32, #tpu.memory_space<vmem>>, vector<1x16x38xf32>
    %486 = vector.shape_cast %485 : vector<1x16x38xf32> to vector<16x38xf32>
    %487 = vector.broadcast %484 : f32 to vector<16x38xf32>
    %488 = arith.mulf %487, %486 : vector<16x38xf32>
    %489 = arith.addf %483, %488 : vector<16x38xf32>
    %c23_319 = arith.constant 23 : index
    %490 = memref.load %arg3[%c23_319] : memref<96xf32, #tpu.memory_space<smem>>
    %c3_320 = arith.constant 3 : index
    %c0_321 = arith.constant 0 : index
    %c2_322 = arith.constant 2 : index
    %491 = vector.load %arg9[%c3_320, %c0_321, %c2_322] : memref<4x16x40xf32, #tpu.memory_space<vmem>>, vector<1x16x38xf32>
    %492 = vector.shape_cast %491 : vector<1x16x38xf32> to vector<16x38xf32>
    %493 = vector.broadcast %490 : f32 to vector<16x38xf32>
    %494 = arith.mulf %493, %492 : vector<16x38xf32>
    %495 = arith.addf %489, %494 : vector<16x38xf32>
    %c0_323 = arith.constant 0 : index
    %c1_324 = arith.constant 1 : index
    %c1_325 = arith.constant 1 : index
    %c0_326 = arith.constant 0 : index
    %496 = vector.load %arg5[%c0_323, %c1_324, %c1_325, %c0_326] : memref<1x8x18x40xf32, #tpu.memory_space<vmem>>, vector<1x1x16x38xf32>
    %497 = vector.shape_cast %496 : vector<1x1x16x38xf32> to vector<16x38xf32>
    %498 = vector.shape_cast %495 : vector<16x38xf32> to vector<1x1x16x38xf32>
    tpu.vector_store %arg5[%c0_323, %c1_324, %c1_325, %c0_326], %498 {strides = array<i32>} : memref<1x8x18x40xf32, #tpu.memory_space<vmem>>, vector<1x1x16x38xf32>,
    %499 = vector.broadcast %327 : vector<1x38xf32> to vector<16x38xf32>
    %500 = arith.mulf %495, %499 : vector<16x38xf32>
    %501 = vector.shape_cast %500 : vector<16x38xf32> to vector<1x16x38xf32>
    %cst_327 = arith.constant dense<0.000000e+00> : vector<1xf32>
    %502 = vector.multi_reduction <add>, %501, %cst_327 [1, 2] : vector<1x16x38xf32> to vector<1xf32>
    %503 = vector.shape_cast %502 : vector<1xf32> to vector<1x1x1xf32>
    %504 = vector.extract %503[0, 0, 0] : f32 from vector<1x1x1xf32>
    %505 = vector.broadcast %504 : f32 to vector<1x1xf32>
    %c0_328 = arith.constant 0 : index
    %c1_329 = arith.constant 1 : index
    %c0_330 = arith.constant 0 : index
    %c0_331 = arith.constant 0 : index
    %506 = vector.load %arg6[%c0_328, %c1_329, %c0_330, %c0_331] : memref<1x8x1x1xf32, #tpu.memory_space<vmem>>, vector<1x1x1x1xf32>
    %507 = vector.shape_cast %506 : vector<1x1x1x1xf32> to vector<1x1xf32>
    %508 = vector.shape_cast %505 : vector<1x1xf32> to vector<1x1x1x1xf32>
    tpu.vector_store %arg6[%c0_328, %c1_329, %c0_330, %c0_331], %508 {strides = array<i32>} : memref<1x8x1x1xf32, #tpu.memory_space<vmem>>, vector<1x1x1x1xf32>,
    %509 = arith.mulf %500, %495 : vector<16x38xf32>
    %510 = vector.shape_cast %509 : vector<16x38xf32> to vector<1x16x38xf32>
    %cst_332 = arith.constant dense<0.000000e+00> : vector<1xf32>
    %511 = vector.multi_reduction <add>, %510, %cst_332 [1, 2] : vector<1x16x38xf32> to vector<1xf32>
    %512 = vector.shape_cast %511 : vector<1xf32> to vector<1x1x1xf32>
    %513 = vector.extract %512[0, 0, 0] : f32 from vector<1x1x1xf32>
    %514 = vector.broadcast %513 : f32 to vector<1x1xf32>
    %c0_333 = arith.constant 0 : index
    %c1_334 = arith.constant 1 : index
    %c0_335 = arith.constant 0 : index
    %c0_336 = arith.constant 0 : index
    %515 = vector.load %arg7[%c0_333, %c1_334, %c0_335, %c0_336] : memref<1x8x1x1xf32, #tpu.memory_space<vmem>>, vector<1x1x1x1xf32>
    %516 = vector.shape_cast %515 : vector<1x1x1x1xf32> to vector<1x1xf32>
    %517 = vector.shape_cast %514 : vector<1x1xf32> to vector<1x1x1x1xf32>
    tpu.vector_store %arg7[%c0_333, %c1_334, %c0_335, %c0_336], %517 {strides = array<i32>} : memref<1x8x1x1xf32, #tpu.memory_space<vmem>>, vector<1x1x1x1xf32>,
    %cst_337 = arith.constant 0.000000e+00 : f32
    %518 = vector.broadcast %cst_337 : f32 to vector<16x38xf32>
    %c24_338 = arith.constant 24 : index
    %519 = memref.load %arg3[%c24_338] : memref<96xf32, #tpu.memory_space<smem>>
    %c0_339 = arith.constant 0 : index
    %c0_340 = arith.constant 0 : index
    %c0_341 = arith.constant 0 : index
    %520 = vector.load %arg9[%c0_339, %c0_340, %c0_341] : memref<4x16x40xf32, #tpu.memory_space<vmem>>, vector<1x16x38xf32>
    %521 = vector.shape_cast %520 : vector<1x16x38xf32> to vector<16x38xf32>
    %522 = vector.broadcast %519 : f32 to vector<16x38xf32>
    %523 = arith.mulf %522, %521 : vector<16x38xf32>
    %524 = arith.addf %518, %523 : vector<16x38xf32>
    %c25_342 = arith.constant 25 : index
    %525 = memref.load %arg3[%c25_342] : memref<96xf32, #tpu.memory_space<smem>>
    %c0_343 = arith.constant 0 : index
    %c0_344 = arith.constant 0 : index
    %c1_345 = arith.constant 1 : index
    %526 = vector.load %arg9[%c0_343, %c0_344, %c1_345] : memref<4x16x40xf32, #tpu.memory_space<vmem>>, vector<1x16x38xf32>
    %527 = vector.shape_cast %526 : vector<1x16x38xf32> to vector<16x38xf32>
    %528 = vector.broadcast %525 : f32 to vector<16x38xf32>
    %529 = arith.mulf %528, %527 : vector<16x38xf32>
    %530 = arith.addf %524, %529 : vector<16x38xf32>
    %c26_346 = arith.constant 26 : index
    %531 = memref.load %arg3[%c26_346] : memref<96xf32, #tpu.memory_space<smem>>
    %c0_347 = arith.constant 0 : index
    %c0_348 = arith.constant 0 : index
    %c2_349 = arith.constant 2 : index
    %532 = vector.load %arg9[%c0_347, %c0_348, %c2_349] : memref<4x16x40xf32, #tpu.memory_space<vmem>>, vector<1x16x38xf32>
    %533 = vector.shape_cast %532 : vector<1x16x38xf32> to vector<16x38xf32>
    %534 = vector.broadcast %531 : f32 to vector<16x38xf32>
    %535 = arith.mulf %534, %533 : vector<16x38xf32>
    %536 = arith.addf %530, %535 : vector<16x38xf32>
    %c27_350 = arith.constant 27 : index
    %537 = memref.load %arg3[%c27_350] : memref<96xf32, #tpu.memory_space<smem>>
    %c1_351 = arith.constant 1 : index
    %c0_352 = arith.constant 0 : index
    %c0_353 = arith.constant 0 : index
    %538 = vector.load %arg9[%c1_351, %c0_352, %c0_353] : memref<4x16x40xf32, #tpu.memory_space<vmem>>, vector<1x16x38xf32>
    %539 = vector.shape_cast %538 : vector<1x16x38xf32> to vector<16x38xf32>
    %540 = vector.broadcast %537 : f32 to vector<16x38xf32>
    %541 = arith.mulf %540, %539 : vector<16x38xf32>
    %542 = arith.addf %536, %541 : vector<16x38xf32>
    %c28_354 = arith.constant 28 : index
    %543 = memref.load %arg3[%c28_354] : memref<96xf32, #tpu.memory_space<smem>>
    %c1_355 = arith.constant 1 : index
    %c0_356 = arith.constant 0 : index
    %c1_357 = arith.constant 1 : index
    %544 = vector.load %arg9[%c1_355, %c0_356, %c1_357] : memref<4x16x40xf32, #tpu.memory_space<vmem>>, vector<1x16x38xf32>
    %545 = vector.shape_cast %544 : vector<1x16x38xf32> to vector<16x38xf32>
    %546 = vector.broadcast %543 : f32 to vector<16x38xf32>
    %547 = arith.mulf %546, %545 : vector<16x38xf32>
    %548 = arith.addf %542, %547 : vector<16x38xf32>
    %c29_358 = arith.constant 29 : index
    %549 = memref.load %arg3[%c29_358] : memref<96xf32, #tpu.memory_space<smem>>
    %c1_359 = arith.constant 1 : index
    %c0_360 = arith.constant 0 : index
    %c2_361 = arith.constant 2 : index
    %550 = vector.load %arg9[%c1_359, %c0_360, %c2_361] : memref<4x16x40xf32, #tpu.memory_space<vmem>>, vector<1x16x38xf32>
    %551 = vector.shape_cast %550 : vector<1x16x38xf32> to vector<16x38xf32>
    %552 = vector.broadcast %549 : f32 to vector<16x38xf32>
    %553 = arith.mulf %552, %551 : vector<16x38xf32>
    %554 = arith.addf %548, %553 : vector<16x38xf32>
    %c30_362 = arith.constant 30 : index
    %555 = memref.load %arg3[%c30_362] : memref<96xf32, #tpu.memory_space<smem>>
    %c2_363 = arith.constant 2 : index
    %c0_364 = arith.constant 0 : index
    %c0_365 = arith.constant 0 : index
    %556 = vector.load %arg9[%c2_363, %c0_364, %c0_365] : memref<4x16x40xf32, #tpu.memory_space<vmem>>, vector<1x16x38xf32>
    %557 = vector.shape_cast %556 : vector<1x16x38xf32> to vector<16x38xf32>
    %558 = vector.broadcast %555 : f32 to vector<16x38xf32>
    %559 = arith.mulf %558, %557 : vector<16x38xf32>
    %560 = arith.addf %554, %559 : vector<16x38xf32>
    %c31_366 = arith.constant 31 : index
    %561 = memref.load %arg3[%c31_366] : memref<96xf32, #tpu.memory_space<smem>>
    %c2_367 = arith.constant 2 : index
    %c0_368 = arith.constant 0 : index
    %c1_369 = arith.constant 1 : index
    %562 = vector.load %arg9[%c2_367, %c0_368, %c1_369] : memref<4x16x40xf32, #tpu.memory_space<vmem>>, vector<1x16x38xf32>
    %563 = vector.shape_cast %562 : vector<1x16x38xf32> to vector<16x38xf32>
    %564 = vector.broadcast %561 : f32 to vector<16x38xf32>
    %565 = arith.mulf %564, %563 : vector<16x38xf32>
    %566 = arith.addf %560, %565 : vector<16x38xf32>
    %c32_370 = arith.constant 32 : index
    %567 = memref.load %arg3[%c32_370] : memref<96xf32, #tpu.memory_space<smem>>
    %c2_371 = arith.constant 2 : index
    %c0_372 = arith.constant 0 : index
    %c2_373 = arith.constant 2 : index
    %568 = vector.load %arg9[%c2_371, %c0_372, %c2_373] : memref<4x16x40xf32, #tpu.memory_space<vmem>>, vector<1x16x38xf32>
    %569 = vector.shape_cast %568 : vector<1x16x38xf32> to vector<16x38xf32>
    %570 = vector.broadcast %567 : f32 to vector<16x38xf32>
    %571 = arith.mulf %570, %569 : vector<16x38xf32>
    %572 = arith.addf %566, %571 : vector<16x38xf32>
    %c33_374 = arith.constant 33 : index
    %573 = memref.load %arg3[%c33_374] : memref<96xf32, #tpu.memory_space<smem>>
    %c3_375 = arith.constant 3 : index
    %c0_376 = arith.constant 0 : index
    %c0_377 = arith.constant 0 : index
    %574 = vector.load %arg9[%c3_375, %c0_376, %c0_377] : memref<4x16x40xf32, #tpu.memory_space<vmem>>, vector<1x16x38xf32>
    %575 = vector.shape_cast %574 : vector<1x16x38xf32> to vector<16x38xf32>
    %576 = vector.broadcast %573 : f32 to vector<16x38xf32>
    %577 = arith.mulf %576, %575 : vector<16x38xf32>
    %578 = arith.addf %572, %577 : vector<16x38xf32>
    %c34_378 = arith.constant 34 : index
    %579 = memref.load %arg3[%c34_378] : memref<96xf32, #tpu.memory_space<smem>>
    %c3_379 = arith.constant 3 : index
    %c0_380 = arith.constant 0 : index
    %c1_381 = arith.constant 1 : index
    %580 = vector.load %arg9[%c3_379, %c0_380, %c1_381] : memref<4x16x40xf32, #tpu.memory_space<vmem>>, vector<1x16x38xf32>
    %581 = vector.shape_cast %580 : vector<1x16x38xf32> to vector<16x38xf32>
    %582 = vector.broadcast %579 : f32 to vector<16x38xf32>
    %583 = arith.mulf %582, %581 : vector<16x38xf32>
    %584 = arith.addf %578, %583 : vector<16x38xf32>
    %c35_382 = arith.constant 35 : index
    %585 = memref.load %arg3[%c35_382] : memref<96xf32, #tpu.memory_space<smem>>
    %c3_383 = arith.constant 3 : index
    %c0_384 = arith.constant 0 : index
    %c2_385 = arith.constant 2 : index
    %586 = vector.load %arg9[%c3_383, %c0_384, %c2_385] : memref<4x16x40xf32, #tpu.memory_space<vmem>>, vector<1x16x38xf32>
    %587 = vector.shape_cast %586 : vector<1x16x38xf32> to vector<16x38xf32>
    %588 = vector.broadcast %585 : f32 to vector<16x38xf32>
    %589 = arith.mulf %588, %587 : vector<16x38xf32>
    %590 = arith.addf %584, %589 : vector<16x38xf32>
    %c0_386 = arith.constant 0 : index
    %c2_387 = arith.constant 2 : index
    %c1_388 = arith.constant 1 : index
    %c0_389 = arith.constant 0 : index
    %591 = vector.load %arg5[%c0_386, %c2_387, %c1_388, %c0_389] : memref<1x8x18x40xf32, #tpu.memory_space<vmem>>, vector<1x1x16x38xf32>
    %592 = vector.shape_cast %591 : vector<1x1x16x38xf32> to vector<16x38xf32>
    %593 = vector.shape_cast %590 : vector<16x38xf32> to vector<1x1x16x38xf32>
    tpu.vector_store %arg5[%c0_386, %c2_387, %c1_388, %c0_389], %593 {strides = array<i32>} : memref<1x8x18x40xf32, #tpu.memory_space<vmem>>, vector<1x1x16x38xf32>,
    %594 = vector.broadcast %327 : vector<1x38xf32> to vector<16x38xf32>
    %595 = arith.mulf %590, %594 : vector<16x38xf32>
    %596 = vector.shape_cast %595 : vector<16x38xf32> to vector<1x16x38xf32>
    %cst_390 = arith.constant dense<0.000000e+00> : vector<1xf32>
    %597 = vector.multi_reduction <add>, %596, %cst_390 [1, 2] : vector<1x16x38xf32> to vector<1xf32>
    %598 = vector.shape_cast %597 : vector<1xf32> to vector<1x1x1xf32>
    %599 = vector.extract %598[0, 0, 0] : f32 from vector<1x1x1xf32>
    %600 = vector.broadcast %599 : f32 to vector<1x1xf32>
    %c0_391 = arith.constant 0 : index
    %c2_392 = arith.constant 2 : index
    %c0_393 = arith.constant 0 : index
    %c0_394 = arith.constant 0 : index
    %601 = vector.load %arg6[%c0_391, %c2_392, %c0_393, %c0_394] : memref<1x8x1x1xf32, #tpu.memory_space<vmem>>, vector<1x1x1x1xf32>
    %602 = vector.shape_cast %601 : vector<1x1x1x1xf32> to vector<1x1xf32>
    %603 = vector.shape_cast %600 : vector<1x1xf32> to vector<1x1x1x1xf32>
    tpu.vector_store %arg6[%c0_391, %c2_392, %c0_393, %c0_394], %603 {strides = array<i32>} : memref<1x8x1x1xf32, #tpu.memory_space<vmem>>, vector<1x1x1x1xf32>,
    %604 = arith.mulf %595, %590 : vector<16x38xf32>
    %605 = vector.shape_cast %604 : vector<16x38xf32> to vector<1x16x38xf32>
    %cst_395 = arith.constant dense<0.000000e+00> : vector<1xf32>
    %606 = vector.multi_reduction <add>, %605, %cst_395 [1, 2] : vector<1x16x38xf32> to vector<1xf32>
    %607 = vector.shape_cast %606 : vector<1xf32> to vector<1x1x1xf32>
    %608 = vector.extract %607[0, 0, 0] : f32 from vector<1x1x1xf32>
    %609 = vector.broadcast %608 : f32 to vector<1x1xf32>
    %c0_396 = arith.constant 0 : index
    %c2_397 = arith.constant 2 : index
    %c0_398 = arith.constant 0 : index
    %c0_399 = arith.constant 0 : index
    %610 = vector.load %arg7[%c0_396, %c2_397, %c0_398, %c0_399] : memref<1x8x1x1xf32, #tpu.memory_space<vmem>>, vector<1x1x1x1xf32>
    %611 = vector.shape_cast %610 : vector<1x1x1x1xf32> to vector<1x1xf32>
    %612 = vector.shape_cast %609 : vector<1x1xf32> to vector<1x1x1x1xf32>
    tpu.vector_store %arg7[%c0_396, %c2_397, %c0_398, %c0_399], %612 {strides = array<i32>} : memref<1x8x1x1xf32, #tpu.memory_space<vmem>>, vector<1x1x1x1xf32>,
    %cst_400 = arith.constant 0.000000e+00 : f32
    %613 = vector.broadcast %cst_400 : f32 to vector<16x38xf32>
    %c36_401 = arith.constant 36 : index
    %614 = memref.load %arg3[%c36_401] : memref<96xf32, #tpu.memory_space<smem>>
    %c0_402 = arith.constant 0 : index
    %c0_403 = arith.constant 0 : index
    %c0_404 = arith.constant 0 : index
    %615 = vector.load %arg9[%c0_402, %c0_403, %c0_404] : memref<4x16x40xf32, #tpu.memory_space<vmem>>, vector<1x16x38xf32>
    %616 = vector.shape_cast %615 : vector<1x16x38xf32> to vector<16x38xf32>
    %617 = vector.broadcast %614 : f32 to vector<16x38xf32>
    %618 = arith.mulf %617, %616 : vector<16x38xf32>
    %619 = arith.addf %613, %618 : vector<16x38xf32>
    %c37_405 = arith.constant 37 : index
    %620 = memref.load %arg3[%c37_405] : memref<96xf32, #tpu.memory_space<smem>>
    %c0_406 = arith.constant 0 : index
    %c0_407 = arith.constant 0 : index
    %c1_408 = arith.constant 1 : index
    %621 = vector.load %arg9[%c0_406, %c0_407, %c1_408] : memref<4x16x40xf32, #tpu.memory_space<vmem>>, vector<1x16x38xf32>
    %622 = vector.shape_cast %621 : vector<1x16x38xf32> to vector<16x38xf32>
    %623 = vector.broadcast %620 : f32 to vector<16x38xf32>
    %624 = arith.mulf %623, %622 : vector<16x38xf32>
    %625 = arith.addf %619, %624 : vector<16x38xf32>
    %c38_409 = arith.constant 38 : index
    %626 = memref.load %arg3[%c38_409] : memref<96xf32, #tpu.memory_space<smem>>
    %c0_410 = arith.constant 0 : index
    %c0_411 = arith.constant 0 : index
    %c2_412 = arith.constant 2 : index
    %627 = vector.load %arg9[%c0_410, %c0_411, %c2_412] : memref<4x16x40xf32, #tpu.memory_space<vmem>>, vector<1x16x38xf32>
    %628 = vector.shape_cast %627 : vector<1x16x38xf32> to vector<16x38xf32>
    %629 = vector.broadcast %626 : f32 to vector<16x38xf32>
    %630 = arith.mulf %629, %628 : vector<16x38xf32>
    %631 = arith.addf %625, %630 : vector<16x38xf32>
    %c39_413 = arith.constant 39 : index
    %632 = memref.load %arg3[%c39_413] : memref<96xf32, #tpu.memory_space<smem>>
    %c1_414 = arith.constant 1 : index
    %c0_415 = arith.constant 0 : index
    %c0_416 = arith.constant 0 : index
    %633 = vector.load %arg9[%c1_414, %c0_415, %c0_416] : memref<4x16x40xf32, #tpu.memory_space<vmem>>, vector<1x16x38xf32>
    %634 = vector.shape_cast %633 : vector<1x16x38xf32> to vector<16x38xf32>
    %635 = vector.broadcast %632 : f32 to vector<16x38xf32>
    %636 = arith.mulf %635, %634 : vector<16x38xf32>
    %637 = arith.addf %631, %636 : vector<16x38xf32>
    %c40_417 = arith.constant 40 : index
    %638 = memref.load %arg3[%c40_417] : memref<96xf32, #tpu.memory_space<smem>>
    %c1_418 = arith.constant 1 : index
    %c0_419 = arith.constant 0 : index
    %c1_420 = arith.constant 1 : index
    %639 = vector.load %arg9[%c1_418, %c0_419, %c1_420] : memref<4x16x40xf32, #tpu.memory_space<vmem>>, vector<1x16x38xf32>
    %640 = vector.shape_cast %639 : vector<1x16x38xf32> to vector<16x38xf32>
    %641 = vector.broadcast %638 : f32 to vector<16x38xf32>
    %642 = arith.mulf %641, %640 : vector<16x38xf32>
    %643 = arith.addf %637, %642 : vector<16x38xf32>
    %c41_421 = arith.constant 41 : index
    %644 = memref.load %arg3[%c41_421] : memref<96xf32, #tpu.memory_space<smem>>
    %c1_422 = arith.constant 1 : index
    %c0_423 = arith.constant 0 : index
    %c2_424 = arith.constant 2 : index
    %645 = vector.load %arg9[%c1_422, %c0_423, %c2_424] : memref<4x16x40xf32, #tpu.memory_space<vmem>>, vector<1x16x38xf32>
    %646 = vector.shape_cast %645 : vector<1x16x38xf32> to vector<16x38xf32>
    %647 = vector.broadcast %644 : f32 to vector<16x38xf32>
    %648 = arith.mulf %647, %646 : vector<16x38xf32>
    %649 = arith.addf %643, %648 : vector<16x38xf32>
    %c42_425 = arith.constant 42 : index
    %650 = memref.load %arg3[%c42_425] : memref<96xf32, #tpu.memory_space<smem>>
    %c2_426 = arith.constant 2 : index
    %c0_427 = arith.constant 0 : index
    %c0_428 = arith.constant 0 : index
    %651 = vector.load %arg9[%c2_426, %c0_427, %c0_428] : memref<4x16x40xf32, #tpu.memory_space<vmem>>, vector<1x16x38xf32>
    %652 = vector.shape_cast %651 : vector<1x16x38xf32> to vector<16x38xf32>
    %653 = vector.broadcast %650 : f32 to vector<16x38xf32>
    %654 = arith.mulf %653, %652 : vector<16x38xf32>
    %655 = arith.addf %649, %654 : vector<16x38xf32>
    %c43_429 = arith.constant 43 : index
    %656 = memref.load %arg3[%c43_429] : memref<96xf32, #tpu.memory_space<smem>>
    %c2_430 = arith.constant 2 : index
    %c0_431 = arith.constant 0 : index
    %c1_432 = arith.constant 1 : index
    %657 = vector.load %arg9[%c2_430, %c0_431, %c1_432] : memref<4x16x40xf32, #tpu.memory_space<vmem>>, vector<1x16x38xf32>
    %658 = vector.shape_cast %657 : vector<1x16x38xf32> to vector<16x38xf32>
    %659 = vector.broadcast %656 : f32 to vector<16x38xf32>
    %660 = arith.mulf %659, %658 : vector<16x38xf32>
    %661 = arith.addf %655, %660 : vector<16x38xf32>
    %c44_433 = arith.constant 44 : index
    %662 = memref.load %arg3[%c44_433] : memref<96xf32, #tpu.memory_space<smem>>
    %c2_434 = arith.constant 2 : index
    %c0_435 = arith.constant 0 : index
    %c2_436 = arith.constant 2 : index
    %663 = vector.load %arg9[%c2_434, %c0_435, %c2_436] : memref<4x16x40xf32, #tpu.memory_space<vmem>>, vector<1x16x38xf32>
    %664 = vector.shape_cast %663 : vector<1x16x38xf32> to vector<16x38xf32>
    %665 = vector.broadcast %662 : f32 to vector<16x38xf32>
    %666 = arith.mulf %665, %664 : vector<16x38xf32>
    %667 = arith.addf %661, %666 : vector<16x38xf32>
    %c45_437 = arith.constant 45 : index
    %668 = memref.load %arg3[%c45_437] : memref<96xf32, #tpu.memory_space<smem>>
    %c3_438 = arith.constant 3 : index
    %c0_439 = arith.constant 0 : index
    %c0_440 = arith.constant 0 : index
    %669 = vector.load %arg9[%c3_438, %c0_439, %c0_440] : memref<4x16x40xf32, #tpu.memory_space<vmem>>, vector<1x16x38xf32>
    %670 = vector.shape_cast %669 : vector<1x16x38xf32> to vector<16x38xf32>
    %671 = vector.broadcast %668 : f32 to vector<16x38xf32>
    %672 = arith.mulf %671, %670 : vector<16x38xf32>
    %673 = arith.addf %667, %672 : vector<16x38xf32>
    %c46_441 = arith.constant 46 : index
    %674 = memref.load %arg3[%c46_441] : memref<96xf32, #tpu.memory_space<smem>>
    %c3_442 = arith.constant 3 : index
    %c0_443 = arith.constant 0 : index
    %c1_444 = arith.constant 1 : index
    %675 = vector.load %arg9[%c3_442, %c0_443, %c1_444] : memref<4x16x40xf32, #tpu.memory_space<vmem>>, vector<1x16x38xf32>
    %676 = vector.shape_cast %675 : vector<1x16x38xf32> to vector<16x38xf32>
    %677 = vector.broadcast %674 : f32 to vector<16x38xf32>
    %678 = arith.mulf %677, %676 : vector<16x38xf32>
    %679 = arith.addf %673, %678 : vector<16x38xf32>
    %c47_445 = arith.constant 47 : index
    %680 = memref.load %arg3[%c47_445] : memref<96xf32, #tpu.memory_space<smem>>
    %c3_446 = arith.constant 3 : index
    %c0_447 = arith.constant 0 : index
    %c2_448 = arith.constant 2 : index
    %681 = vector.load %arg9[%c3_446, %c0_447, %c2_448] : memref<4x16x40xf32, #tpu.memory_space<vmem>>, vector<1x16x38xf32>
    %682 = vector.shape_cast %681 : vector<1x16x38xf32> to vector<16x38xf32>
    %683 = vector.broadcast %680 : f32 to vector<16x38xf32>
    %684 = arith.mulf %683, %682 : vector<16x38xf32>
    %685 = arith.addf %679, %684 : vector<16x38xf32>
    %c0_449 = arith.constant 0 : index
    %c3_450 = arith.constant 3 : index
    %c1_451 = arith.constant 1 : index
    %c0_452 = arith.constant 0 : index
    %686 = vector.load %arg5[%c0_449, %c3_450, %c1_451, %c0_452] : memref<1x8x18x40xf32, #tpu.memory_space<vmem>>, vector<1x1x16x38xf32>
    %687 = vector.shape_cast %686 : vector<1x1x16x38xf32> to vector<16x38xf32>
    %688 = vector.shape_cast %685 : vector<16x38xf32> to vector<1x1x16x38xf32>
    tpu.vector_store %arg5[%c0_449, %c3_450, %c1_451, %c0_452], %688 {strides = array<i32>} : memref<1x8x18x40xf32, #tpu.memory_space<vmem>>, vector<1x1x16x38xf32>,
    %689 = vector.broadcast %327 : vector<1x38xf32> to vector<16x38xf32>
    %690 = arith.mulf %685, %689 : vector<16x38xf32>
    %691 = vector.shape_cast %690 : vector<16x38xf32> to vector<1x16x38xf32>
    %cst_453 = arith.constant dense<0.000000e+00> : vector<1xf32>
    %692 = vector.multi_reduction <add>, %691, %cst_453 [1, 2] : vector<1x16x38xf32> to vector<1xf32>
    %693 = vector.shape_cast %692 : vector<1xf32> to vector<1x1x1xf32>
    %694 = vector.extract %693[0, 0, 0] : f32 from vector<1x1x1xf32>
    %695 = vector.broadcast %694 : f32 to vector<1x1xf32>
    %c0_454 = arith.constant 0 : index
    %c3_455 = arith.constant 3 : index
    %c0_456 = arith.constant 0 : index
    %c0_457 = arith.constant 0 : index
    %696 = vector.load %arg6[%c0_454, %c3_455, %c0_456, %c0_457] : memref<1x8x1x1xf32, #tpu.memory_space<vmem>>, vector<1x1x1x1xf32>
    %697 = vector.shape_cast %696 : vector<1x1x1x1xf32> to vector<1x1xf32>
    %698 = vector.shape_cast %695 : vector<1x1xf32> to vector<1x1x1x1xf32>
    tpu.vector_store %arg6[%c0_454, %c3_455, %c0_456, %c0_457], %698 {strides = array<i32>} : memref<1x8x1x1xf32, #tpu.memory_space<vmem>>, vector<1x1x1x1xf32>,
    %699 = arith.mulf %690, %685 : vector<16x38xf32>
    %700 = vector.shape_cast %699 : vector<16x38xf32> to vector<1x16x38xf32>
    %cst_458 = arith.constant dense<0.000000e+00> : vector<1xf32>
    %701 = vector.multi_reduction <add>, %700, %cst_458 [1, 2] : vector<1x16x38xf32> to vector<1xf32>
    %702 = vector.shape_cast %701 : vector<1xf32> to vector<1x1x1xf32>
    %703 = vector.extract %702[0, 0, 0] : f32 from vector<1x1x1xf32>
    %704 = vector.broadcast %703 : f32 to vector<1x1xf32>
    %c0_459 = arith.constant 0 : index
    %c3_460 = arith.constant 3 : index
    %c0_461 = arith.constant 0 : index
    %c0_462 = arith.constant 0 : index
    %705 = vector.load %arg7[%c0_459, %c3_460, %c0_461, %c0_462] : memref<1x8x1x1xf32, #tpu.memory_space<vmem>>, vector<1x1x1x1xf32>
    %706 = vector.shape_cast %705 : vector<1x1x1x1xf32> to vector<1x1xf32>
    %707 = vector.shape_cast %704 : vector<1x1xf32> to vector<1x1x1x1xf32>
    tpu.vector_store %arg7[%c0_459, %c3_460, %c0_461, %c0_462], %707 {strides = array<i32>} : memref<1x8x1x1xf32, #tpu.memory_space<vmem>>, vector<1x1x1x1xf32>,
    %cst_463 = arith.constant 0.000000e+00 : f32
    %708 = vector.broadcast %cst_463 : f32 to vector<16x38xf32>
    %c48 = arith.constant 48 : index
    %709 = memref.load %arg3[%c48] : memref<96xf32, #tpu.memory_space<smem>>
    %c0_464 = arith.constant 0 : index
    %c0_465 = arith.constant 0 : index
    %c0_466 = arith.constant 0 : index
    %710 = vector.load %arg9[%c0_464, %c0_465, %c0_466] : memref<4x16x40xf32, #tpu.memory_space<vmem>>, vector<1x16x38xf32>
    %711 = vector.shape_cast %710 : vector<1x16x38xf32> to vector<16x38xf32>
    %712 = vector.broadcast %709 : f32 to vector<16x38xf32>
    %713 = arith.mulf %712, %711 : vector<16x38xf32>
    %714 = arith.addf %708, %713 : vector<16x38xf32>
    %c49 = arith.constant 49 : index
    %715 = memref.load %arg3[%c49] : memref<96xf32, #tpu.memory_space<smem>>
    %c0_467 = arith.constant 0 : index
    %c0_468 = arith.constant 0 : index
    %c1_469 = arith.constant 1 : index
    %716 = vector.load %arg9[%c0_467, %c0_468, %c1_469] : memref<4x16x40xf32, #tpu.memory_space<vmem>>, vector<1x16x38xf32>
    %717 = vector.shape_cast %716 : vector<1x16x38xf32> to vector<16x38xf32>
    %718 = vector.broadcast %715 : f32 to vector<16x38xf32>
    %719 = arith.mulf %718, %717 : vector<16x38xf32>
    %720 = arith.addf %714, %719 : vector<16x38xf32>
    %c50 = arith.constant 50 : index
    %721 = memref.load %arg3[%c50] : memref<96xf32, #tpu.memory_space<smem>>
    %c0_470 = arith.constant 0 : index
    %c0_471 = arith.constant 0 : index
    %c2_472 = arith.constant 2 : index
    %722 = vector.load %arg9[%c0_470, %c0_471, %c2_472] : memref<4x16x40xf32, #tpu.memory_space<vmem>>, vector<1x16x38xf32>
    %723 = vector.shape_cast %722 : vector<1x16x38xf32> to vector<16x38xf32>
    %724 = vector.broadcast %721 : f32 to vector<16x38xf32>
    %725 = arith.mulf %724, %723 : vector<16x38xf32>
    %726 = arith.addf %720, %725 : vector<16x38xf32>
    %c51 = arith.constant 51 : index
    %727 = memref.load %arg3[%c51] : memref<96xf32, #tpu.memory_space<smem>>
    %c1_473 = arith.constant 1 : index
    %c0_474 = arith.constant 0 : index
    %c0_475 = arith.constant 0 : index
    %728 = vector.load %arg9[%c1_473, %c0_474, %c0_475] : memref<4x16x40xf32, #tpu.memory_space<vmem>>, vector<1x16x38xf32>
    %729 = vector.shape_cast %728 : vector<1x16x38xf32> to vector<16x38xf32>
    %730 = vector.broadcast %727 : f32 to vector<16x38xf32>
    %731 = arith.mulf %730, %729 : vector<16x38xf32>
    %732 = arith.addf %726, %731 : vector<16x38xf32>
    %c52 = arith.constant 52 : index
    %733 = memref.load %arg3[%c52] : memref<96xf32, #tpu.memory_space<smem>>
    %c1_476 = arith.constant 1 : index
    %c0_477 = arith.constant 0 : index
    %c1_478 = arith.constant 1 : index
    %734 = vector.load %arg9[%c1_476, %c0_477, %c1_478] : memref<4x16x40xf32, #tpu.memory_space<vmem>>, vector<1x16x38xf32>
    %735 = vector.shape_cast %734 : vector<1x16x38xf32> to vector<16x38xf32>
    %736 = vector.broadcast %733 : f32 to vector<16x38xf32>
    %737 = arith.mulf %736, %735 : vector<16x38xf32>
    %738 = arith.addf %732, %737 : vector<16x38xf32>
    %c53 = arith.constant 53 : index
    %739 = memref.load %arg3[%c53] : memref<96xf32, #tpu.memory_space<smem>>
    %c1_479 = arith.constant 1 : index
    %c0_480 = arith.constant 0 : index
    %c2_481 = arith.constant 2 : index
    %740 = vector.load %arg9[%c1_479, %c0_480, %c2_481] : memref<4x16x40xf32, #tpu.memory_space<vmem>>, vector<1x16x38xf32>
    %741 = vector.shape_cast %740 : vector<1x16x38xf32> to vector<16x38xf32>
    %742 = vector.broadcast %739 : f32 to vector<16x38xf32>
    %743 = arith.mulf %742, %741 : vector<16x38xf32>
    %744 = arith.addf %738, %743 : vector<16x38xf32>
    %c54 = arith.constant 54 : index
    %745 = memref.load %arg3[%c54] : memref<96xf32, #tpu.memory_space<smem>>
    %c2_482 = arith.constant 2 : index
    %c0_483 = arith.constant 0 : index
    %c0_484 = arith.constant 0 : index
    %746 = vector.load %arg9[%c2_482, %c0_483, %c0_484] : memref<4x16x40xf32, #tpu.memory_space<vmem>>, vector<1x16x38xf32>
    %747 = vector.shape_cast %746 : vector<1x16x38xf32> to vector<16x38xf32>
    %748 = vector.broadcast %745 : f32 to vector<16x38xf32>
    %749 = arith.mulf %748, %747 : vector<16x38xf32>
    %750 = arith.addf %744, %749 : vector<16x38xf32>
    %c55 = arith.constant 55 : index
    %751 = memref.load %arg3[%c55] : memref<96xf32, #tpu.memory_space<smem>>
    %c2_485 = arith.constant 2 : index
    %c0_486 = arith.constant 0 : index
    %c1_487 = arith.constant 1 : index
    %752 = vector.load %arg9[%c2_485, %c0_486, %c1_487] : memref<4x16x40xf32, #tpu.memory_space<vmem>>, vector<1x16x38xf32>
    %753 = vector.shape_cast %752 : vector<1x16x38xf32> to vector<16x38xf32>
    %754 = vector.broadcast %751 : f32 to vector<16x38xf32>
    %755 = arith.mulf %754, %753 : vector<16x38xf32>
    %756 = arith.addf %750, %755 : vector<16x38xf32>
    %c56 = arith.constant 56 : index
    %757 = memref.load %arg3[%c56] : memref<96xf32, #tpu.memory_space<smem>>
    %c2_488 = arith.constant 2 : index
    %c0_489 = arith.constant 0 : index
    %c2_490 = arith.constant 2 : index
    %758 = vector.load %arg9[%c2_488, %c0_489, %c2_490] : memref<4x16x40xf32, #tpu.memory_space<vmem>>, vector<1x16x38xf32>
    %759 = vector.shape_cast %758 : vector<1x16x38xf32> to vector<16x38xf32>
    %760 = vector.broadcast %757 : f32 to vector<16x38xf32>
    %761 = arith.mulf %760, %759 : vector<16x38xf32>
    %762 = arith.addf %756, %761 : vector<16x38xf32>
    %c57 = arith.constant 57 : index
    %763 = memref.load %arg3[%c57] : memref<96xf32, #tpu.memory_space<smem>>
    %c3_491 = arith.constant 3 : index
    %c0_492 = arith.constant 0 : index
    %c0_493 = arith.constant 0 : index
    %764 = vector.load %arg9[%c3_491, %c0_492, %c0_493] : memref<4x16x40xf32, #tpu.memory_space<vmem>>, vector<1x16x38xf32>
    %765 = vector.shape_cast %764 : vector<1x16x38xf32> to vector<16x38xf32>
    %766 = vector.broadcast %763 : f32 to vector<16x38xf32>
    %767 = arith.mulf %766, %765 : vector<16x38xf32>
    %768 = arith.addf %762, %767 : vector<16x38xf32>
    %c58 = arith.constant 58 : index
    %769 = memref.load %arg3[%c58] : memref<96xf32, #tpu.memory_space<smem>>
    %c3_494 = arith.constant 3 : index
    %c0_495 = arith.constant 0 : index
    %c1_496 = arith.constant 1 : index
    %770 = vector.load %arg9[%c3_494, %c0_495, %c1_496] : memref<4x16x40xf32, #tpu.memory_space<vmem>>, vector<1x16x38xf32>
    %771 = vector.shape_cast %770 : vector<1x16x38xf32> to vector<16x38xf32>
    %772 = vector.broadcast %769 : f32 to vector<16x38xf32>
    %773 = arith.mulf %772, %771 : vector<16x38xf32>
    %774 = arith.addf %768, %773 : vector<16x38xf32>
    %c59 = arith.constant 59 : index
    %775 = memref.load %arg3[%c59] : memref<96xf32, #tpu.memory_space<smem>>
    %c3_497 = arith.constant 3 : index
    %c0_498 = arith.constant 0 : index
    %c2_499 = arith.constant 2 : index
    %776 = vector.load %arg9[%c3_497, %c0_498, %c2_499] : memref<4x16x40xf32, #tpu.memory_space<vmem>>, vector<1x16x38xf32>
    %777 = vector.shape_cast %776 : vector<1x16x38xf32> to vector<16x38xf32>
    %778 = vector.broadcast %775 : f32 to vector<16x38xf32>
    %779 = arith.mulf %778, %777 : vector<16x38xf32>
    %780 = arith.addf %774, %779 : vector<16x38xf32>
    %c0_500 = arith.constant 0 : index
    %c4_501 = arith.constant 4 : index
    %c1_502 = arith.constant 1 : index
    %c0_503 = arith.constant 0 : index
    %781 = vector.load %arg5[%c0_500, %c4_501, %c1_502, %c0_503] : memref<1x8x18x40xf32, #tpu.memory_space<vmem>>, vector<1x1x16x38xf32>
    %782 = vector.shape_cast %781 : vector<1x1x16x38xf32> to vector<16x38xf32>
    %783 = vector.shape_cast %780 : vector<16x38xf32> to vector<1x1x16x38xf32>
    tpu.vector_store %arg5[%c0_500, %c4_501, %c1_502, %c0_503], %783 {strides = array<i32>} : memref<1x8x18x40xf32, #tpu.memory_space<vmem>>, vector<1x1x16x38xf32>,
    %784 = vector.broadcast %327 : vector<1x38xf32> to vector<16x38xf32>
    %785 = arith.mulf %780, %784 : vector<16x38xf32>
    %786 = vector.shape_cast %785 : vector<16x38xf32> to vector<1x16x38xf32>
    %cst_504 = arith.constant dense<0.000000e+00> : vector<1xf32>
    %787 = vector.multi_reduction <add>, %786, %cst_504 [1, 2] : vector<1x16x38xf32> to vector<1xf32>
    %788 = vector.shape_cast %787 : vector<1xf32> to vector<1x1x1xf32>
    %789 = vector.extract %788[0, 0, 0] : f32 from vector<1x1x1xf32>
    %790 = vector.broadcast %789 : f32 to vector<1x1xf32>
    %c0_505 = arith.constant 0 : index
    %c4_506 = arith.constant 4 : index
    %c0_507 = arith.constant 0 : index
    %c0_508 = arith.constant 0 : index
    %791 = vector.load %arg6[%c0_505, %c4_506, %c0_507, %c0_508] : memref<1x8x1x1xf32, #tpu.memory_space<vmem>>, vector<1x1x1x1xf32>
    %792 = vector.shape_cast %791 : vector<1x1x1x1xf32> to vector<1x1xf32>
    %793 = vector.shape_cast %790 : vector<1x1xf32> to vector<1x1x1x1xf32>
    tpu.vector_store %arg6[%c0_505, %c4_506, %c0_507, %c0_508], %793 {strides = array<i32>} : memref<1x8x1x1xf32, #tpu.memory_space<vmem>>, vector<1x1x1x1xf32>,
    %794 = arith.mulf %785, %780 : vector<16x38xf32>
    %795 = vector.shape_cast %794 : vector<16x38xf32> to vector<1x16x38xf32>
    %cst_509 = arith.constant dense<0.000000e+00> : vector<1xf32>
    %796 = vector.multi_reduction <add>, %795, %cst_509 [1, 2] : vector<1x16x38xf32> to vector<1xf32>
    %797 = vector.shape_cast %796 : vector<1xf32> to vector<1x1x1xf32>
    %798 = vector.extract %797[0, 0, 0] : f32 from vector<1x1x1xf32>
    %799 = vector.broadcast %798 : f32 to vector<1x1xf32>
    %c0_510 = arith.constant 0 : index
    %c4_511 = arith.constant 4 : index
    %c0_512 = arith.constant 0 : index
    %c0_513 = arith.constant 0 : index
    %800 = vector.load %arg7[%c0_510, %c4_511, %c0_512, %c0_513] : memref<1x8x1x1xf32, #tpu.memory_space<vmem>>, vector<1x1x1x1xf32>
    %801 = vector.shape_cast %800 : vector<1x1x1x1xf32> to vector<1x1xf32>
    %802 = vector.shape_cast %799 : vector<1x1xf32> to vector<1x1x1x1xf32>
    tpu.vector_store %arg7[%c0_510, %c4_511, %c0_512, %c0_513], %802 {strides = array<i32>} : memref<1x8x1x1xf32, #tpu.memory_space<vmem>>, vector<1x1x1x1xf32>,
    %cst_514 = arith.constant 0.000000e+00 : f32
    %803 = vector.broadcast %cst_514 : f32 to vector<16x38xf32>
    %c60 = arith.constant 60 : index
    %804 = memref.load %arg3[%c60] : memref<96xf32, #tpu.memory_space<smem>>
    %c0_515 = arith.constant 0 : index
    %c0_516 = arith.constant 0 : index
    %c0_517 = arith.constant 0 : index
    %805 = vector.load %arg9[%c0_515, %c0_516, %c0_517] : memref<4x16x40xf32, #tpu.memory_space<vmem>>, vector<1x16x38xf32>
    %806 = vector.shape_cast %805 : vector<1x16x38xf32> to vector<16x38xf32>
    %807 = vector.broadcast %804 : f32 to vector<16x38xf32>
    %808 = arith.mulf %807, %806 : vector<16x38xf32>
    %809 = arith.addf %803, %808 : vector<16x38xf32>
    %c61 = arith.constant 61 : index
    %810 = memref.load %arg3[%c61] : memref<96xf32, #tpu.memory_space<smem>>
    %c0_518 = arith.constant 0 : index
    %c0_519 = arith.constant 0 : index
    %c1_520 = arith.constant 1 : index
    %811 = vector.load %arg9[%c0_518, %c0_519, %c1_520] : memref<4x16x40xf32, #tpu.memory_space<vmem>>, vector<1x16x38xf32>
    %812 = vector.shape_cast %811 : vector<1x16x38xf32> to vector<16x38xf32>
    %813 = vector.broadcast %810 : f32 to vector<16x38xf32>
    %814 = arith.mulf %813, %812 : vector<16x38xf32>
    %815 = arith.addf %809, %814 : vector<16x38xf32>
    %c62 = arith.constant 62 : index
    %816 = memref.load %arg3[%c62] : memref<96xf32, #tpu.memory_space<smem>>
    %c0_521 = arith.constant 0 : index
    %c0_522 = arith.constant 0 : index
    %c2_523 = arith.constant 2 : index
    %817 = vector.load %arg9[%c0_521, %c0_522, %c2_523] : memref<4x16x40xf32, #tpu.memory_space<vmem>>, vector<1x16x38xf32>
    %818 = vector.shape_cast %817 : vector<1x16x38xf32> to vector<16x38xf32>
    %819 = vector.broadcast %816 : f32 to vector<16x38xf32>
    %820 = arith.mulf %819, %818 : vector<16x38xf32>
    %821 = arith.addf %815, %820 : vector<16x38xf32>
    %c63 = arith.constant 63 : index
    %822 = memref.load %arg3[%c63] : memref<96xf32, #tpu.memory_space<smem>>
    %c1_524 = arith.constant 1 : index
    %c0_525 = arith.constant 0 : index
    %c0_526 = arith.constant 0 : index
    %823 = vector.load %arg9[%c1_524, %c0_525, %c0_526] : memref<4x16x40xf32, #tpu.memory_space<vmem>>, vector<1x16x38xf32>
    %824 = vector.shape_cast %823 : vector<1x16x38xf32> to vector<16x38xf32>
    %825 = vector.broadcast %822 : f32 to vector<16x38xf32>
    %826 = arith.mulf %825, %824 : vector<16x38xf32>
    %827 = arith.addf %821, %826 : vector<16x38xf32>
    %c64 = arith.constant 64 : index
    %828 = memref.load %arg3[%c64] : memref<96xf32, #tpu.memory_space<smem>>
    %c1_527 = arith.constant 1 : index
    %c0_528 = arith.constant 0 : index
    %c1_529 = arith.constant 1 : index
    %829 = vector.load %arg9[%c1_527, %c0_528, %c1_529] : memref<4x16x40xf32, #tpu.memory_space<vmem>>, vector<1x16x38xf32>
    %830 = vector.shape_cast %829 : vector<1x16x38xf32> to vector<16x38xf32>
    %831 = vector.broadcast %828 : f32 to vector<16x38xf32>
    %832 = arith.mulf %831, %830 : vector<16x38xf32>
    %833 = arith.addf %827, %832 : vector<16x38xf32>
    %c65 = arith.constant 65 : index
    %834 = memref.load %arg3[%c65] : memref<96xf32, #tpu.memory_space<smem>>
    %c1_530 = arith.constant 1 : index
    %c0_531 = arith.constant 0 : index
    %c2_532 = arith.constant 2 : index
    %835 = vector.load %arg9[%c1_530, %c0_531, %c2_532] : memref<4x16x40xf32, #tpu.memory_space<vmem>>, vector<1x16x38xf32>
    %836 = vector.shape_cast %835 : vector<1x16x38xf32> to vector<16x38xf32>
    %837 = vector.broadcast %834 : f32 to vector<16x38xf32>
    %838 = arith.mulf %837, %836 : vector<16x38xf32>
    %839 = arith.addf %833, %838 : vector<16x38xf32>
    %c66 = arith.constant 66 : index
    %840 = memref.load %arg3[%c66] : memref<96xf32, #tpu.memory_space<smem>>
    %c2_533 = arith.constant 2 : index
    %c0_534 = arith.constant 0 : index
    %c0_535 = arith.constant 0 : index
    %841 = vector.load %arg9[%c2_533, %c0_534, %c0_535] : memref<4x16x40xf32, #tpu.memory_space<vmem>>, vector<1x16x38xf32>
    %842 = vector.shape_cast %841 : vector<1x16x38xf32> to vector<16x38xf32>
    %843 = vector.broadcast %840 : f32 to vector<16x38xf32>
    %844 = arith.mulf %843, %842 : vector<16x38xf32>
    %845 = arith.addf %839, %844 : vector<16x38xf32>
    %c67 = arith.constant 67 : index
    %846 = memref.load %arg3[%c67] : memref<96xf32, #tpu.memory_space<smem>>
    %c2_536 = arith.constant 2 : index
    %c0_537 = arith.constant 0 : index
    %c1_538 = arith.constant 1 : index
    %847 = vector.load %arg9[%c2_536, %c0_537, %c1_538] : memref<4x16x40xf32, #tpu.memory_space<vmem>>, vector<1x16x38xf32>
    %848 = vector.shape_cast %847 : vector<1x16x38xf32> to vector<16x38xf32>
    %849 = vector.broadcast %846 : f32 to vector<16x38xf32>
    %850 = arith.mulf %849, %848 : vector<16x38xf32>
    %851 = arith.addf %845, %850 : vector<16x38xf32>
    %c68 = arith.constant 68 : index
    %852 = memref.load %arg3[%c68] : memref<96xf32, #tpu.memory_space<smem>>
    %c2_539 = arith.constant 2 : index
    %c0_540 = arith.constant 0 : index
    %c2_541 = arith.constant 2 : index
    %853 = vector.load %arg9[%c2_539, %c0_540, %c2_541] : memref<4x16x40xf32, #tpu.memory_space<vmem>>, vector<1x16x38xf32>
    %854 = vector.shape_cast %853 : vector<1x16x38xf32> to vector<16x38xf32>
    %855 = vector.broadcast %852 : f32 to vector<16x38xf32>
    %856 = arith.mulf %855, %854 : vector<16x38xf32>
    %857 = arith.addf %851, %856 : vector<16x38xf32>
    %c69 = arith.constant 69 : index
    %858 = memref.load %arg3[%c69] : memref<96xf32, #tpu.memory_space<smem>>
    %c3_542 = arith.constant 3 : index
    %c0_543 = arith.constant 0 : index
    %c0_544 = arith.constant 0 : index
    %859 = vector.load %arg9[%c3_542, %c0_543, %c0_544] : memref<4x16x40xf32, #tpu.memory_space<vmem>>, vector<1x16x38xf32>
    %860 = vector.shape_cast %859 : vector<1x16x38xf32> to vector<16x38xf32>
    %861 = vector.broadcast %858 : f32 to vector<16x38xf32>
    %862 = arith.mulf %861, %860 : vector<16x38xf32>
    %863 = arith.addf %857, %862 : vector<16x38xf32>
    %c70 = arith.constant 70 : index
    %864 = memref.load %arg3[%c70] : memref<96xf32, #tpu.memory_space<smem>>
    %c3_545 = arith.constant 3 : index
    %c0_546 = arith.constant 0 : index
    %c1_547 = arith.constant 1 : index
    %865 = vector.load %arg9[%c3_545, %c0_546, %c1_547] : memref<4x16x40xf32, #tpu.memory_space<vmem>>, vector<1x16x38xf32>
    %866 = vector.shape_cast %865 : vector<1x16x38xf32> to vector<16x38xf32>
    %867 = vector.broadcast %864 : f32 to vector<16x38xf32>
    %868 = arith.mulf %867, %866 : vector<16x38xf32>
    %869 = arith.addf %863, %868 : vector<16x38xf32>
    %c71 = arith.constant 71 : index
    %870 = memref.load %arg3[%c71] : memref<96xf32, #tpu.memory_space<smem>>
    %c3_548 = arith.constant 3 : index
    %c0_549 = arith.constant 0 : index
    %c2_550 = arith.constant 2 : index
    %871 = vector.load %arg9[%c3_548, %c0_549, %c2_550] : memref<4x16x40xf32, #tpu.memory_space<vmem>>, vector<1x16x38xf32>
    %872 = vector.shape_cast %871 : vector<1x16x38xf32> to vector<16x38xf32>
    %873 = vector.broadcast %870 : f32 to vector<16x38xf32>
    %874 = arith.mulf %873, %872 : vector<16x38xf32>
    %875 = arith.addf %869, %874 : vector<16x38xf32>
    %c0_551 = arith.constant 0 : index
    %c5_552 = arith.constant 5 : index
    %c1_553 = arith.constant 1 : index
    %c0_554 = arith.constant 0 : index
    %876 = vector.load %arg5[%c0_551, %c5_552, %c1_553, %c0_554] : memref<1x8x18x40xf32, #tpu.memory_space<vmem>>, vector<1x1x16x38xf32>
    %877 = vector.shape_cast %876 : vector<1x1x16x38xf32> to vector<16x38xf32>
    %878 = vector.shape_cast %875 : vector<16x38xf32> to vector<1x1x16x38xf32>
    tpu.vector_store %arg5[%c0_551, %c5_552, %c1_553, %c0_554], %878 {strides = array<i32>} : memref<1x8x18x40xf32, #tpu.memory_space<vmem>>, vector<1x1x16x38xf32>,
    %879 = vector.broadcast %327 : vector<1x38xf32> to vector<16x38xf32>
    %880 = arith.mulf %875, %879 : vector<16x38xf32>
    %881 = vector.shape_cast %880 : vector<16x38xf32> to vector<1x16x38xf32>
    %cst_555 = arith.constant dense<0.000000e+00> : vector<1xf32>
    %882 = vector.multi_reduction <add>, %881, %cst_555 [1, 2] : vector<1x16x38xf32> to vector<1xf32>
    %883 = vector.shape_cast %882 : vector<1xf32> to vector<1x1x1xf32>
    %884 = vector.extract %883[0, 0, 0] : f32 from vector<1x1x1xf32>
    %885 = vector.broadcast %884 : f32 to vector<1x1xf32>
    %c0_556 = arith.constant 0 : index
    %c5_557 = arith.constant 5 : index
    %c0_558 = arith.constant 0 : index
    %c0_559 = arith.constant 0 : index
    %886 = vector.load %arg6[%c0_556, %c5_557, %c0_558, %c0_559] : memref<1x8x1x1xf32, #tpu.memory_space<vmem>>, vector<1x1x1x1xf32>
    %887 = vector.shape_cast %886 : vector<1x1x1x1xf32> to vector<1x1xf32>
    %888 = vector.shape_cast %885 : vector<1x1xf32> to vector<1x1x1x1xf32>
    tpu.vector_store %arg6[%c0_556, %c5_557, %c0_558, %c0_559], %888 {strides = array<i32>} : memref<1x8x1x1xf32, #tpu.memory_space<vmem>>, vector<1x1x1x1xf32>,
    %889 = arith.mulf %880, %875 : vector<16x38xf32>
    %890 = vector.shape_cast %889 : vector<16x38xf32> to vector<1x16x38xf32>
    %cst_560 = arith.constant dense<0.000000e+00> : vector<1xf32>
    %891 = vector.multi_reduction <add>, %890, %cst_560 [1, 2] : vector<1x16x38xf32> to vector<1xf32>
    %892 = vector.shape_cast %891 : vector<1xf32> to vector<1x1x1xf32>
    %893 = vector.extract %892[0, 0, 0] : f32 from vector<1x1x1xf32>
    %894 = vector.broadcast %893 : f32 to vector<1x1xf32>
    %c0_561 = arith.constant 0 : index
    %c5_562 = arith.constant 5 : index
    %c0_563 = arith.constant 0 : index
    %c0_564 = arith.constant 0 : index
    %895 = vector.load %arg7[%c0_561, %c5_562, %c0_563, %c0_564] : memref<1x8x1x1xf32, #tpu.memory_space<vmem>>, vector<1x1x1x1xf32>
    %896 = vector.shape_cast %895 : vector<1x1x1x1xf32> to vector<1x1xf32>
    %897 = vector.shape_cast %894 : vector<1x1xf32> to vector<1x1x1x1xf32>
    tpu.vector_store %arg7[%c0_561, %c5_562, %c0_563, %c0_564], %897 {strides = array<i32>} : memref<1x8x1x1xf32, #tpu.memory_space<vmem>>, vector<1x1x1x1xf32>,
    %cst_565 = arith.constant 0.000000e+00 : f32
    %898 = vector.broadcast %cst_565 : f32 to vector<16x38xf32>
    %c72 = arith.constant 72 : index
    %899 = memref.load %arg3[%c72] : memref<96xf32, #tpu.memory_space<smem>>
    %c0_566 = arith.constant 0 : index
    %c0_567 = arith.constant 0 : index
    %c0_568 = arith.constant 0 : index
    %900 = vector.load %arg9[%c0_566, %c0_567, %c0_568] : memref<4x16x40xf32, #tpu.memory_space<vmem>>, vector<1x16x38xf32>
    %901 = vector.shape_cast %900 : vector<1x16x38xf32> to vector<16x38xf32>
    %902 = vector.broadcast %899 : f32 to vector<16x38xf32>
    %903 = arith.mulf %902, %901 : vector<16x38xf32>
    %904 = arith.addf %898, %903 : vector<16x38xf32>
    %c73 = arith.constant 73 : index
    %905 = memref.load %arg3[%c73] : memref<96xf32, #tpu.memory_space<smem>>
    %c0_569 = arith.constant 0 : index
    %c0_570 = arith.constant 0 : index
    %c1_571 = arith.constant 1 : index
    %906 = vector.load %arg9[%c0_569, %c0_570, %c1_571] : memref<4x16x40xf32, #tpu.memory_space<vmem>>, vector<1x16x38xf32>
    %907 = vector.shape_cast %906 : vector<1x16x38xf32> to vector<16x38xf32>
    %908 = vector.broadcast %905 : f32 to vector<16x38xf32>
    %909 = arith.mulf %908, %907 : vector<16x38xf32>
    %910 = arith.addf %904, %909 : vector<16x38xf32>
    %c74 = arith.constant 74 : index
    %911 = memref.load %arg3[%c74] : memref<96xf32, #tpu.memory_space<smem>>
    %c0_572 = arith.constant 0 : index
    %c0_573 = arith.constant 0 : index
    %c2_574 = arith.constant 2 : index
    %912 = vector.load %arg9[%c0_572, %c0_573, %c2_574] : memref<4x16x40xf32, #tpu.memory_space<vmem>>, vector<1x16x38xf32>
    %913 = vector.shape_cast %912 : vector<1x16x38xf32> to vector<16x38xf32>
    %914 = vector.broadcast %911 : f32 to vector<16x38xf32>
    %915 = arith.mulf %914, %913 : vector<16x38xf32>
    %916 = arith.addf %910, %915 : vector<16x38xf32>
    %c75 = arith.constant 75 : index
    %917 = memref.load %arg3[%c75] : memref<96xf32, #tpu.memory_space<smem>>
    %c1_575 = arith.constant 1 : index
    %c0_576 = arith.constant 0 : index
    %c0_577 = arith.constant 0 : index
    %918 = vector.load %arg9[%c1_575, %c0_576, %c0_577] : memref<4x16x40xf32, #tpu.memory_space<vmem>>, vector<1x16x38xf32>
    %919 = vector.shape_cast %918 : vector<1x16x38xf32> to vector<16x38xf32>
    %920 = vector.broadcast %917 : f32 to vector<16x38xf32>
    %921 = arith.mulf %920, %919 : vector<16x38xf32>
    %922 = arith.addf %916, %921 : vector<16x38xf32>
    %c76 = arith.constant 76 : index
    %923 = memref.load %arg3[%c76] : memref<96xf32, #tpu.memory_space<smem>>
    %c1_578 = arith.constant 1 : index
    %c0_579 = arith.constant 0 : index
    %c1_580 = arith.constant 1 : index
    %924 = vector.load %arg9[%c1_578, %c0_579, %c1_580] : memref<4x16x40xf32, #tpu.memory_space<vmem>>, vector<1x16x38xf32>
    %925 = vector.shape_cast %924 : vector<1x16x38xf32> to vector<16x38xf32>
    %926 = vector.broadcast %923 : f32 to vector<16x38xf32>
    %927 = arith.mulf %926, %925 : vector<16x38xf32>
    %928 = arith.addf %922, %927 : vector<16x38xf32>
    %c77 = arith.constant 77 : index
    %929 = memref.load %arg3[%c77] : memref<96xf32, #tpu.memory_space<smem>>
    %c1_581 = arith.constant 1 : index
    %c0_582 = arith.constant 0 : index
    %c2_583 = arith.constant 2 : index
    %930 = vector.load %arg9[%c1_581, %c0_582, %c2_583] : memref<4x16x40xf32, #tpu.memory_space<vmem>>, vector<1x16x38xf32>
    %931 = vector.shape_cast %930 : vector<1x16x38xf32> to vector<16x38xf32>
    %932 = vector.broadcast %929 : f32 to vector<16x38xf32>
    %933 = arith.mulf %932, %931 : vector<16x38xf32>
    %934 = arith.addf %928, %933 : vector<16x38xf32>
    %c78 = arith.constant 78 : index
    %935 = memref.load %arg3[%c78] : memref<96xf32, #tpu.memory_space<smem>>
    %c2_584 = arith.constant 2 : index
    %c0_585 = arith.constant 0 : index
    %c0_586 = arith.constant 0 : index
    %936 = vector.load %arg9[%c2_584, %c0_585, %c0_586] : memref<4x16x40xf32, #tpu.memory_space<vmem>>, vector<1x16x38xf32>
    %937 = vector.shape_cast %936 : vector<1x16x38xf32> to vector<16x38xf32>
    %938 = vector.broadcast %935 : f32 to vector<16x38xf32>
    %939 = arith.mulf %938, %937 : vector<16x38xf32>
    %940 = arith.addf %934, %939 : vector<16x38xf32>
    %c79 = arith.constant 79 : index
    %941 = memref.load %arg3[%c79] : memref<96xf32, #tpu.memory_space<smem>>
    %c2_587 = arith.constant 2 : index
    %c0_588 = arith.constant 0 : index
    %c1_589 = arith.constant 1 : index
    %942 = vector.load %arg9[%c2_587, %c0_588, %c1_589] : memref<4x16x40xf32, #tpu.memory_space<vmem>>, vector<1x16x38xf32>
    %943 = vector.shape_cast %942 : vector<1x16x38xf32> to vector<16x38xf32>
    %944 = vector.broadcast %941 : f32 to vector<16x38xf32>
    %945 = arith.mulf %944, %943 : vector<16x38xf32>
    %946 = arith.addf %940, %945 : vector<16x38xf32>
    %c80 = arith.constant 80 : index
    %947 = memref.load %arg3[%c80] : memref<96xf32, #tpu.memory_space<smem>>
    %c2_590 = arith.constant 2 : index
    %c0_591 = arith.constant 0 : index
    %c2_592 = arith.constant 2 : index
    %948 = vector.load %arg9[%c2_590, %c0_591, %c2_592] : memref<4x16x40xf32, #tpu.memory_space<vmem>>, vector<1x16x38xf32>
    %949 = vector.shape_cast %948 : vector<1x16x38xf32> to vector<16x38xf32>
    %950 = vector.broadcast %947 : f32 to vector<16x38xf32>
    %951 = arith.mulf %950, %949 : vector<16x38xf32>
    %952 = arith.addf %946, %951 : vector<16x38xf32>
    %c81 = arith.constant 81 : index
    %953 = memref.load %arg3[%c81] : memref<96xf32, #tpu.memory_space<smem>>
    %c3_593 = arith.constant 3 : index
    %c0_594 = arith.constant 0 : index
    %c0_595 = arith.constant 0 : index
    %954 = vector.load %arg9[%c3_593, %c0_594, %c0_595] : memref<4x16x40xf32, #tpu.memory_space<vmem>>, vector<1x16x38xf32>
    %955 = vector.shape_cast %954 : vector<1x16x38xf32> to vector<16x38xf32>
    %956 = vector.broadcast %953 : f32 to vector<16x38xf32>
    %957 = arith.mulf %956, %955 : vector<16x38xf32>
    %958 = arith.addf %952, %957 : vector<16x38xf32>
    %c82 = arith.constant 82 : index
    %959 = memref.load %arg3[%c82] : memref<96xf32, #tpu.memory_space<smem>>
    %c3_596 = arith.constant 3 : index
    %c0_597 = arith.constant 0 : index
    %c1_598 = arith.constant 1 : index
    %960 = vector.load %arg9[%c3_596, %c0_597, %c1_598] : memref<4x16x40xf32, #tpu.memory_space<vmem>>, vector<1x16x38xf32>
    %961 = vector.shape_cast %960 : vector<1x16x38xf32> to vector<16x38xf32>
    %962 = vector.broadcast %959 : f32 to vector<16x38xf32>
    %963 = arith.mulf %962, %961 : vector<16x38xf32>
    %964 = arith.addf %958, %963 : vector<16x38xf32>
    %c83 = arith.constant 83 : index
    %965 = memref.load %arg3[%c83] : memref<96xf32, #tpu.memory_space<smem>>
    %c3_599 = arith.constant 3 : index
    %c0_600 = arith.constant 0 : index
    %c2_601 = arith.constant 2 : index
    %966 = vector.load %arg9[%c3_599, %c0_600, %c2_601] : memref<4x16x40xf32, #tpu.memory_space<vmem>>, vector<1x16x38xf32>
    %967 = vector.shape_cast %966 : vector<1x16x38xf32> to vector<16x38xf32>
    %968 = vector.broadcast %965 : f32 to vector<16x38xf32>
    %969 = arith.mulf %968, %967 : vector<16x38xf32>
    %970 = arith.addf %964, %969 : vector<16x38xf32>
    %c0_602 = arith.constant 0 : index
    %c6_603 = arith.constant 6 : index
    %c1_604 = arith.constant 1 : index
    %c0_605 = arith.constant 0 : index
    %971 = vector.load %arg5[%c0_602, %c6_603, %c1_604, %c0_605] : memref<1x8x18x40xf32, #tpu.memory_space<vmem>>, vector<1x1x16x38xf32>
    %972 = vector.shape_cast %971 : vector<1x1x16x38xf32> to vector<16x38xf32>
    %973 = vector.shape_cast %970 : vector<16x38xf32> to vector<1x1x16x38xf32>
    tpu.vector_store %arg5[%c0_602, %c6_603, %c1_604, %c0_605], %973 {strides = array<i32>} : memref<1x8x18x40xf32, #tpu.memory_space<vmem>>, vector<1x1x16x38xf32>,
    %974 = vector.broadcast %327 : vector<1x38xf32> to vector<16x38xf32>
    %975 = arith.mulf %970, %974 : vector<16x38xf32>
    %976 = vector.shape_cast %975 : vector<16x38xf32> to vector<1x16x38xf32>
    %cst_606 = arith.constant dense<0.000000e+00> : vector<1xf32>
    %977 = vector.multi_reduction <add>, %976, %cst_606 [1, 2] : vector<1x16x38xf32> to vector<1xf32>
    %978 = vector.shape_cast %977 : vector<1xf32> to vector<1x1x1xf32>
    %979 = vector.extract %978[0, 0, 0] : f32 from vector<1x1x1xf32>
    %980 = vector.broadcast %979 : f32 to vector<1x1xf32>
    %c0_607 = arith.constant 0 : index
    %c6_608 = arith.constant 6 : index
    %c0_609 = arith.constant 0 : index
    %c0_610 = arith.constant 0 : index
    %981 = vector.load %arg6[%c0_607, %c6_608, %c0_609, %c0_610] : memref<1x8x1x1xf32, #tpu.memory_space<vmem>>, vector<1x1x1x1xf32>
    %982 = vector.shape_cast %981 : vector<1x1x1x1xf32> to vector<1x1xf32>
    %983 = vector.shape_cast %980 : vector<1x1xf32> to vector<1x1x1x1xf32>
    tpu.vector_store %arg6[%c0_607, %c6_608, %c0_609, %c0_610], %983 {strides = array<i32>} : memref<1x8x1x1xf32, #tpu.memory_space<vmem>>, vector<1x1x1x1xf32>,
    %984 = arith.mulf %975, %970 : vector<16x38xf32>
    %985 = vector.shape_cast %984 : vector<16x38xf32> to vector<1x16x38xf32>
    %cst_611 = arith.constant dense<0.000000e+00> : vector<1xf32>
    %986 = vector.multi_reduction <add>, %985, %cst_611 [1, 2] : vector<1x16x38xf32> to vector<1xf32>
    %987 = vector.shape_cast %986 : vector<1xf32> to vector<1x1x1xf32>
    %988 = vector.extract %987[0, 0, 0] : f32 from vector<1x1x1xf32>
    %989 = vector.broadcast %988 : f32 to vector<1x1xf32>
    %c0_612 = arith.constant 0 : index
    %c6_613 = arith.constant 6 : index
    %c0_614 = arith.constant 0 : index
    %c0_615 = arith.constant 0 : index
    %990 = vector.load %arg7[%c0_612, %c6_613, %c0_614, %c0_615] : memref<1x8x1x1xf32, #tpu.memory_space<vmem>>, vector<1x1x1x1xf32>
    %991 = vector.shape_cast %990 : vector<1x1x1x1xf32> to vector<1x1xf32>
    %992 = vector.shape_cast %989 : vector<1x1xf32> to vector<1x1x1x1xf32>
    tpu.vector_store %arg7[%c0_612, %c6_613, %c0_614, %c0_615], %992 {strides = array<i32>} : memref<1x8x1x1xf32, #tpu.memory_space<vmem>>, vector<1x1x1x1xf32>,
    %cst_616 = arith.constant 0.000000e+00 : f32
    %993 = vector.broadcast %cst_616 : f32 to vector<16x38xf32>
    %c84 = arith.constant 84 : index
    %994 = memref.load %arg3[%c84] : memref<96xf32, #tpu.memory_space<smem>>
    %c0_617 = arith.constant 0 : index
    %c0_618 = arith.constant 0 : index
    %c0_619 = arith.constant 0 : index
    %995 = vector.load %arg9[%c0_617, %c0_618, %c0_619] : memref<4x16x40xf32, #tpu.memory_space<vmem>>, vector<1x16x38xf32>
    %996 = vector.shape_cast %995 : vector<1x16x38xf32> to vector<16x38xf32>
    %997 = vector.broadcast %994 : f32 to vector<16x38xf32>
    %998 = arith.mulf %997, %996 : vector<16x38xf32>
    %999 = arith.addf %993, %998 : vector<16x38xf32>
    %c85 = arith.constant 85 : index
    %1000 = memref.load %arg3[%c85] : memref<96xf32, #tpu.memory_space<smem>>
    %c0_620 = arith.constant 0 : index
    %c0_621 = arith.constant 0 : index
    %c1_622 = arith.constant 1 : index
    %1001 = vector.load %arg9[%c0_620, %c0_621, %c1_622] : memref<4x16x40xf32, #tpu.memory_space<vmem>>, vector<1x16x38xf32>
    %1002 = vector.shape_cast %1001 : vector<1x16x38xf32> to vector<16x38xf32>
    %1003 = vector.broadcast %1000 : f32 to vector<16x38xf32>
    %1004 = arith.mulf %1003, %1002 : vector<16x38xf32>
    %1005 = arith.addf %999, %1004 : vector<16x38xf32>
    %c86 = arith.constant 86 : index
    %1006 = memref.load %arg3[%c86] : memref<96xf32, #tpu.memory_space<smem>>
    %c0_623 = arith.constant 0 : index
    %c0_624 = arith.constant 0 : index
    %c2_625 = arith.constant 2 : index
    %1007 = vector.load %arg9[%c0_623, %c0_624, %c2_625] : memref<4x16x40xf32, #tpu.memory_space<vmem>>, vector<1x16x38xf32>
    %1008 = vector.shape_cast %1007 : vector<1x16x38xf32> to vector<16x38xf32>
    %1009 = vector.broadcast %1006 : f32 to vector<16x38xf32>
    %1010 = arith.mulf %1009, %1008 : vector<16x38xf32>
    %1011 = arith.addf %1005, %1010 : vector<16x38xf32>
    %c87 = arith.constant 87 : index
    %1012 = memref.load %arg3[%c87] : memref<96xf32, #tpu.memory_space<smem>>
    %c1_626 = arith.constant 1 : index
    %c0_627 = arith.constant 0 : index
    %c0_628 = arith.constant 0 : index
    %1013 = vector.load %arg9[%c1_626, %c0_627, %c0_628] : memref<4x16x40xf32, #tpu.memory_space<vmem>>, vector<1x16x38xf32>
    %1014 = vector.shape_cast %1013 : vector<1x16x38xf32> to vector<16x38xf32>
    %1015 = vector.broadcast %1012 : f32 to vector<16x38xf32>
    %1016 = arith.mulf %1015, %1014 : vector<16x38xf32>
    %1017 = arith.addf %1011, %1016 : vector<16x38xf32>
    %c88 = arith.constant 88 : index
    %1018 = memref.load %arg3[%c88] : memref<96xf32, #tpu.memory_space<smem>>
    %c1_629 = arith.constant 1 : index
    %c0_630 = arith.constant 0 : index
    %c1_631 = arith.constant 1 : index
    %1019 = vector.load %arg9[%c1_629, %c0_630, %c1_631] : memref<4x16x40xf32, #tpu.memory_space<vmem>>, vector<1x16x38xf32>
    %1020 = vector.shape_cast %1019 : vector<1x16x38xf32> to vector<16x38xf32>
    %1021 = vector.broadcast %1018 : f32 to vector<16x38xf32>
    %1022 = arith.mulf %1021, %1020 : vector<16x38xf32>
    %1023 = arith.addf %1017, %1022 : vector<16x38xf32>
    %c89 = arith.constant 89 : index
    %1024 = memref.load %arg3[%c89] : memref<96xf32, #tpu.memory_space<smem>>
    %c1_632 = arith.constant 1 : index
    %c0_633 = arith.constant 0 : index
    %c2_634 = arith.constant 2 : index
    %1025 = vector.load %arg9[%c1_632, %c0_633, %c2_634] : memref<4x16x40xf32, #tpu.memory_space<vmem>>, vector<1x16x38xf32>
    %1026 = vector.shape_cast %1025 : vector<1x16x38xf32> to vector<16x38xf32>
    %1027 = vector.broadcast %1024 : f32 to vector<16x38xf32>
    %1028 = arith.mulf %1027, %1026 : vector<16x38xf32>
    %1029 = arith.addf %1023, %1028 : vector<16x38xf32>
    %c90 = arith.constant 90 : index
    %1030 = memref.load %arg3[%c90] : memref<96xf32, #tpu.memory_space<smem>>
    %c2_635 = arith.constant 2 : index
    %c0_636 = arith.constant 0 : index
    %c0_637 = arith.constant 0 : index
    %1031 = vector.load %arg9[%c2_635, %c0_636, %c0_637] : memref<4x16x40xf32, #tpu.memory_space<vmem>>, vector<1x16x38xf32>
    %1032 = vector.shape_cast %1031 : vector<1x16x38xf32> to vector<16x38xf32>
    %1033 = vector.broadcast %1030 : f32 to vector<16x38xf32>
    %1034 = arith.mulf %1033, %1032 : vector<16x38xf32>
    %1035 = arith.addf %1029, %1034 : vector<16x38xf32>
    %c91 = arith.constant 91 : index
    %1036 = memref.load %arg3[%c91] : memref<96xf32, #tpu.memory_space<smem>>
    %c2_638 = arith.constant 2 : index
    %c0_639 = arith.constant 0 : index
    %c1_640 = arith.constant 1 : index
    %1037 = vector.load %arg9[%c2_638, %c0_639, %c1_640] : memref<4x16x40xf32, #tpu.memory_space<vmem>>, vector<1x16x38xf32>
    %1038 = vector.shape_cast %1037 : vector<1x16x38xf32> to vector<16x38xf32>
    %1039 = vector.broadcast %1036 : f32 to vector<16x38xf32>
    %1040 = arith.mulf %1039, %1038 : vector<16x38xf32>
    %1041 = arith.addf %1035, %1040 : vector<16x38xf32>
    %c92 = arith.constant 92 : index
    %1042 = memref.load %arg3[%c92] : memref<96xf32, #tpu.memory_space<smem>>
    %c2_641 = arith.constant 2 : index
    %c0_642 = arith.constant 0 : index
    %c2_643 = arith.constant 2 : index
    %1043 = vector.load %arg9[%c2_641, %c0_642, %c2_643] : memref<4x16x40xf32, #tpu.memory_space<vmem>>, vector<1x16x38xf32>
    %1044 = vector.shape_cast %1043 : vector<1x16x38xf32> to vector<16x38xf32>
    %1045 = vector.broadcast %1042 : f32 to vector<16x38xf32>
    %1046 = arith.mulf %1045, %1044 : vector<16x38xf32>
    %1047 = arith.addf %1041, %1046 : vector<16x38xf32>
    %c93 = arith.constant 93 : index
    %1048 = memref.load %arg3[%c93] : memref<96xf32, #tpu.memory_space<smem>>
    %c3_644 = arith.constant 3 : index
    %c0_645 = arith.constant 0 : index
    %c0_646 = arith.constant 0 : index
    %1049 = vector.load %arg9[%c3_644, %c0_645, %c0_646] : memref<4x16x40xf32, #tpu.memory_space<vmem>>, vector<1x16x38xf32>
    %1050 = vector.shape_cast %1049 : vector<1x16x38xf32> to vector<16x38xf32>
    %1051 = vector.broadcast %1048 : f32 to vector<16x38xf32>
    %1052 = arith.mulf %1051, %1050 : vector<16x38xf32>
    %1053 = arith.addf %1047, %1052 : vector<16x38xf32>
    %c94 = arith.constant 94 : index
    %1054 = memref.load %arg3[%c94] : memref<96xf32, #tpu.memory_space<smem>>
    %c3_647 = arith.constant 3 : index
    %c0_648 = arith.constant 0 : index
    %c1_649 = arith.constant 1 : index
    %1055 = vector.load %arg9[%c3_647, %c0_648, %c1_649] : memref<4x16x40xf32, #tpu.memory_space<vmem>>, vector<1x16x38xf32>
    %1056 = vector.shape_cast %1055 : vector<1x16x38xf32> to vector<16x38xf32>
    %1057 = vector.broadcast %1054 : f32 to vector<16x38xf32>
    %1058 = arith.mulf %1057, %1056 : vector<16x38xf32>
    %1059 = arith.addf %1053, %1058 : vector<16x38xf32>
    %c95 = arith.constant 95 : index
    %1060 = memref.load %arg3[%c95] : memref<96xf32, #tpu.memory_space<smem>>
    %c3_650 = arith.constant 3 : index
    %c0_651 = arith.constant 0 : index
    %c2_652 = arith.constant 2 : index
    %1061 = vector.load %arg9[%c3_650, %c0_651, %c2_652] : memref<4x16x40xf32, #tpu.memory_space<vmem>>, vector<1x16x38xf32>
    %1062 = vector.shape_cast %1061 : vector<1x16x38xf32> to vector<16x38xf32>
    %1063 = vector.broadcast %1060 : f32 to vector<16x38xf32>
    %1064 = arith.mulf %1063, %1062 : vector<16x38xf32>
    %1065 = arith.addf %1059, %1064 : vector<16x38xf32>
    %c0_653 = arith.constant 0 : index
    %c7_654 = arith.constant 7 : index
    %c1_655 = arith.constant 1 : index
    %c0_656 = arith.constant 0 : index
    %1066 = vector.load %arg5[%c0_653, %c7_654, %c1_655, %c0_656] : memref<1x8x18x40xf32, #tpu.memory_space<vmem>>, vector<1x1x16x38xf32>
    %1067 = vector.shape_cast %1066 : vector<1x1x16x38xf32> to vector<16x38xf32>
    %1068 = vector.shape_cast %1065 : vector<16x38xf32> to vector<1x1x16x38xf32>
    tpu.vector_store %arg5[%c0_653, %c7_654, %c1_655, %c0_656], %1068 {strides = array<i32>} : memref<1x8x18x40xf32, #tpu.memory_space<vmem>>, vector<1x1x16x38xf32>,
    %1069 = vector.broadcast %327 : vector<1x38xf32> to vector<16x38xf32>
    %1070 = arith.mulf %1065, %1069 : vector<16x38xf32>
    %1071 = vector.shape_cast %1070 : vector<16x38xf32> to vector<1x16x38xf32>
    %cst_657 = arith.constant dense<0.000000e+00> : vector<1xf32>
    %1072 = vector.multi_reduction <add>, %1071, %cst_657 [1, 2] : vector<1x16x38xf32> to vector<1xf32>
    %1073 = vector.shape_cast %1072 : vector<1xf32> to vector<1x1x1xf32>
    %1074 = vector.extract %1073[0, 0, 0] : f32 from vector<1x1x1xf32>
    %1075 = vector.broadcast %1074 : f32 to vector<1x1xf32>
    %c0_658 = arith.constant 0 : index
    %c7_659 = arith.constant 7 : index
    %c0_660 = arith.constant 0 : index
    %c0_661 = arith.constant 0 : index
    %1076 = vector.load %arg6[%c0_658, %c7_659, %c0_660, %c0_661] : memref<1x8x1x1xf32, #tpu.memory_space<vmem>>, vector<1x1x1x1xf32>
    %1077 = vector.shape_cast %1076 : vector<1x1x1x1xf32> to vector<1x1xf32>
    %1078 = vector.shape_cast %1075 : vector<1x1xf32> to vector<1x1x1x1xf32>
    tpu.vector_store %arg6[%c0_658, %c7_659, %c0_660, %c0_661], %1078 {strides = array<i32>} : memref<1x8x1x1xf32, #tpu.memory_space<vmem>>, vector<1x1x1x1xf32>,
    %1079 = arith.mulf %1070, %1065 : vector<16x38xf32>
    %1080 = vector.shape_cast %1079 : vector<16x38xf32> to vector<1x16x38xf32>
    %cst_662 = arith.constant dense<0.000000e+00> : vector<1xf32>
    %1081 = vector.multi_reduction <add>, %1080, %cst_662 [1, 2] : vector<1x16x38xf32> to vector<1xf32>
    %1082 = vector.shape_cast %1081 : vector<1xf32> to vector<1x1x1xf32>
    %1083 = vector.extract %1082[0, 0, 0] : f32 from vector<1x1x1xf32>
    %1084 = vector.broadcast %1083 : f32 to vector<1x1xf32>
    %c0_663 = arith.constant 0 : index
    %c7_664 = arith.constant 7 : index
    %c0_665 = arith.constant 0 : index
    %c0_666 = arith.constant 0 : index
    %1085 = vector.load %arg7[%c0_663, %c7_664, %c0_665, %c0_666] : memref<1x8x1x1xf32, #tpu.memory_space<vmem>>, vector<1x1x1x1xf32>
    %1086 = vector.shape_cast %1085 : vector<1x1x1x1xf32> to vector<1x1xf32>
    %1087 = vector.shape_cast %1084 : vector<1x1xf32> to vector<1x1x1x1xf32>
    tpu.vector_store %arg7[%c0_663, %c7_664, %c0_665, %c0_666], %1087 {strides = array<i32>} : memref<1x8x1x1xf32, #tpu.memory_space<vmem>>, vector<1x1x1x1xf32>,
    return
  }
  func.func @transform_0(%arg0: i32) -> (i32, i32, i32, i32) {
    %c0_i32 = arith.constant 0 : i32
    %c0_i32_0 = arith.constant 0 : i32
    %c0_i32_1 = arith.constant 0 : i32
    %c0_i32_2 = arith.constant 0 : i32
    return %arg0, %c0_i32, %c0_i32_0, %c0_i32_1 : i32, i32, i32, i32
  }
  func.func @transform_1(%arg0: i32) -> i32 {
    %c0_i32 = arith.constant 0 : i32
    %c0_i32_0 = arith.constant 0 : i32
    return %c0_i32 : i32
  }
  func.func @transform_2(%arg0: i32) -> i32 {
    %c0_i32 = arith.constant 0 : i32
    %c0_i32_0 = arith.constant 0 : i32
    return %c0_i32 : i32
  }
  func.func @transform_3(%arg0: i32) -> (i32, i32) {
    %c0_i32 = arith.constant 0 : i32
    %c0_i32_0 = arith.constant 0 : i32
    %c0_i32_1 = arith.constant 0 : i32
    return %c0_i32, %c0_i32_0 : i32, i32
  }
  func.func @transform_4(%arg0: i32) -> (i32, i32, i32, i32) {
    %c0_i32 = arith.constant 0 : i32
    %c0_i32_0 = arith.constant 0 : i32
    %c0_i32_1 = arith.constant 0 : i32
    %c0_i32_2 = arith.constant 0 : i32
    return %arg0, %c0_i32, %c0_i32_0, %c0_i32_1 : i32, i32, i32, i32
  }
  func.func @transform_5(%arg0: i32) -> (i32, i32, i32, i32) {
    %c0_i32 = arith.constant 0 : i32
    %c0_i32_0 = arith.constant 0 : i32
    %c0_i32_1 = arith.constant 0 : i32
    %c0_i32_2 = arith.constant 0 : i32
    return %arg0, %c0_i32, %c0_i32_0, %c0_i32_1 : i32, i32, i32, i32
  }
  func.func @transform_6(%arg0: i32) -> (i32, i32, i32, i32) {
    %c0_i32 = arith.constant 0 : i32
    %c0_i32_0 = arith.constant 0 : i32
    %c0_i32_1 = arith.constant 0 : i32
    %c0_i32_2 = arith.constant 0 : i32
    return %arg0, %c0_i32, %c0_i32_0, %c0_i32_1 : i32, i32, i32, i32
  }
}

</mosaic_0001>

<bundles_post_ra>
// kernel: fac_conv.1
= control target key start
LH: loop header
LB: loop body
LE: loop exit
PB: predicated region body
PF: predicated region fallthrough
CT: control target
= control target key end

     0   :  { %s3690_s0 = inlined_call_operand.hbm [shape: f32[2,4,16,16], index: 0, kind: input, shape index: {}]   ;;  %s3691_s1 = inlined_call_operand.vmem [shape: f32[48], index: 1, kind: input, shape index: {}]   ;;  %s3692_s2 = inlined_call_operand.vmem [shape: f32[96], index: 2, kind: input, shape index: {}]   ;;  %s3693_s3 = inlined_call_operand.vmem [shape: f32[1,38], index: 3, kind: input, shape index: {}]   ;;  %s3694_s4 = inlined_call_operand.vmem [shape: f32[1,8,18,40], index: 4, kind: output, shape index: {0}]   ;;  %s3695_s5 = inlined_call_operand.vmem [shape: f32[1,8,1,1], index: 5, kind: output, shape index: {1}]   ;;  %s3696_s6 = inlined_call_operand.vmem [shape: f32[1,8,1,1], index: 6, kind: output, shape index: {2}]  }
   0x1   :  { %3754 = sst [smem:[#allocation45_spill]] %s3693_s3 }
   0x2   :  { %3755 = sst [smem:[#allocation46_spill]] %s3694_s4 }
   0x3   :  { %3756 = sst [smem:[#allocation47_spill]] %s3695_s5 }
   0x4   :  { %3757 = sst [smem:[#allocation48_spill]] %s3696_s6 }
   0x5   :  { %12 = vsyncpa [#allocation5], 0 }
   0x6   :  { %13 = vsyncpa [#allocation6], 0 }
   0x7   :  { %14 = vsyncpa [#allocation9], 0  ;;  %s2385_s21 = smov [#allocation4]   ;;  %s33_s25 = sshll.u32 %s3691_s1, 4  ;;  %s34_s25 = int_to_ptr.vmem [resolvable:$true] %s33_s25 }
   0x8   :  { %s20_s22 = sshll.u32 %s2385_s21, 4  ;;  %s21_s22 = int_to_ptr.vmem [resolvable:$true] %s20_s22 }
   0x9   :  { %s2343_s26 = scalar_lea.vmem %s21_s22, 2048  ;;  %p2348_p1 = scmp.lt.s32.totalorder %s21_s22, %s21_s22 }
   0xa   :  { %p2344_p0 = scmp.ne.s32.totalorder %s21_s22, %s2343_s26  ;;  %p2349_p2 = scmp.lt.s32.totalorder %s2343_s26, %s2343_s26 }
   0xc   :  { %p2350_p3 = por %p2349_p2, %p2348_p1 }
   0xe   :  { %p2351_p4 = pnand %p2350_p3, %p2344_p0 }
  0x10   :  { %2354 = shalt.err (!%p2351_p4)
}
  0x11   :  { %s2386_s27 = smov 128   ;;  %s2387_s28 = smov 8  }
  0x12   :  { %26 = dma.hbm_to_vmem [thread:$0]  %s3690_s0, 2048, %s21_s22, [#allocation5], %s2386_s27, %s2386_s27, %s2387_s28  }
  0x13   :  { %s2355_s7 = scalar_lea.vmem %s34_s25, 16  ;;  %p2360_p6 = scmp.lt.s32.totalorder %s34_s25, %s34_s25 }
  0x14   :  { %p2356_p5 = scmp.ne.s32.totalorder %s34_s25, %s2355_s7  ;;  %p2361_p7 = scmp.lt.s32.totalorder %s2355_s7, %s2355_s7 }
  0x16   :  { %p2362_p8 = por %p2361_p7, %p2360_p6 }
  0x18   :  { %p2363_p9 = pnand %p2362_p8, %p2356_p5 }
  0x1a   :  { %2366 = shalt.err (!%p2363_p9)
}
  0x1b   :  { %s2388_s1 = smov [#allocation7]   ;;  %s43_s10 = sshll.u32 %s3692_s2, 4  ;;  %s44_s10 = int_to_ptr.vmem [resolvable:$true] %s43_s10 }
  0x1c   :  { %36 = dma.vmem_to_smem %s34_s25, 16, %s2388_s1, [#allocation6]  }
  0x1d   :  { %s2367_s11 = scalar_lea.vmem %s44_s10, 16  ;;  %p2372_p11 = scmp.lt.s32.totalorder %s44_s10, %s44_s10 }
  0x1e   :  { %p2368_p10 = scmp.ne.s32.totalorder %s44_s10, %s2367_s11  ;;  %p2373_p12 = scmp.lt.s32.totalorder %s2367_s11, %s2367_s11 }
  0x20   :  { %p2374_p13 = por %p2373_p12, %p2372_p11 }
  0x22   :  { %p2375_p0 = pnand %p2374_p13, %p2368_p10 }
  0x24   :  { %2378 = shalt.err (!%p2375_p0)
}
  0x25   :  { %s2389_s0 = smov [#allocation8]  }
  0x26   :  { %46 = dma.vmem_to_smem %s44_s10, 16, %s2389_s0, [#allocation9]  }
  0x27   :  { %2379 = dma.done.wait [#allocation5], 2048  }
  0x28   :  { %2380 = vsyncadd [#allocation5], 4294965248 }
  0x29   :  { %2381 = dma.done.wait [#allocation6], 16  }
  0x2a   :  { %2382 = vsyncadd [#allocation6], 4294967280 }
  0x2b   :  { %2383 = dma.done.wait [#allocation9], 16  }
  0x2c   :  { %2384 = vsyncadd [#allocation9], 4294967280 }
  0x2d   :  { %58 = sfence }
  0x2e   :  { %v88_v0 = vld [vmem:[#allocation4 + $0x10] sm:$0xff]  ;;  %v86_v1 = vld [vmem:[#allocation4] sm:$0xff]  ;;  %v89_v2 = vld [vmem:[#allocation4 + $0x18] sm:$0xff]  ;;  %s2390_s2 = smov 2   ;;  %vm68_vm0 = vcmask 15360   ;;  %vm77_vm1 = vcmask 162960  }
  0x2f   :  { %v96_v3 = vmax.f32 %v88_v0, 0.0  ;;  %v94_v4 = vmax.f32 %v86_v1, 0.0  ;;  %v87_v5 = vld [vmem:[#allocation4 + $0x8] sm:$0xff]  ;;  %v97_v6 = vmax.f32 %v89_v2, 0.0  ;;  %v2443_v9 = vld [vmem:[#allocation4 + $0x20] sm:$0xff]  ;;  %v2391_v12 = vmov 0.0  }
  0x30   :  { %v95_v7 = vmax.f32 %v87_v5, 0.0  ;;  %v2441_v8 = vld [vmem:[#allocation4 + $0x28] sm:$0xff]  ;;  %v98_v11 = vmax.f32 %v2443_v9, 0.0  ;;  %71 = vst.msk [vmem:[#allocation2 + $0x19] sm:$0xff] %vm68_vm0, %v2391_v12  ;;  %69 = vst.msk [vmem:[#allocation2 + $0x1] sm:$0xff] %vm68_vm0, %v2391_v12  ;;  %vm152_vm2 = vcmask 326960  }
  0x31   :  { %114 = vrot.lane.b32.xlu1 %v96_v3, %s2390_s2  ;;  %110 = vrot.lane.b32.xlu0 %v94_v4, %s2390_s2  ;;  %v99_v10 = vmax.f32 %v2441_v8, 0.0  ;;  %70 = vst.msk [vmem:[#allocation2 + $0x9] sm:$0xff] %vm68_vm0, %v2391_v12  ;;  %72 = vst.msk [vmem:[#allocation2 + $0x21] sm:$0xff] %vm68_vm0, %v2391_v12  ;;  %vm59_vm3 = vcmask 319488   ;;  %v93_v13 = vld [vmem:[#allocation4 + $0x38] sm:$0xff]  ;;  %v92_v14 = vld [vmem:[#allocation4 + $0x30] sm:$0xff] }
  0x32   :  { %73 = vst.msk [vmem:[#allocation2 + $0x31] sm:$0xff] %vm68_vm0, %v2391_v12  ;;  %74 = vst.msk [vmem:[#allocation2 + $0x39] sm:$0xff] %vm68_vm0, %v2391_v12  ;;  %v101_v15 = vmax.f32 %v93_v13, 0.0  ;;  %v100_v16 = vmax.f32 %v92_v14, 0.0  ;;  %v163_v17 = vld [vmem:[#allocation4 + $0x48] sm:$0xff]  ;;  %v162_v18 = vld [vmem:[#allocation4 + $0x40] sm:$0xff] }
  0x33   :  { %75 = vst.msk [vmem:[#allocation2 + $0x49] sm:$0xff] %vm68_vm0, %v2391_v12  ;;  %76 = vst.msk [vmem:[#allocation2 + $0x51] sm:$0xff] %vm68_vm0, %v2391_v12  ;;  %v171_v19 = vmax.f32 %v163_v17, 0.0  ;;  %v170_v20 = vmax.f32 %v162_v18, 0.0  ;;  %v165_v21 = vld [vmem:[#allocation4 + $0x58] sm:$0xff]  ;;  %v164_v22 = vld [vmem:[#allocation4 + $0x50] sm:$0xff] }
  0x34   :  { %80 = vst.msk [vmem:[#allocation2 + $0x19] sm:$0xff] %vm77_vm1, %v2391_v12  ;;  %78 = vst.msk [vmem:[#allocation2 + $0x1] sm:$0xff] %vm77_vm1, %v2391_v12  ;;  %s2392_s24 = smov 22   ;;  %v173_v23 = vmax.f32 %v165_v21, 0.0  ;;  %v172_v24 = vmax.f32 %v164_v22, 0.0  ;;  %v167_v25 = vld [vmem:[#allocation4 + $0x68] sm:$0xff] }
  0x35   :  { %116 = vrot.lane.b32.xlu1 %v97_v6, %s2390_s2  ;;  %112 = vrot.lane.b32.xlu0 %v95_v7, %s2390_s2  ;;  %79 = vst.msk [vmem:[#allocation2 + $0x9] sm:$0xff] %vm77_vm1, %v2391_v12  ;;  %81 = vst.msk [vmem:[#allocation2 + $0x21] sm:$0xff] %vm77_vm1, %v2391_v12  ;;  %v166_v26 = vld [vmem:[#allocation4 + $0x60] sm:$0xff]  ;;  %v175_v27 = vmax.f32 %v167_v25, 0.0  ;;  %v169_v29 = vld [vmem:[#allocation4 + $0x78] sm:$0xff]  ;;  %s2657_s25 = sld [smem:[#allocation7 + $0x2]] }
  0x36   :  { %82 = vst.msk [vmem:[#allocation2 + $0x31] sm:$0xff] %vm77_vm1, %v2391_v12  ;;  %83 = vst.msk [vmem:[#allocation2 + $0x39] sm:$0xff] %vm77_vm1, %v2391_v12  ;;  %v174_v28 = vmax.f32 %v166_v26, 0.0  ;;  %v168_v30 = vld [vmem:[#allocation4 + $0x70] sm:$0xff]  ;;  %v177_v31 = vmax.f32 %v169_v29, 0.0  ;;  %s2659_s26 = sld [smem:[#allocation7 + $0xd]] }
  0x37   :  { %84 = vst.msk [vmem:[#allocation2 + $0x49] sm:$0xff] %vm77_vm1, %v2391_v12  ;;  %85 = vst.msk [vmem:[#allocation2 + $0x51] sm:$0xff] %vm77_vm1, %v2391_v12  ;;  %v176_v32 = vmax.f32 %v168_v30, 0.0  ;;  %s2661_s27 = sld [smem:[#allocation7 + $0xe]]  ;;  %vm134_vm4 = vcmask 146448   ;;  %vm143_vm5 = vcmask 179360  }
  0x38   :  { %64 = vst.msk [vmem:[#allocation2 + $0x11] sm:$0x1] %vm59_vm3, %v2391_v12  ;;  %618 = vst.msk [vmem:[%s3694_s4] sm:$0x1] %vm59_vm3, %v2391_v12  ;;  %s2663_s28 = sld [smem:[#allocation7 + $0x19]]  ;;  %vm210_vm6 = vcmask 310448  }
  0x39   :  { %619 = vst.msk [vmem:[%s3694_s4 + $0x18] sm:$0x1] %vm59_vm3, %v2391_v12  ;;  %620 = vst.msk [vmem:[%s3694_s4 + $0x30] sm:$0x1] %vm59_vm3, %v2391_v12  ;;  %120 = vrot.lane.b32.xlu1 %v99_v10, %s2390_s2  ;;  %118 = vrot.lane.b32.xlu0 %v98_v11, %s2390_s2  ;;  %s2665_s29 = sld [smem:[#allocation7 + $0x1a]]  ;;  %vm318_vm7 = vcmask 326656  }
  0x3a   :  { %621 = vst.msk [vmem:[%s3694_s4 + $0x48] sm:$0x1] %vm59_vm3, %v2391_v12  ;;  %622 = vst.msk [vmem:[%s3694_s4 + $0x60] sm:$0x1] %vm59_vm3, %v2391_v12  ;;  %s2667_s30 = sld [smem:[#allocation7 + $0x25]]  ;;  %vm795_vm8 = vcmask 310272  }
  0x3b   :  { %623 = vst.msk [vmem:[%s3694_s4 + $0x78] sm:$0x1] %vm59_vm3, %v2391_v12  ;;  %624 = vst.msk [vmem:[%s3694_s4 + $0x90] sm:$0x1] %vm59_vm3, %v2391_v12  ;;  %s2669_s7 = sld [smem:[#allocation7 + $0x26]]  ;;  %v238_v42 = vstv %s2657_s25  ;;  %vm819_vm9 = vcmask 0  }
  0x3c   :  { %625 = vst.msk [vmem:[%s3694_s4 + $0xa8] sm:$0x1] %vm59_vm3, %v2391_v12  ;;  %626 = vst.msk [vmem:[%s3694_s4 + $0x11] sm:$0x1] %vm59_vm3, %v2391_v12  ;;  %3758 = sst [smem:[#allocation13_spill]] %s2659_s26  ;;  %v332_v43 = vstv %s2659_s26 }
  0x3d   :  { %627 = vst.msk [vmem:[%s3694_s4 + $0x29] sm:$0x1] %vm59_vm3, %v2391_v12  ;;  %628 = vst.msk [vmem:[%s3694_s4 + $0x41] sm:$0x1] %vm59_vm3, %v2391_v12  ;;  %124 = vrot.lane.b32.xlu1 %v101_v15, %s2390_s2  ;;  %122 = vrot.lane.b32.xlu0 %v100_v16, %s2390_s2  ;;  %s2655_s2 = sld [smem:[#allocation7 + $0x1]] }
  0x3e   :  { %629 = vst.msk [vmem:[%s3694_s4 + $0x59] sm:$0x1] %vm59_vm3, %v2391_v12  ;;  %630 = vst.msk [vmem:[%s3694_s4 + $0x71] sm:$0x1] %vm59_vm3, %v2391_v12  ;;  %3759 = sst [smem:[#allocation14_spill]] %s2663_s28  ;;  %v340_v44 = vstv %s2661_s27  ;;  %v431_v45 = vstv %s2663_s28 }
  0x3f   :  { %631 = vst.msk [vmem:[%s3694_s4 + $0x89] sm:$0x1] %vm59_vm3, %v2391_v12  ;;  %632 = vst.msk [vmem:[%s3694_s4 + $0xa1] sm:$0x1] %vm59_vm3, %v2391_v12  ;;  %3760 = sst [smem:[#allocation15_spill]] %s2665_s29  ;;  %v439_v46 = vstv %s2665_s29 }
  0x40   :  { %633 = vst.msk [vmem:[%s3694_s4 + $0xb9] sm:$0x1] %vm59_vm3, %v2391_v12  ;;  %60 = vst.msk [vmem:[#allocation2] sm:$0x1] %vm59_vm3, %v2391_v12  ;;  %3761 = sst [smem:[#allocation16_spill]] %s2667_s30  ;;  %v530_v47 = vstv %s2667_s30 }
  0x41   :  { %61 = vst.msk [vmem:[#allocation2 + $0x18] sm:$0x1] %vm59_vm3, %v2391_v12  ;;  %62 = vst.msk [vmem:[#allocation2 + $0x30] sm:$0x1] %vm59_vm3, %v2391_v12  ;;  %188 = vrot.lane.b32.xlu1 %v171_v19, %s2392_s24  ;;  %186 = vrot.lane.b32.xlu0 %v170_v20, %s2392_s24  ;;  %3762 = sst [smem:[#allocation17_spill]] %s2669_s7  ;;  %v538_v48 = vstv %s2669_s7 }
  0x42   :  { %63 = vst.msk [vmem:[#allocation2 + $0x48] sm:$0x1] %vm59_vm3, %v2391_v12  ;;  %65 = vst.msk [vmem:[#allocation2 + $0x29] sm:$0x1] %vm59_vm3, %v2391_v12  ;;  %s2671_s1 = sld [smem:[#allocation7]] }
  0x43   :  { %66 = vst.msk [vmem:[#allocation2 + $0x41] sm:$0x1] %vm59_vm3, %v2391_v12  ;;  %67 = vst.msk [vmem:[#allocation2 + $0x59] sm:$0x1] %vm59_vm3, %v2391_v12  ;;  %s2673_s8 = sld [smem:[#allocation7 + $0xc]]  ;;  %v230_v41 = vstv %s2655_s2 }
  0x44   :  { %634 = vst.msk [vmem:[%s3694_s4 + $0x1] sm:$0xff] %vm152_vm2, %v2391_v12  ;;  %635 = vst.msk [vmem:[%s3694_s4 + $0x9] sm:$0xff] %vm152_vm2, %v2391_v12  ;;  %s2675_s9 = sld [smem:[#allocation7 + $0x18]] }
  0x45   :  { %636 = vst.msk [vmem:[%s3694_s4 + $0x19] sm:$0xff] %vm152_vm2, %v2391_v12  ;;  %637 = vst.msk [vmem:[%s3694_s4 + $0x21] sm:$0xff] %vm152_vm2, %v2391_v12  ;;  %192 = vrot.lane.b32.xlu1 %v173_v23, %s2392_s24  ;;  %190 = vrot.lane.b32.xlu0 %v172_v24, %s2392_s24  ;;  %s2677_s10 = sld [smem:[#allocation7 + $0x24]] }
  0x46   :  { %638 = vst.msk [vmem:[%s3694_s4 + $0x31] sm:$0xff] %vm152_vm2, %v2391_v12  ;;  %639 = vst.msk [vmem:[%s3694_s4 + $0x39] sm:$0xff] %vm152_vm2, %v2391_v12  ;;  %s2679_s11 = sld [smem:[#allocation7 + $0x4]] }
  0x47   :  { %640 = vst.msk [vmem:[%s3694_s4 + $0x49] sm:$0xff] %vm152_vm2, %v2391_v12  ;;  %641 = vst.msk [vmem:[%s3694_s4 + $0x51] sm:$0xff] %vm152_vm2, %v2391_v12  ;;  %s2681_s0 = sld [smem:[#allocation7 + $0x5]] }
  0x48   :  { %642 = vst.msk [vmem:[%s3694_s4 + $0x61] sm:$0xff] %vm152_vm2, %v2391_v12  ;;  %643 = vst.msk [vmem:[%s3694_s4 + $0x69] sm:$0xff] %vm152_vm2, %v2391_v12  ;;  %3763 = sst [smem:[#allocation18_spill]] %s2671_s1  ;;  %v222_v49 = vstv %s2671_s1 }
  0x49   :  { %644 = vst.msk [vmem:[%s3694_s4 + $0x79] sm:$0xff] %vm152_vm2, %v2391_v12  ;;  %645 = vst.msk [vmem:[%s3694_s4 + $0x81] sm:$0xff] %vm152_vm2, %v2391_v12  ;;  %196 = vrot.lane.b32.xlu1 %v175_v27, %s2392_s24  ;;  %194 = vrot.lane.b32.xlu0 %v174_v28, %s2392_s24  ;;  %3764 = sst [smem:[#allocation19_spill]] %s2673_s8 }
  0x4a   :  { %646 = vst.msk [vmem:[%s3694_s4 + $0x91] sm:$0xff] %vm152_vm2, %v2391_v12  ;;  %647 = vst.msk [vmem:[%s3694_s4 + $0x99] sm:$0xff] %vm152_vm2, %v2391_v12  ;;  %3765 = sst [smem:[#allocation20_spill]] %s2675_s9  ;;  %v324_v51 = vstv %s2673_s8  ;;  %v423_v52 = vstv %s2675_s9 }
  0x4b   :  { %648 = vst.msk [vmem:[%s3694_s4 + $0xa9] sm:$0xff] %vm152_vm2, %v2391_v12  ;;  %649 = vst.msk [vmem:[%s3694_s4 + $0xb1] sm:$0xff] %vm152_vm2, %v2391_v12  ;;  %3766 = sst [smem:[#allocation21_spill]] %s2677_s10  ;;  %v522_v53 = vstv %s2677_s10 }
  0x4c   :  { %3767 = sst [smem:[#allocation22_spill]] %s2679_s11  ;;  %v255_v55 = vstv %s2679_s11 }
  0x4d   :  { %200 = vrot.lane.b32.xlu1 %v177_v31, %s2392_s24  ;;  %198 = vrot.lane.b32.xlu0 %v176_v32, %s2392_s24  ;;  %3768 = sst [smem:[#allocation23_spill]] %s2681_s0  ;;  %v263_v56 = vstv %s2681_s0 }
  0x4e   :  { %s2683_s12 = sld [smem:[#allocation7 + $0x10]] }
  0x4f   :  { %s2685_s13 = sld [smem:[#allocation7 + $0x11]] }
  0x50   :  { %s2687_s14 = sld [smem:[#allocation7 + $0x1c]] }
  0x51   :  { %s2689_s15 = sld [smem:[#allocation7 + $0x1d]] }
  0x52   :  { %s2691_s16 = sld [smem:[#allocation7 + $0x28]] }
  0x53   :  { %s2693_s17 = sld [smem:[#allocation7 + $0x29]] }
  0x54   :  { %3769 = sst [smem:[#allocation24_spill]] %s2683_s12  ;;  %v356_v57 = vstv %s2683_s12 }
  0x55   :  { %3770 = sst [smem:[#allocation25_spill]] %s2685_s13  ;;  %v364_v58 = vstv %s2685_s13 }
  0x56   :  { %3771 = sst [smem:[#allocation26_spill]] %s2687_s14  ;;  %v455_v59 = vstv %s2687_s14 }
  0x57   :  { %3772 = sst [smem:[#allocation27_spill]] %s2689_s15  ;;  %v463_v60 = vstv %s2689_s15 }
  0x58   :  { %3773 = sst [smem:[#allocation28_spill]] %s2691_s16  ;;  %v554_v61 = vstv %s2691_s16 }
  0x59   :  { %s2695_s18 = sld [smem:[#allocation7 + $0x3]]  ;;  %v562_v62 = vstv %s2693_s17  ;;  %s2394_s17 = smov 126  }
  0x5a   :  { %s2697_s19 = sld [smem:[#allocation7 + $0xf]] }
  0x5b   :  { %s2699_s20 = sld [smem:[#allocation7 + $0x1b]] }
  0x5c   :  { %s2701_s21 = sld [smem:[#allocation7 + $0x27]] }
  0x5d   :  { %s2703_s22 = sld [smem:[#allocation7 + $0x7]] }
  0x5e   :  { %s2705_s23 = sld [smem:[#allocation7 + $0x8]] }
  0x5f   :  { %s2707_s24 = sld [smem:[#allocation7 + $0x13]]  ;;  %v247_v63 = vstv %s2695_s18 }
  0x60   :  { %s2709_s6 = sld [smem:[#allocation7 + $0x14]]  ;;  %v348_v0 = vstv %s2697_s19 }
  0x61   :  { %s2711_s5 = sld [smem:[#allocation7 + $0x1f]]  ;;  %v447_v1 = vstv %s2699_s20 }
  0x62   :  { %s2713_s4 = sld [smem:[#allocation7 + $0x20]]  ;;  %v546_v2 = vstv %s2701_s21 }
  0x63   :  { %3774 = sst [smem:[#allocation29_spill]] %s2703_s22 }
  0x64   :  { %s2715_s3 = sld [smem:[#allocation7 + $0x2b]]  ;;  %v288_v6 = vstv %s2705_s23 }
  0x65   :  { %s2719_s22 = sld [smem:[#allocation7 + $0x2c]]  ;;  %v380_v7 = vstv %s2707_s24 }
  0x66   :  { %s2794_s26 = sld [smem:[#allocation7 + $0x15]]  ;;  %v388_v8 = vstv %s2709_s6 }
  0x67   :  { %3775 = sst [smem:[#allocation30_spill]] %s2711_s5 }
  0x68   :  { %3776 = sst [smem:[#allocation31_spill]] %s2713_s4 }
  0x69   :  { %s2725_s5 = sld [smem:[#allocation7 + $0x6]] }
  0x6a   :  { %3777 = sst [smem:[#allocation32_spill]] %s2715_s3 }
  0x6b   :  { %3778 = sst [smem:[#allocation33_spill]] %s2719_s22 }
  0x6c   :  { %s2731_s3 = sld [smem:[#allocation7 + $0x12]] }
  0x6d   :  { %s2733_s4 = sld [smem:[#allocation7 + $0x1e]] }
  0x6e   :  { %s2737_s22 = sld [smem:[#allocation7 + $0x2a]] }
  0x6f   :  { %3779 = sst [smem:[#allocation34_spill]] %s2725_s5 }
  0x70   :  { %s2743_s5 = sld [smem:[#allocation7 + $0xa]] }
  0x71   :  { %s3790_s7 = sld [smem:[#allocation29_spill]] }
  0x72   :  { %3780 = sst [smem:[#allocation35_spill]] %s2731_s3 }
  0x73   :  { %3781 = sst [smem:[#allocation36_spill]] %s2733_s4 }
  0x74   :  { %3782 = sst [smem:[#allocation37_spill]] %s2737_s22 }
  0x75   :  { %s2749_s4 = sld [smem:[#allocation7 + $0xb]] }
  0x76   :  { %3783 = sst [smem:[#allocation38_spill]] %s2743_s5  ;;  %v305_v17 = vstv %s2743_s5 }
  0x77   :  { %s2751_s3 = sld [smem:[#allocation7 + $0x16]]  ;;  %v280_v3 = vstv %s3790_s7 }
  0x78   :  { %s2755_s22 = sld [smem:[#allocation7 + $0x17]] }
  0x79   :  { %s2800_s30 = sld [smem:[#allocation7 + $0x21]] }
  0x7a   :  { %s3791_s9 = sld [smem:[#allocation30_spill]] }
  0x7b   :  { %3784 = sst [smem:[#allocation39_spill]] %s2749_s4 }
  0x7c   :  { %s2761_s4 = sld [smem:[#allocation7 + $0x22]] }
  0x7d   :  { %3785 = sst [smem:[#allocation40_spill]] %s2751_s3 }
  0x7e   :  { %3786 = sst [smem:[#allocation41_spill]] %s2755_s22 }
  0x7f   :  { %s2767_s3 = sld [smem:[#allocation7 + $0x23]] }
  0x80   :  { %s2769_s22 = sld [smem:[#allocation7 + $0x2e]]  ;;  %v479_v9 = vstv %s3791_s9 }
  0x81   :  { %s2808_s10 = sld [smem:[#allocation7 + $0x2d]] }
  0x82   :  { %3787 = sst [smem:[#allocation42_spill]] %s2761_s4 }
  0x83   :  { %s2774_s4 = sld [smem:[#allocation7 + $0x2f]] }
  0x84   :  { %s3793_s8 = sld [smem:[#allocation31_spill]] }
  0x85   :  { %s3794_s11 = sld [smem:[#allocation32_spill]] }
  0x86   :  { %3788 = sst [smem:[#allocation43_spill]] %s2769_s22 }
  0x87   :  { %s2784_s22 = sld [smem:[#allocation7 + $0x9]] }
  0x88   :  { %3792 = sst [smem:[#allocation30_spill]] %s2808_s10 }
  0x89   :  { %3789 = sst [smem:[#allocation44_spill]] %s2774_s4 }
  0x8a   :  { %s3795_s1 = sld [smem:[#allocation33_spill]]  ;;  %v487_v10 = vstv %s3793_s8 }
  0x8b   :  { %s3796_s29 = sld [smem:[#allocation34_spill]]  ;;  %v578_v11 = vstv %s3794_s11 }
  0x8c   :  { %s3797_s28 = sld [smem:[#allocation35_spill]] }
  0x8d   :  { %s3798_s0 = sld [smem:[#allocation36_spill]] }
  0x8e   :  { %s3799_s12 = sld [smem:[#allocation37_spill]] }
  0x8f   :  { %s3800_s14 = sld [smem:[#allocation39_spill]] }
  0x90   :  { %s3801_s13 = sld [smem:[#allocation40_spill]] }
  0x91   :  { %v272_v13 = vstv %s3796_s29  ;;  %s3826_s6 = sld [smem:[#allocation41_spill]] }
  0x92   :  { %v372_v14 = vstv %s3797_s28  ;;  %s3827_s9 = sld [smem:[#allocation42_spill]] }
  0x93   :  { %v471_v15 = vstv %s3798_s0  ;;  %s3835_s8 = sld [smem:[#allocation30_spill]] }
  0x94   :  { %v570_v16 = vstv %s3799_s12  ;;  %s3052_s11 = sld [smem:[#allocation8 + $0x1]] }
  0x95   :  { %v313_v18 = vstv %s3800_s14  ;;  %s3842_s12 = sld [smem:[#allocation44_spill]]  ;;  %s2393_s14 = smov 127  }
  0x96   :  { %v404_v19 = vstv %s3801_s13  ;;  %s2170_s13 = sld [smem:[#allocation8 + $0x5]] }
  0x97   :  { %s2172_s16 = sld [smem:[#allocation8 + $0x7]] }
  0x98   :  { %s2173_s18 = sld [smem:[#allocation8 + $0x8]] }
  0x99   :  { %s2175_s19 = sld [smem:[#allocation8 + $0xa]] }
  0x9a   :  { %s2176_s20 = sld [smem:[#allocation8 + $0xb]] }
  0x9b   :  { %s2179_s21 = sld [smem:[#allocation8 + $0xd]] }
  0x9c   :  { %s2182_s23 = sld [smem:[#allocation8 + $0x10]] }
  0x9d   :  { %s2183_s24 = sld [smem:[#allocation8 + $0x11]] }
  0x9e   :  { %s2185_s5 = sld [smem:[#allocation8 + $0x13]] }
  0x9f   :  { %s2186_s2 = sld [smem:[#allocation8 + $0x14]] }
  0xa0   :  { %s2188_s7 = sld [smem:[#allocation8 + $0x16]] }
  0xa1   :  { %s2195_s25 = sld [smem:[#allocation8 + $0x19]] }
  0xa2   :  { %s2196_s27 = sld [smem:[#allocation8 + $0x1a]] }
  0xa3   :  { %v115_v33 = vpop.permute.xlu1 %114  ;;  %v111_v34 = vpop.permute.xlu0 %110  ;;  %s2198_s28 = sld [smem:[#allocation8 + $0x1c]] }
  0xa4   :  { %137 = vst.msk [vmem:[#allocation2 + $0x19] sm:$0xff] %vm134_vm4, %v115_v33  ;;  %135 = vst.msk [vmem:[#allocation2 + $0x1] sm:$0xff] %vm134_vm4, %v111_v34  ;;  %s2199_s4 = sld [smem:[#allocation8 + $0x1d]] }
  0xa5   :  { %146 = vst.msk [vmem:[#allocation2 + $0x19] sm:$0xff] %vm143_vm5, %v2391_v12  ;;  %144 = vst.msk [vmem:[#allocation2 + $0x1] sm:$0xff] %vm143_vm5, %v2391_v12  ;;  %s2201_s10 = sld [smem:[#allocation8 + $0x1f]] }
  0xa6   :  { %153 = vst.msk [vmem:[#allocation2 + $0x1] sm:$0xff] %vm152_vm2, %v2391_v12  ;;  %155 = vst.msk [vmem:[#allocation2 + $0x19] sm:$0xff] %vm152_vm2, %v2391_v12  ;;  %s2202_s0 = sld [smem:[#allocation8 + $0x20]] }
  0xa7   :  { %v117_v35 = vpop.permute.xlu1 %116  ;;  %v113_v36 = vpop.permute.xlu0 %112  ;;  %s2204_s15 = sld [smem:[#allocation8 + $0x22]] }
  0xa8   :  { %138 = vst.msk [vmem:[#allocation2 + $0x21] sm:$0xff] %vm134_vm4, %v117_v35  ;;  %136 = vst.msk [vmem:[#allocation2 + $0x9] sm:$0xff] %vm134_vm4, %v113_v36  ;;  %s2205_s29 = sld [smem:[#allocation8 + $0x23]] }
  0xa9   :  { %147 = vst.msk [vmem:[#allocation2 + $0x21] sm:$0xff] %vm143_vm5, %v2391_v12  ;;  %145 = vst.msk [vmem:[#allocation2 + $0x9] sm:$0xff] %vm143_vm5, %v2391_v12 }
  0xaa   :  { %154 = vst.msk [vmem:[#allocation2 + $0x9] sm:$0xff] %vm152_vm2, %v2391_v12  ;;  %156 = vst.msk [vmem:[#allocation2 + $0x21] sm:$0xff] %vm152_vm2, %v2391_v12 }
  0xab   :  { %v121_v37 = vpop.permute.xlu1 %120  ;;  %v119_v38 = vpop.permute.xlu0 %118 }
  0xac   :  { %140 = vst.msk [vmem:[#allocation2 + $0x39] sm:$0xff] %vm134_vm4, %v121_v37  ;;  %139 = vst.msk [vmem:[#allocation2 + $0x31] sm:$0xff] %vm134_vm4, %v119_v38 }
  0xad   :  { %149 = vst.msk [vmem:[#allocation2 + $0x39] sm:$0xff] %vm143_vm5, %v2391_v12  ;;  %148 = vst.msk [vmem:[#allocation2 + $0x31] sm:$0xff] %vm143_vm5, %v2391_v12 }
  0xae   :  { %157 = vst.msk [vmem:[#allocation2 + $0x31] sm:$0xff] %vm152_vm2, %v2391_v12  ;;  %158 = vst.msk [vmem:[#allocation2 + $0x39] sm:$0xff] %vm152_vm2, %v2391_v12 }
  0xaf   :  { %v125_v39 = vpop.permute.xlu1 %124  ;;  %v123_v40 = vpop.permute.xlu0 %122 }
  0xb0   :  { %142 = vst.msk [vmem:[#allocation2 + $0x51] sm:$0xff] %vm134_vm4, %v125_v39  ;;  %141 = vst.msk [vmem:[#allocation2 + $0x49] sm:$0xff] %vm134_vm4, %v123_v40 }
  0xb1   :  { %151 = vst.msk [vmem:[#allocation2 + $0x51] sm:$0xff] %vm143_vm5, %v2391_v12  ;;  %150 = vst.msk [vmem:[#allocation2 + $0x49] sm:$0xff] %vm143_vm5, %v2391_v12 }
  0xb2   :  { %159 = vst.msk [vmem:[#allocation2 + $0x49] sm:$0xff] %vm152_vm2, %v2391_v12  ;;  %160 = vst.msk [vmem:[#allocation2 + $0x51] sm:$0xff] %vm152_vm2, %v2391_v12  ;;  %v586_v12 = vstv %s3795_s1  ;;  %s2189_s1 = sld [smem:[#allocation8 + $0x17]] }
  0xb3   :  { %v189_v50 = vpop.permute.xlu1 %188  ;;  %v187_v54 = vpop.permute.xlu0 %186 }
  0xb4   :  { %212 = vst.msk [vmem:[#allocation2 + $0x9] sm:$0xff] %vm210_vm6, %v189_v50  ;;  %211 = vst.msk [vmem:[#allocation2 + $0x1] sm:$0xff] %vm210_vm6, %v187_v54 }
  0xb7   :  { %v193_v4 = vpop.permute.xlu1 %192  ;;  %v191_v5 = vpop.permute.xlu0 %190 }
  0xb8   :  { %214 = vst.msk [vmem:[#allocation2 + $0x21] sm:$0xff] %vm210_vm6, %v193_v4  ;;  %213 = vst.msk [vmem:[#allocation2 + $0x19] sm:$0xff] %vm210_vm6, %v191_v5 }
  0xbb   :  { %v229_v22 = vld [vmem:[#allocation2 + $0x9] sm:$0xff]  ;;  %v220_v24 = vld [vmem:[#allocation2] sm:$0xff]  ;;  %v197_v25 = vpop.permute.xlu1 %196  ;;  %v195_v26 = vpop.permute.xlu0 %194 }
  0xbc   :  { %v237_v23 = vld [vmem:[#allocation2 + $0xa] sm:$0xff]  ;;  %v232_v31 = vmul.f32 %v230_v41, %v229_v22  ;;  %v228_v33 = vld [vmem:[#allocation2 + $0x1] sm:$0xff]  ;;  %216 = vst.msk [vmem:[#allocation2 + $0x39] sm:$0xff] %vm210_vm6, %v197_v25  ;;  %215 = vst.msk [vmem:[#allocation2 + $0x31] sm:$0xff] %vm210_vm6, %v195_v26  ;;  %v334_v38 = vmul.f32 %v332_v43, %v229_v22  ;;  %v433_v40 = vmul.f32 %v431_v45, %v229_v22 }
  0xbd   :  { %v221_v32 = vld [vmem:[#allocation2 + $0x8] sm:$0xff]  ;;  %v240_v37 = vmul.f32 %v238_v42, %v237_v23  ;;  %v342_v39 = vmul.f32 %v340_v44, %v237_v23  ;;  %v441_v50 = vmul.f32 %v439_v46, %v237_v23  ;;  %v223_v54 = vmul.f32 %v222_v49, %v220_v24 }
  0xbe   :  { %v224_v4 = vmul.f32 %v222_v49, %v221_v32  ;;  %v231_v5 = vmul.f32 %v230_v41, %v228_v33  ;;  %v236_v25 = vld [vmem:[#allocation2 + $0x2] sm:$0xff]  ;;  %v532_v26 = vmul.f32 %v530_v47, %v229_v22  ;;  %v325_v29 = vmul.f32 %v324_v51, %v220_v24 }
  0xbf   :  { %v326_v28 = vmul.f32 %v324_v51, %v221_v32  ;;  %v333_v36 = vmul.f32 %v332_v43, %v228_v33  ;;  %v201_v35 = vpop.permute.xlu1 %200  ;;  %v199_v34 = vpop.permute.xlu0 %198  ;;  %v540_v30 = vmul.f32 %v538_v48, %v237_v23  ;;  %v424_v41 = vmul.f32 %v423_v52, %v220_v24  ;;  %v262_v20 = vld [vmem:[#allocation2 + $0x22] sm:$0xff] }
  0xc0   :  { %v233_v49 = vadd.f32 %v231_v5, %v223_v54  ;;  %v425_v27 = vmul.f32 %v423_v52, %v221_v32  ;;  %218 = vst.msk [vmem:[#allocation2 + $0x51] sm:$0xff] %vm210_vm6, %v201_v35  ;;  %217 = vst.msk [vmem:[#allocation2 + $0x49] sm:$0xff] %vm210_vm6, %v199_v34  ;;  %v239_v51 = vmul.f32 %v238_v42, %v236_v25  ;;  %v254_v35 = vld [vmem:[#allocation2 + $0x21] sm:$0xff] }
  0xc1   :  { %v335_v22 = vadd.f32 %v333_v36, %v325_v29  ;;  %v341_v43 = vmul.f32 %v340_v44, %v236_v25  ;;  %v432_v21 = vmul.f32 %v431_v45, %v228_v33  ;;  %v234_v23 = vadd.f32 %v232_v31, %v224_v4  ;;  %v245_v31 = vld [vmem:[#allocation2 + $0x18] sm:$0xff] }
  0xc2   :  { %v336_v54 = vadd.f32 %v334_v38, %v326_v28  ;;  %v523_v5 = vmul.f32 %v522_v53, %v220_v24  ;;  %v524_v52 = vmul.f32 %v522_v53, %v221_v32  ;;  %v241_v34 = vadd.f32 %v239_v51, %v233_v49  ;;  %v246_v32 = vld [vmem:[#allocation2 + $0x20] sm:$0xff] }
  0xc3   :  { %v434_v42 = vadd.f32 %v432_v21, %v424_v41  ;;  %v440_v29 = vmul.f32 %v439_v46, %v236_v25  ;;  %v531_v44 = vmul.f32 %v530_v47, %v228_v33  ;;  %v343_v45 = vadd.f32 %v341_v43, %v335_v22  ;;  %v261_v51 = vld [vmem:[#allocation2 + $0x1a] sm:$0xff] }
  0xc4   :  { %v435_v28 = vadd.f32 %v433_v40, %v425_v27  ;;  %v534_v24 = vadd.f32 %v532_v26, %v524_v52  ;;  %v539_v53 = vmul.f32 %v538_v48, %v236_v25  ;;  %v257_v21 = vmul.f32 %v255_v55, %v254_v35  ;;  %v253_v40 = vld [vmem:[#allocation2 + $0x19] sm:$0xff] }
  0xc5   :  { %v442_v36 = vadd.f32 %v440_v29, %v434_v42  ;;  %v265_v46 = vmul.f32 %v263_v56, %v262_v20  ;;  %v358_v47 = vmul.f32 %v356_v57, %v254_v35  ;;  %v533_v33 = vadd.f32 %v531_v44, %v523_v5 }
  0xc6   :  { %v2903_v27 = vmul.f32 %v364_v58, %v262_v20  ;;  %v457_v48 = vmul.f32 %v455_v59, %v254_v35  ;;  %v242_v38 = vadd.f32 %v240_v37, %v234_v23  ;;  %v2909_v4 = vmul.f32 %v463_v60, %v262_v20 }
  0xc7   :  { %v556_v25 = vmul.f32 %v554_v61, %v254_v35  ;;  %v248_v26 = vmul.f32 %v247_v63, %v245_v31  ;;  %v249_v49 = vmul.f32 %v247_v63, %v246_v32  ;;  %v2919_v41 = vmul.f32 %v562_v62, %v262_v20 }
  0xc8   :  { %v344_v22 = vadd.f32 %v342_v39, %v336_v54  ;;  %v349_v37 = vmul.f32 %v348_v0, %v245_v31  ;;  %v350_v43 = vmul.f32 %v348_v0, %v246_v32  ;;  %v256_v52 = vmul.f32 %v255_v55, %v253_v40 }
  0xc9   :  { %v250_v23 = vadd.f32 %v248_v26, %v241_v34  ;;  %v251_v5 = vadd.f32 %v249_v49, %v242_v38  ;;  %v357_v35 = vmul.f32 %v356_v57, %v253_v40  ;;  %v443_v20 = vadd.f32 %v441_v50, %v435_v28 }
  0xca   :  { %v351_v63 = vadd.f32 %v349_v37, %v343_v45  ;;  %v352_v42 = vadd.f32 %v350_v43, %v344_v22  ;;  %v448_v29 = vmul.f32 %v447_v1, %v245_v31  ;;  %v541_v39 = vadd.f32 %v539_v53, %v533_v33  ;;  %v279_v33 = vld [vmem:[#allocation2 + $0x39] sm:$0xff] }
  0xcb   :  { %v258_v54 = vadd.f32 %v256_v52, %v250_v23  ;;  %v264_v44 = vmul.f32 %v263_v56, %v261_v51  ;;  %v449_v0 = vmul.f32 %v447_v1, %v246_v32  ;;  %v365_v38 = vmul.f32 %v364_v58, %v261_v51  ;;  %v287_v1 = vld [vmem:[#allocation2 + $0x3a] sm:$0xff]  ;;  %v278_v23 = vld [vmem:[#allocation2 + $0x31] sm:$0xff] }
  0xcc   :  { %v359_v34 = vadd.f32 %v357_v35, %v351_v63  ;;  %v450_v55 = vadd.f32 %v448_v29, %v442_v36  ;;  %v456_v57 = vmul.f32 %v455_v59, %v253_v40  ;;  %v259_v45 = vadd.f32 %v257_v21, %v251_v5 }
  0xcd   :  { %v451_v50 = vadd.f32 %v449_v0, %v443_v20  ;;  %v542_v28 = vadd.f32 %v540_v30, %v534_v24  ;;  %v547_v53 = vmul.f32 %v546_v2, %v245_v31  ;;  %v360_v26 = vadd.f32 %v358_v47, %v352_v42  ;;  %v286_v20 = vld [vmem:[#allocation2 + $0x32] sm:$0xff] }
  0xce   :  { %v458_v49 = vadd.f32 %v456_v57, %v450_v55  ;;  %v464_v56 = vmul.f32 %v463_v60, %v261_v51  ;;  %v548_v58 = vmul.f32 %v546_v2, %v246_v32  ;;  %v266_v59 = vadd.f32 %v264_v44, %v258_v54  ;;  %v270_v2 = vld [vmem:[#allocation2 + $0x30] sm:$0xff]  ;;  %v271_v32 = vld [vmem:[#allocation2 + $0x38] sm:$0xff] }
  0xcf   :  { %v367_v36 = vadd.f32 %v365_v38, %v359_v34  ;;  %v549_v21 = vadd.f32 %v547_v53, %v541_v39  ;;  %v555_v30 = vmul.f32 %v554_v61, %v253_v40  ;;  %v459_v24 = vadd.f32 %v457_v48, %v451_v50 }
  0xd0   :  { %v550_v31 = vadd.f32 %v548_v58, %v542_v28  ;;  %v563_v47 = vmul.f32 %v562_v62, %v261_v51  ;;  %v282_v60 = vmul.f32 %v280_v3, %v279_v33  ;;  %v466_v22 = vadd.f32 %v464_v56, %v458_v49  ;;  %v2998_v49 = vld [vmem:[#allocation2 + $0x51] sm:$0xff] }
  0xd1   :  { %v557_v37 = vadd.f32 %v555_v30, %v549_v21  ;;  %v290_v43 = vmul.f32 %v288_v6, %v287_v1  ;;  %v382_v61 = vmul.f32 %v380_v7, %v279_v33  ;;  %v2957_v48 = vmul.f32 %v388_v8, %v287_v1  ;;  %v3004_v58 = vld [vmem:[#allocation2 + $0x52] sm:$0xff] }
  0xd2   :  { %v481_v62 = vmul.f32 %v479_v9, %v279_v33  ;;  %v2963_v40 = vmul.f32 %v487_v10, %v287_v1  ;;  %v267_v51 = vadd.f32 %v265_v46, %v259_v45  ;;  %v558_v5 = vadd.f32 %v556_v25, %v550_v31 }
  0xd3   :  { %v580_v52 = vmul.f32 %v578_v11, %v279_v33  ;;  %v273_v35 = vmul.f32 %v272_v13, %v270_v2  ;;  %v274_v63 = vmul.f32 %v272_v13, %v271_v32  ;;  %v2973_v42 = vmul.f32 %v586_v12, %v287_v1 }
  0xd4   :  { %v368_v29 = vadd.f32 %v2903_v27, %v360_v26  ;;  %v373_v46 = vmul.f32 %v372_v14, %v270_v2  ;;  %v374_v25 = vmul.f32 %v372_v14, %v271_v32  ;;  %v281_v44 = vmul.f32 %v280_v3, %v278_v23 }
  0xd5   :  { %v275_v39 = vadd.f32 %v273_v35, %v266_v59  ;;  %v276_v54 = vadd.f32 %v274_v63, %v267_v51  ;;  %v381_v13 = vmul.f32 %v380_v7, %v278_v23  ;;  %v467_v38 = vadd.f32 %v2909_v4, %v459_v24  ;;  %v296_v24 = vld [vmem:[#allocation2 + $0x50] sm:$0xff] }
  0xd6   :  { %v375_v0 = vadd.f32 %v373_v46, %v367_v36  ;;  %v376_v34 = vadd.f32 %v374_v25, %v368_v29  ;;  %v472_v55 = vmul.f32 %v471_v15, %v270_v2  ;;  %v565_v27 = vadd.f32 %v563_v47, %v557_v37 }
  0xd7   :  { %v283_v57 = vadd.f32 %v281_v44, %v275_v39  ;;  %v289_v14 = vmul.f32 %v288_v6, %v286_v20  ;;  %v473_v45 = vmul.f32 %v471_v15, %v271_v32  ;;  %v389_v3 = vmul.f32 %v388_v8, %v286_v20 }
  0xd8   :  { %v383_v50 = vadd.f32 %v381_v13, %v375_v0  ;;  %v474_v7 = vadd.f32 %v472_v55, %v466_v22  ;;  %v480_v28 = vmul.f32 %v479_v9, %v278_v23  ;;  %v284_v53 = vadd.f32 %v282_v60, %v276_v54 }
  0xd9   :  { %v475_v4 = vadd.f32 %v473_v45, %v467_v38  ;;  %v566_v33 = vadd.f32 %v2919_v41, %v558_v5  ;;  %v571_v26 = vmul.f32 %v570_v16, %v270_v2  ;;  %v384_v6 = vadd.f32 %v382_v61, %v376_v34 }
  0xda   :  { %v482_v56 = vadd.f32 %v480_v28, %v474_v7  ;;  %v488_v15 = vmul.f32 %v487_v10, %v286_v20  ;;  %v572_v8 = vmul.f32 %v570_v16, %v271_v32  ;;  %v291_v9 = vadd.f32 %v289_v14, %v283_v57  ;;  %v295_v16 = vld [vmem:[#allocation2 + $0x48] sm:$0xff] }
  0xdb   :  { %v391_v1 = vadd.f32 %v389_v3, %v383_v50  ;;  %v573_v59 = vadd.f32 %v571_v26, %v565_v27  ;;  %v579_v41 = vmul.f32 %v578_v11, %v278_v23  ;;  %v483_v36 = vadd.f32 %v481_v62, %v475_v4  ;;  %v311_v23 = vld [vmem:[#allocation2 + $0x4a] sm:$0xff] }
  0xdc   :  { %v574_v21 = vadd.f32 %v572_v8, %v566_v33  ;;  %v587_v30 = vmul.f32 %v586_v12, %v286_v20  ;;  %v307_v10 = vmul.f32 %v305_v17, %v2998_v49  ;;  %v490_v31 = vadd.f32 %v488_v15, %v482_v56  ;;  %v303_v12 = vld [vmem:[#allocation2 + $0x49] sm:$0xff] }
  0xdd   :  { %v581_v47 = vadd.f32 %v579_v41, %v573_v59  ;;  %v315_v11 = vmul.f32 %v313_v18, %v3004_v58  ;;  %v406_v60 = vmul.f32 %v404_v19, %v2998_v49  ;;  %v3828_v2 = vstv %s3826_s6  ;;  %s2211_s6 = sld [smem:[#allocation8 + $0x25]] }
  0xde   :  { %v414_v32 = vmul.f32 %v3828_v2, %v3004_v58  ;;  %v3829_v22 = vstv %s3827_s9  ;;  %v3830_v61 = vstv %s2767_s3  ;;  %v292_v51 = vadd.f32 %v290_v43, %v284_v53  ;;  %s2167_s3 = sld [smem:[#allocation8 + $0x2]] }
  0xdf   :  { %v505_v37 = vmul.f32 %v3829_v22, %v2998_v49  ;;  %v513_v62 = vmul.f32 %v3830_v61, %v3004_v58  ;;  %v582_v5 = vadd.f32 %v580_v52, %v574_v21  ;;  %v589_v35 = vadd.f32 %v587_v30, %v581_v47  ;;  %s2212_s9 = sld [smem:[#allocation8 + $0x26]] }
  0xe0   :  { %v3831_v63 = vstv %s2784_s22  ;;  %v306_v25 = vmul.f32 %v305_v17, %v303_v12  ;;  %v392_v39 = vadd.f32 %v2957_v48, %v384_v6  ;;  %v3833_v54 = vstv %s2794_s26  ;;  %s3839_s26 = sld [smem:[#allocation43_spill]] }
  0xe1   :  { %v298_v20 = vmul.f32 %v3831_v63, %v295_v16  ;;  %v3832_v29 = vmov %v3831_v63  ;;  %v397_v44 = vmul.f32 %v3833_v54, %v295_v16  ;;  %v3834_v13 = vmov %v3833_v54  ;;  %s2180_s22 = sld [smem:[#allocation8 + $0xe]] }
  0xe2   :  { %v299_v46 = vmul.f32 %v3832_v29, %v296_v24  ;;  %v398_v0 = vmul.f32 %v3834_v13, %v296_v24  ;;  %v314_v52 = vmul.f32 %v313_v18, %v311_v23  ;;  %v405_v38 = vmul.f32 %v404_v19, %v303_v12 }
  0xe3   :  { %v300_v43 = vadd.f32 %v298_v20, %v291_v9  ;;  %v399_v55 = vadd.f32 %v397_v44, %v391_v1  ;;  %v491_v57 = vadd.f32 %v2963_v40, %v483_v36  ;;  %v3836_v14 = vstv %s2800_s30  ;;  %s2169_s30 = sld [smem:[#allocation8 + $0x4]] }
  0xe4   :  { %v301_v34 = vadd.f32 %v299_v46, %v292_v51  ;;  %v400_v27 = vadd.f32 %v398_v0, %v392_v39  ;;  %v496_v17 = vmul.f32 %v3836_v14, %v295_v16  ;;  %v3837_v50 = vmov %v3828_v2 }
  0xe5   :  { %v308_v48 = vadd.f32 %v306_v25, %v300_v43  ;;  %v413_v3 = vmul.f32 %v3837_v50, %v311_v23  ;;  %v3838_v7 = vmov %v3836_v14  ;;  %v407_v53 = vadd.f32 %v405_v38, %v399_v55 }
  0xe6   :  { %v309_v45 = vadd.f32 %v307_v10, %v301_v34  ;;  %v497_v28 = vmul.f32 %v3838_v7, %v296_v24  ;;  %v408_v18 = vadd.f32 %v406_v60, %v400_v27  ;;  %v498_v4 = vadd.f32 %v496_v17, %v490_v31 }
  0xe7   :  { %v3840_v19 = vmov %v3829_v22  ;;  %v316_v40 = vadd.f32 %v314_v52, %v308_v48  ;;  %v590_v6 = vadd.f32 %v2973_v42, %v582_v5  ;;  %v3841_v56 = vstv %s3835_s8  ;;  %s2214_s8 = sld [smem:[#allocation8 + $0x28]] }
  0xe8   :  { %v504_v33 = vmul.f32 %v3840_v19, %v303_v12  ;;  %v499_v26 = vadd.f32 %v497_v28, %v491_v57  ;;  %v595_v15 = vmul.f32 %v3841_v56, %v295_v16  ;;  %v415_v8 = vadd.f32 %v413_v3, %v407_v53 }
  0xe9   :  { %v3843_v1 = vmov %v3830_v61  ;;  %v3844_v41 = vmov %v3841_v56  ;;  %v3845_v10 = vstv %s3839_s26  ;;  %v317_v47 = vadd.f32 %v315_v11, %v309_v45  ;;  %319 = vst.msk [vmem:[#allocation3] sm:$0xff] %vm318_vm7, %v316_v40  ;;  %s2215_s26 = sld [smem:[#allocation8 + $0x29]] }
  0xea   :  { %v506_v9 = vadd.f32 %v504_v33, %v498_v4  ;;  %v512_v59 = vmul.f32 %v3843_v1, %v311_v23  ;;  %v596_v36 = vmul.f32 %v3844_v41, %v296_v24  ;;  %v507_v21 = vadd.f32 %v505_v37, %v499_v26  ;;  %418 = vst.msk [vmem:[#allocation3 + $0x10] sm:$0xff] %vm318_vm7, %v415_v8 }
  0xeb   :  { %v597_v30 = vadd.f32 %v595_v15, %v589_v35  ;;  %v603_v31 = vmul.f32 %v3845_v10, %v303_v12  ;;  %v3846_v60 = vmov %v3845_v10  ;;  %v416_v22 = vadd.f32 %v414_v32, %v408_v18  ;;  %320 = vst.msk [vmem:[#allocation3 + $0x8] sm:$0xff] %vm318_vm7, %v317_v47 }
  0xec   :  { %v604_v42 = vmul.f32 %v3846_v60, %v2998_v49  ;;  %v514_v16 = vadd.f32 %v512_v59, %v506_v9  ;;  %v598_v2 = vadd.f32 %v596_v36, %v590_v6  ;;  %v3847_v24 = vstv %s3842_s12  ;;  %s2218_s12 = sld [smem:[#allocation8 + $0x2c]] }
  0xed   :  { %v605_v61 = vadd.f32 %v603_v31, %v597_v30  ;;  %v611_v51 = vmul.f32 %v3847_v24, %v311_v23  ;;  %v515_v37 = vadd.f32 %v513_v62, %v507_v21  ;;  %v3848_v11 = vmov %v3847_v24  ;;  %419 = vst.msk [vmem:[#allocation3 + $0x18] sm:$0xff] %vm318_vm7, %v416_v22 }
  0xee   :  { %v612_v12 = vmul.f32 %v3848_v11, %v3004_v58  ;;  %v606_v5 = vadd.f32 %v604_v42, %v598_v2  ;;  %517 = vst.msk [vmem:[#allocation3 + $0x20] sm:$0xff] %vm318_vm7, %v514_v16  ;;  %v660_v35 = vstv %s3052_s11  ;;  %v674_v63 = vstv %s2167_s3  ;;  %s2217_s11 = sld [smem:[#allocation8 + $0x2b]] }
  0xef   :  { %v613_v49 = vadd.f32 %v611_v51, %v605_v61  ;;  %518 = vst.msk [vmem:[#allocation3 + $0x28] sm:$0xff] %vm318_vm7, %v515_v37  ;;  %v696_v46 = vstv %s2169_s30  ;;  %v710_v13 = vstv %s2170_s13  ;;  %v732_v34 = vstv %s2172_s16  ;;  %s651_s3 = sld [smem:[#allocation8]] }
  0xf0   :  { %v614_v32 = vadd.f32 %v612_v12, %v606_v5  ;;  %v3079_v23 = vld [vmem:[#allocation3] sm:$0xff]  ;;  %v746_v57 = vstv %s2173_s18  ;;  %v768_v48 = vstv %s2175_s19  ;;  %v782_v28 = vstv %s2176_s20  ;;  %s3205_s30 = sld [smem:[#allocation8 + $0x2e]] }
  0xf1   :  { %616 = vst.msk [vmem:[#allocation3 + $0x30] sm:$0xff] %vm318_vm7, %v613_v49  ;;  %v661_v62 = vmul.f32 %v660_v35, %v3079_v23  ;;  %v675_v29 = vmul.f32 %v674_v63, %v3079_v23  ;;  %v3089_v25 = vld [vmem:[#allocation3 + $0x10] sm:$0xff]  ;;  %v846_v4 = vstv %s2179_s21  ;;  %v860_v40 = vstv %s2180_s22  ;;  %s3209_s13 = sld [smem:[#allocation8 + $0x3]] }
  0xf2   :  { %617 = vst.msk [vmem:[#allocation3 + $0x38] sm:$0xff] %vm318_vm7, %v614_v32  ;;  %v3083_v58 = vld [vmem:[#allocation3 + $0x8] sm:$0xff]  ;;  %v697_v44 = vmul.f32 %v696_v46, %v3089_v25  ;;  %v711_v43 = vmul.f32 %v710_v13, %v3089_v25  ;;  %v847_v33 = vmul.f32 %v846_v4, %v3079_v23  ;;  %v861_v6 = vmul.f32 %v860_v40, %v3079_v23  ;;  %s3213_s16 = sld [smem:[#allocation8 + $0x2f]] }
  0xf3   :  { %v662_v20 = vmul.f32 %v660_v35, %v3083_v58  ;;  %665 = vrot.lane.b32.xlu0 %v661_v62, %s2393_s14  ;;  %v676_v39 = vmul.f32 %v674_v63, %v3083_v58  ;;  %v848_v26 = vmul.f32 %v846_v4, %v3083_v58  ;;  %v882_v56 = vstv %s2182_s23  ;;  %s3224_s18 = sld [smem:[#allocation8 + $0x6]] }
  0xf4   :  { %v3093_v54 = vld [vmem:[#allocation3 + $0x18] sm:$0xff]  ;;  %v862_v15 = vmul.f32 %v860_v40, %v3083_v58  ;;  %v883_v8 = vmul.f32 %v882_v56, %v3089_v25  ;;  %v896_v9 = vstv %s2183_s24  ;;  %v918_v41 = vstv %s2185_s5  ;;  %s2174_s19 = sld [smem:[#allocation8 + $0x9]] }
  0xf5   :  { %667 = vrot.lane.b32.xlu1 %v662_v20, %s2393_s14  ;;  %v698_v0 = vmul.f32 %v696_v46, %v3093_v54  ;;  %v3101_v52 = vld [vmem:[#allocation3 + $0x20] sm:$0xff]  ;;  %v712_v38 = vmul.f32 %v710_v13, %v3093_v54  ;;  %v884_v1 = vmul.f32 %v882_v56, %v3093_v54  ;;  %v897_v59 = vmul.f32 %v896_v9, %v3089_v25  ;;  %s2178_s20 = sld [smem:[#allocation8 + $0xc]] }
  0xf6   :  { %v3105_v55 = vld [vmem:[#allocation3 + $0x28] sm:$0xff]  ;;  %v733_v27 = vmul.f32 %v732_v34, %v3101_v52  ;;  %v747_v17 = vmul.f32 %v746_v57, %v3101_v52  ;;  %v898_v36 = vmul.f32 %v896_v9, %v3093_v54  ;;  %v919_v21 = vmul.f32 %v918_v41, %v3101_v52  ;;  %s3244_s21 = sld [smem:[#allocation8 + $0xf]] }
  0xf7   :  { %679 = vrot.lane.b32.xlu0 %v675_v29, %s2394_s17  ;;  %v734_v14 = vmul.f32 %v732_v34, %v3105_v55  ;;  %v748_v50 = vmul.f32 %v746_v57, %v3105_v55  ;;  %v932_v30 = vstv %s2186_s2  ;;  %v920_v10 = vmul.f32 %v918_v41, %v3105_v55  ;;  %s3849_s24 = sld [smem:[#allocation45_spill]] }
  0xf8   :  { %v3113_v45 = vld [vmem:[#allocation3 + $0x30] sm:$0xff]  ;;  %v933_v31 = vmul.f32 %v932_v30, %v3101_v52  ;;  %v954_v47 = vstv %s2188_s7  ;;  %v934_v60 = vmul.f32 %v932_v30, %v3105_v55  ;;  %v968_v16 = vstv %s2189_s1  ;;  %s3850_s7 = sld [smem:[#allocation46_spill]] }
  0xf9   :  { %681 = vrot.lane.b32.xlu1 %v676_v39, %s2394_s17  ;;  %v3117_v3 = vld [vmem:[#allocation3 + $0x38] sm:$0xff]  ;;  %v769_v7 = vmul.f32 %v768_v48, %v3113_v45  ;;  %v783_v18 = vmul.f32 %v782_v28, %v3113_v45  ;;  %v955_v42 = vmul.f32 %v954_v47, %v3113_v45  ;;  %v969_v22 = vmul.f32 %v968_v16, %v3113_v45  ;;  %s2227_s23 = sld [smem:[#allocation8 + $0x31]] }
  0xfa   :  { %v770_v53 = vmul.f32 %v768_v48, %v3117_v3  ;;  %v784_v19 = vmul.f32 %v782_v28, %v3117_v3  ;;  %v956_v2 = vmul.f32 %v954_v47, %v3117_v3  ;;  %v1027_v61 = vstv %s2195_s25  ;;  %s2228_s5 = sld [smem:[#allocation8 + $0x32]] }
  0xfb   :  { %701 = vrot.lane.b32.xlu0 %v697_v44, %s2393_s14  ;;  %v970_v24 = vmul.f32 %v968_v16, %v3117_v3  ;;  %v1028_v51 = vmul.f32 %v1027_v61, %v3079_v23  ;;  %v1041_v37 = vstv %s2196_s27  ;;  %v1029_v11 = vmul.f32 %v1027_v61, %v3083_v58  ;;  %s2184_s27 = sld [smem:[#allocation8 + $0x12]] }
  0xfc   :  { %v1042_v12 = vmul.f32 %v1041_v37, %v3079_v23  ;;  %v1063_v5 = vstv %s2198_s28  ;;  %v1043_v49 = vmul.f32 %v1041_v37, %v3083_v58  ;;  %v1077_v32 = vstv %s2199_s4  ;;  %s2187_s28 = sld [smem:[#allocation8 + $0x15]] }
  0xfd   :  { %703 = vrot.lane.b32.xlu1 %v698_v0, %s2393_s14  ;;  %v1064_v35 = vmul.f32 %v1063_v5, %v3089_v25  ;;  %v1065_v62 = vmul.f32 %v1063_v5, %v3093_v54  ;;  %v1078_v63 = vmul.f32 %v1077_v32, %v3089_v25  ;;  %v1099_v20 = vstv %s2201_s10  ;;  %s2194_s4 = sld [smem:[#allocation8 + $0x18]] }
  0xfe   :  { %v1079_v29 = vmul.f32 %v1077_v32, %v3093_v54  ;;  %v1100_v46 = vmul.f32 %v1099_v20, %v3101_v52  ;;  %v1113_v39 = vstv %s2202_s0  ;;  %v1101_v44 = vmul.f32 %v1099_v20, %v3105_v55  ;;  %s3274_s10 = sld [smem:[#allocation8 + $0x1b]] }
  0xff   :  { %715 = vrot.lane.b32.xlu0 %v711_v43, %s2394_s17  ;;  %v1114_v13 = vmul.f32 %v1113_v39, %v3101_v52  ;;  %v1135_v0 = vstv %s2204_s15  ;;  %v1115_v43 = vmul.f32 %v1113_v39, %v3105_v55  ;;  %v654_v9 = vstv %s651_s3  ;;  %s2243_s2 = sld [smem:[#allocation8 + $0x3d]] }
 0x100   :  { %v1136_v34 = vmul.f32 %v1135_v0, %v3113_v45  ;;  %v655_v41 = vmul.f32 %v654_v9, %v3079_v23  ;;  %v1330_v61 = vstv %s3213_s16  ;;  %s2216_s16 = sld [smem:[#allocation8 + $0x2a]] }
 0x101   :  { %717 = vrot.lane.b32.xlu1 %v712_v38, %s2394_s17  ;;  %v1149_v38 = vstv %s2205_s29  ;;  %s2259_s1 = sld [smem:[#allocation8 + $0x49]] }
 0x102   :  { %v1150_v57 = vmul.f32 %v1149_v38, %v3113_v45  ;;  %s2275_s25 = sld [smem:[#allocation8 + $0x55]] }
 0x103   :  { %737 = vrot.lane.b32.xlu0 %v733_v27, %s2393_s14  ;;  %v1137_v27 = vmul.f32 %v1135_v0, %v3117_v3  ;;  %s3367_s0 = sld [smem:[#allocation8 + $0x40]] }
 0x104   :  { %s3375_s15 = sld [smem:[#allocation8 + $0x4c]] }
 0x105   :  { %739 = vrot.lane.b32.xlu1 %v734_v14, %s2393_s14  ;;  %v1208_v14 = vstv %s2211_s6  ;;  %s3384_s29 = sld [smem:[#allocation8 + $0x58]] }
 0x106   :  { %v1209_v48 = vmul.f32 %v1208_v14, %v3079_v23  ;;  %s2231_s6 = sld [smem:[#allocation8 + $0x35]] }
 0x107   :  { %751 = vrot.lane.b32.xlu0 %v747_v17, %s2394_s17  ;;  %v1151_v17 = vmul.f32 %v1149_v38, %v3117_v3  ;;  %s3423_s3 = sld [smem:[#allocation8 + $0x4f]] }
 0x108   :  { %s3462_s22 = sld [smem:[#allocation8 + $0x46]] }
 0x109   :  { %753 = vrot.lane.b32.xlu1 %v748_v50, %s2394_s17  ;;  %v1222_v50 = vstv %s2212_s9  ;;  %s2200_s9 = sld [smem:[#allocation8 + $0x1e]] }
 0x10a   :  { %v1223_v28 = vmul.f32 %v1222_v50, %v3079_v23 }
 0x10b   :  { %773 = vrot.lane.b32.xlu0 %v769_v7, %s2393_s14  ;;  %v1210_v7 = vmul.f32 %v1208_v14, %v3083_v58  ;;  %v762_v14 = vstv %s2174_s19  ;;  %s3449_s19 = sld [smem:[#allocation8 + $0x5c]] }
 0x10d   :  { %775 = vrot.lane.b32.xlu1 %v770_v53, %s2393_s14  ;;  %v1244_v53 = vstv %s2214_s8  ;;  %s2203_s8 = sld [smem:[#allocation8 + $0x21]] }
 0x10e   :  { %v1245_v4 = vmul.f32 %v1244_v53, %v3089_v25 }
 0x10f   :  { %787 = vrot.lane.b32.xlu0 %v783_v18, %s2394_s17  ;;  %v1224_v18 = vmul.f32 %v1222_v50, %v3083_v58 }
 0x111   :  { %789 = vrot.lane.b32.xlu1 %v784_v19, %s2394_s17  ;;  %v1258_v19 = vstv %s2215_s26  ;;  %s2210_s26 = sld [smem:[#allocation8 + $0x24]] }
 0x112   :  { %v1259_v40 = vmul.f32 %v1258_v19, %v3089_v25 }
 0x113   :  { %851 = vrot.lane.b32.xlu0 %v847_v33, %s2393_s14  ;;  %v1246_v33 = vmul.f32 %v1244_v53, %v3093_v54 }
 0x115   :  { %853 = vrot.lane.b32.xlu1 %v848_v26, %s2393_s14  ;;  %v1280_v26 = vstv %s2217_s11  ;;  %s3299_s11 = sld [smem:[#allocation8 + $0x27]] }
 0x116   :  { %v1281_v56 = vmul.f32 %v1280_v26, %v3101_v52 }
 0x117   :  { %865 = vrot.lane.b32.xlu0 %v861_v6, %s2394_s17  ;;  %v1260_v6 = vmul.f32 %v1258_v19, %v3093_v54 }
 0x119   :  { %867 = vrot.lane.b32.xlu1 %v862_v15, %s2394_s17  ;;  %v1294_v15 = vstv %s2218_s12  ;;  %s3414_s12 = sld [smem:[#allocation8 + $0x43]] }
 0x11a   :  { %v1296_v30 = vmul.f32 %v1294_v15, %v3105_v55 }
 0x11b   :  { %887 = vrot.lane.b32.xlu0 %v883_v8, %s2393_s14  ;;  %v1282_v8 = vmul.f32 %v1280_v26, %v3105_v55 }
 0x11d   :  { %889 = vrot.lane.b32.xlu1 %v884_v1, %s2393_s14 }
 0x11f   :  { %901 = vrot.lane.b32.xlu0 %v897_v59, %s2394_s17  ;;  %v1295_v59 = vmul.f32 %v1294_v15, %v3101_v52  ;;  %v3249_v15 = vld [vmem:[%s3849_s24] ss:$0 sm:$0xff] }
 0x121   :  { %903 = vrot.lane.b32.xlu1 %v898_v36, %s2394_s17  ;;  %v1316_v36 = vstv %s3205_s30  ;;  %s2281_s30 = sld [smem:[#allocation8 + $0x5b]] }
 0x123   :  { %923 = vrot.lane.b32.xlu0 %v919_v21, %s2393_s14 }
 0x125   :  { %925 = vrot.lane.b32.xlu1 %v920_v10, %s2393_s14  ;;  %v690_v10 = vstv %s3209_s13  ;;  %s2234_s13 = sld [smem:[#allocation8 + $0x38]] }
 0x127   :  { %937 = vrot.lane.b32.xlu0 %v933_v31, %s2394_s17  ;;  %v656_v31 = vmul.f32 %v654_v9, %v3083_v58 }
 0x129   :  { %939 = vrot.lane.b32.xlu1 %v934_v60, %s2394_s17 }
 0x12b   :  { %959 = vrot.lane.b32.xlu0 %v955_v42, %s2393_s14  ;;  %v1317_v42 = vmul.f32 %v1316_v36, %v3113_v45 }
 0x12d   :  { %961 = vrot.lane.b32.xlu1 %v956_v2, %s2393_s14 }
 0x12f   :  { %973 = vrot.lane.b32.xlu0 %v969_v22, %s2394_s17  ;;  %v691_v22 = vmul.f32 %v690_v10, %v3089_v25 }
 0x131   :  { %975 = vrot.lane.b32.xlu1 %v970_v24, %s2394_s17 }
 0x133   :  { %1032 = vrot.lane.b32.xlu0 %v1028_v51, %s2393_s14  ;;  %v1318_v51 = vmul.f32 %v1316_v36, %v3117_v3 }
 0x135   :  { %1034 = vrot.lane.b32.xlu1 %v1029_v11, %s2393_s14  ;;  %v692_v11 = vmul.f32 %v690_v10, %v3093_v54 }
 0x137   :  { %1046 = vrot.lane.b32.xlu0 %v1042_v12, %s2394_s17 }
 0x139   :  { %1048 = vrot.lane.b32.xlu1 %v1043_v49, %s2394_s17  ;;  %v1331_v49 = vmul.f32 %v1330_v61, %v3113_v45 }
 0x13b   :  { %1068 = vrot.lane.b32.xlu0 %v1064_v35, %s2393_s14 }
 0x13d   :  { %1070 = vrot.lane.b32.xlu1 %v1065_v62, %s2393_s14  ;;  %v1332_v62 = vmul.f32 %v1330_v61, %v3117_v3 }
 0x13f   :  { %1082 = vrot.lane.b32.xlu0 %v1078_v63, %s2394_s17  ;;  %v726_v63 = vstv %s3224_s18  ;;  %s2219_s18 = sld [smem:[#allocation8 + $0x2d]] }
 0x141   :  { %1084 = vrot.lane.b32.xlu1 %v1079_v29, %s2394_s17 }
 0x143   :  { %1104 = vrot.lane.b32.xlu0 %v1100_v46, %s2393_s14 }
 0x145   :  { %1106 = vrot.lane.b32.xlu1 %v1101_v44, %s2393_s14  ;;  %v727_v44 = vmul.f32 %v726_v63, %v3101_v52 }
 0x147   :  { %1118 = vrot.lane.b32.xlu0 %v1114_v13, %s2394_s17 }
 0x149   :  { %1120 = vrot.lane.b32.xlu1 %v1115_v43, %s2394_s17  ;;  %v728_v43 = vmul.f32 %v726_v63, %v3105_v55 }
 0x14b   :  { %1140 = vrot.lane.b32.xlu0 %v1136_v34, %s2393_s14 }
 0x14d   :  { %1142 = vrot.lane.b32.xlu1 %v1137_v27, %s2393_s14 }
 0x14f   :  { %1154 = vrot.lane.b32.xlu0 %v1150_v57, %s2394_s17 }
 0x151   :  { %1156 = vrot.lane.b32.xlu1 %v1151_v17, %s2394_s17 }
 0x153   :  { %1213 = vrot.lane.b32.xlu0 %v1209_v48, %s2393_s14 }
 0x155   :  { %1215 = vrot.lane.b32.xlu1 %v1210_v7, %s2393_s14 }
 0x157   :  { %1227 = vrot.lane.b32.xlu0 %v1223_v28, %s2394_s17  ;;  %v763_v28 = vmul.f32 %v762_v14, %v3113_v45 }
 0x159   :  { %1229 = vrot.lane.b32.xlu1 %v1224_v18, %s2394_s17 }
 0x15b   :  { %1249 = vrot.lane.b32.xlu0 %v1245_v4, %s2393_s14  ;;  %v764_v4 = vmul.f32 %v762_v14, %v3117_v3 }
 0x15d   :  { %1251 = vrot.lane.b32.xlu1 %v1246_v33, %s2393_s14 }
 0x15f   :  { %1263 = vrot.lane.b32.xlu0 %v1259_v40, %s2394_s17 }
 0x161   :  { %1265 = vrot.lane.b32.xlu1 %v1260_v6, %s2394_s17 }
 0x163   :  { %1285 = vrot.lane.b32.xlu0 %v1281_v56, %s2393_s14 }
 0x165   :  { %1287 = vrot.lane.b32.xlu1 %v1282_v8, %s2393_s14  ;;  %v666_v1 = vpop.permute.xlu0 %665 }
 0x166   :  { %v671_v47 = vadd.f32 %v666_v1, %v655_v41 }
 0x167   :  { %v668_v21 = vpop.permute.xlu1 %667  ;;  %1299 = vrot.lane.b32.xlu0 %v1295_v59, %s2394_s17  ;;  %v840_v59 = vstv %s2178_s20  ;;  %s3455_s20 = sld [smem:[#allocation8 + $0x3a]] }
 0x168   :  { %v672_v16 = vadd.f32 %v668_v21, %v656_v31 }
 0x169   :  { %1301 = vrot.lane.b32.xlu1 %v1296_v30, %s2394_s17  ;;  %v680_v60 = vpop.permute.xlu0 %679  ;;  %v841_v30 = vmul.f32 %v840_v59, %v3079_v23 }
 0x16a   :  { %v685_v2 = vadd.f32 %v680_v60, %v671_v47  ;;  %v842_v60 = vmul.f32 %v840_v59, %v3083_v58 }
 0x16b   :  { %v682_v24 = vpop.permute.xlu1 %681  ;;  %1321 = vrot.lane.b32.xlu0 %v1317_v42, %s2393_s14 }
 0x16c   :  { %v686_v37 = vadd.f32 %v682_v24, %v672_v16  ;;  %v693_v12 = vadd.f32 %v691_v22, %v685_v2  ;;  %v876_v16 = vstv %s3244_s21 }
 0x16d   :  { %1323 = vrot.lane.b32.xlu1 %v1318_v51, %s2393_s14  ;;  %v702_v5 = vpop.permute.xlu0 %701  ;;  %v878_v63 = vmul.f32 %v876_v16, %v3093_v54 }
 0x16e   :  { %v694_v35 = vadd.f32 %v692_v11, %v686_v37  ;;  %v707_v20 = vadd.f32 %v702_v5, %v693_v12  ;;  %v877_v5 = vmul.f32 %v876_v16, %v3089_v25 }
 0x16f   :  { %v704_v32 = vpop.permute.xlu1 %703  ;;  %1335 = vrot.lane.b32.xlu0 %v1331_v49, %s2394_s17 }
 0x170   :  { %v708_v46 = vadd.f32 %v704_v32, %v694_v35 }
 0x171   :  { %1337 = vrot.lane.b32.xlu1 %v1332_v62, %s2394_s17  ;;  %v716_v29 = vpop.permute.xlu0 %715 }
 0x172   :  { %v721_v39 = vadd.f32 %v716_v29, %v707_v20 }
 0x173   :  { %v718_v13 = vpop.permute.xlu1 %717 }
 0x174   :  { %v722_v0 = vadd.f32 %v718_v13, %v708_v46  ;;  %v729_v34 = vadd.f32 %v727_v44, %v721_v39  ;;  %v912_v44 = vstv %s2184_s27  ;;  %s2244_s27 = sld [smem:[#allocation8 + $0x3e]] }
 0x175   :  { %v738_v38 = vpop.permute.xlu0 %737  ;;  %v914_v14 = vmul.f32 %v912_v44, %v3105_v55 }
 0x176   :  { %v730_v27 = vadd.f32 %v728_v43, %v722_v0  ;;  %v743_v17 = vadd.f32 %v738_v38, %v729_v34  ;;  %v913_v38 = vmul.f32 %v912_v44, %v3101_v52 }
 0x177   :  { %v740_v57 = vpop.permute.xlu1 %739 }
 0x178   :  { %v744_v50 = vadd.f32 %v740_v57, %v730_v27 }
 0x179   :  { %v752_v48 = vpop.permute.xlu0 %751 }
 0x17a   :  { %v757_v7 = vadd.f32 %v752_v48, %v743_v17 }
 0x17b   :  { %v754_v53 = vpop.permute.xlu1 %753 }
 0x17c   :  { %v758_v18 = vadd.f32 %v754_v53, %v744_v50  ;;  %v765_v19 = vadd.f32 %v763_v28, %v757_v7  ;;  %v948_v28 = vstv %s2187_s28  ;;  %s2260_s28 = sld [smem:[#allocation8 + $0x4a]] }
 0x17d   :  { %v774_v33 = vpop.permute.xlu0 %773 }
 0x17e   :  { %v766_v40 = vadd.f32 %v764_v4, %v758_v18  ;;  %v779_v6 = vadd.f32 %v774_v33, %v765_v19  ;;  %v949_v33 = vmul.f32 %v948_v28, %v3113_v45 }
 0x17f   :  { %v776_v26 = vpop.permute.xlu1 %775 }
 0x180   :  { %v780_v8 = vadd.f32 %v776_v26, %v766_v40 }
 0x181   :  { %v788_v56 = vpop.permute.xlu0 %787 }
 0x182   :  { %v793_v9 = vadd.f32 %v788_v56, %v779_v6  ;;  %v950_v6 = vmul.f32 %v948_v28, %v3117_v3 }
 0x183   :  { %v790_v1 = vpop.permute.xlu1 %789 }
 0x184   :  { %v794_v41 = vadd.f32 %v790_v1, %v780_v8  ;;  %796 = vst.msk [vmem:[%s3850_s7 + $0x1] sm:$0xff] %vm795_vm8, %v793_v9  ;;  %v804_v36 = vmul.f32 %v3249_v15, %v793_v9 }
 0x185   :  { %v852_v21 = vpop.permute.xlu0 %851 }
 0x186   :  { %797 = vst.msk [vmem:[%s3850_s7 + $0x9] sm:$0xff] %vm795_vm8, %v794_v41  ;;  %v805_v10 = vmul.f32 %v3249_v15, %v794_v41  ;;  %v806_v31 = vsel %vm795_vm8, %v804_v36, 0.0  ;;  %v821_v47 = vmul.f32 %v804_v36, %v793_v9  ;;  %v857_v2 = vadd.f32 %v852_v21, %v841_v30 }
 0x187   :  { %v854_v42 = vpop.permute.xlu1 %853 }
 0x188   :  { %v807_v22 = vsel %vm795_vm8, %v805_v10, 0.0  ;;  %v822_v61 = vmul.f32 %v805_v10, %v794_v41  ;;  %v823_v24 = vsel %vm795_vm8, %v821_v47, 0.0  ;;  %v858_v11 = vadd.f32 %v854_v42, %v842_v60 }
 0x189   :  { %v866_v51 = vpop.permute.xlu0 %865  ;;  %v808_v37 = vadd.f32 %v807_v22, %v806_v31  ;;  %v1021_v10 = vstv %s2194_s4  ;;  %s2276_s4 = sld [smem:[#allocation8 + $0x56]] }
 0x18a   :  { %v871_v12 = vadd.f32 %v866_v51, %v857_v2  ;;  %v824_v49 = vsel %vm795_vm8, %v822_v61, 0.0  ;;  %v1022_v42 = vmul.f32 %v1021_v10, %v3079_v23  ;;  %v1023_v61 = vmul.f32 %v1021_v10, %v3083_v58 }
 0x18b   :  { %v868_v35 = vpop.permute.xlu1 %867  ;;  %v825_v32 = vadd.f32 %v824_v49, %v823_v24  ;;  %v1057_v51 = vstv %s3274_s10  ;;  %s2230_s10 = sld [smem:[#allocation8 + $0x34]] }
 0x18c   :  { %v872_v62 = vadd.f32 %v868_v35, %v858_v11  ;;  %v879_v20 = vadd.f32 %v877_v5, %v871_v12  ;;  %v1059_v44 = vmul.f32 %v1057_v51, %v3093_v54 }
 0x18d   :  { %v888_v29 = vpop.permute.xlu0 %887 }
 0x18e   :  { %v880_v46 = vadd.f32 %v878_v63, %v872_v62  ;;  %809 = vadd.xlane.f32.xlu0 %v808_v37  ;;  %v893_v13 = vadd.f32 %v888_v29, %v879_v20  ;;  %v1058_v20 = vmul.f32 %v1057_v51, %v3089_v25 }
 0x18f   :  { %v890_v39 = vpop.permute.xlu1 %889 }
 0x190   :  { %v894_v43 = vadd.f32 %v890_v39, %v880_v46 }
 0x191   :  { %v902_v0 = vpop.permute.xlu0 %901 }
 0x192   :  { %v907_v34 = vadd.f32 %v902_v0, %v893_v13 }
 0x193   :  { %v904_v27 = vpop.permute.xlu1 %903 }
 0x194   :  { %v908_v57 = vadd.f32 %v904_v27, %v894_v43  ;;  %v915_v17 = vadd.f32 %v913_v38, %v907_v34  ;;  %v1093_v38 = vstv %s2200_s9  ;;  %s2247_s9 = sld [smem:[#allocation8 + $0x41]] }
 0x195   :  { %826 = vadd.xlane.f32.xlu1 %v825_v32  ;;  %v924_v48 = vpop.permute.xlu0 %923  ;;  %v1095_v28 = vmul.f32 %v1093_v38, %v3105_v55 }
 0x196   :  { %v916_v50 = vadd.f32 %v914_v14, %v908_v57  ;;  %v929_v53 = vadd.f32 %v924_v48, %v915_v17  ;;  %v1094_v48 = vmul.f32 %v1093_v38, %v3101_v52 }
 0x197   :  { %v926_v7 = vpop.permute.xlu1 %925 }
 0x198   :  { %v930_v4 = vadd.f32 %v926_v7, %v916_v50 }
 0x199   :  { %v938_v18 = vpop.permute.xlu0 %937 }
 0x19a   :  { %v943_v19 = vadd.f32 %v938_v18, %v929_v53 }
 0x19b   :  { %v940_v40 = vpop.permute.xlu1 %939 }
 0x19c   :  { %v944_v26 = vadd.f32 %v940_v40, %v930_v4  ;;  %v951_v56 = vadd.f32 %v949_v33, %v943_v19  ;;  %v1129_v33 = vstv %s2203_s8  ;;  %s2263_s8 = sld [smem:[#allocation8 + $0x4d]] }
 0x19d   :  { %v960_v8 = vpop.permute.xlu0 %959 }
 0x19e   :  { %v952_v9 = vadd.f32 %v950_v6, %v944_v26  ;;  %v965_v59 = vadd.f32 %v960_v8, %v951_v56  ;;  %v1130_v8 = vmul.f32 %v1129_v33, %v3113_v45 }
 0x19f   :  { %v962_v1 = vpop.permute.xlu1 %961 }
 0x1a0   :  { %v966_v36 = vadd.f32 %v962_v1, %v952_v9 }
 0x1a1   :  { %v974_v41 = vpop.permute.xlu0 %973 }
 0x1a2   :  { %v979_v21 = vadd.f32 %v974_v41, %v965_v59  ;;  %v1131_v59 = vmul.f32 %v1129_v33, %v3117_v3 }
 0x1a3   :  { %v976_v30 = vpop.permute.xlu1 %975 }
 0x1a4   :  { %v980_v31 = vadd.f32 %v976_v30, %v966_v36  ;;  %2190 = vst.msk [vmem:[%s3850_s7 + $0x19] sm:$0xff] %vm795_vm8, %v979_v21  ;;  %v984_v47 = vmul.f32 %v3249_v15, %v979_v21 }
 0x1a5   :  { %v1033_v60 = vpop.permute.xlu0 %1032 }
 0x1a6   :  { %2191 = vst.msk [vmem:[%s3850_s7 + $0x21] sm:$0xff] %vm795_vm8, %v980_v31  ;;  %v985_v16 = vmul.f32 %v3249_v15, %v980_v31  ;;  %v986_v2 = vsel %vm795_vm8, %v984_v47, 0.0  ;;  %v1001_v22 = vmul.f32 %v984_v47, %v979_v21  ;;  %v1038_v37 = vadd.f32 %v1033_v60, %v1022_v42 }
 0x1a7   :  { %v1035_v24 = vpop.permute.xlu1 %1034 }
 0x1a8   :  { %v987_v11 = vsel %vm795_vm8, %v985_v16, 0.0  ;;  %v1002_v12 = vmul.f32 %v985_v16, %v980_v31  ;;  %v1003_v5 = vsel %vm795_vm8, %v1001_v22, 0.0  ;;  %v1039_v32 = vadd.f32 %v1035_v24, %v1023_v61 }
 0x1a9   :  { %v1047_v49 = vpop.permute.xlu0 %1046  ;;  %v988_v35 = vadd.f32 %v987_v11, %v986_v2  ;;  %v1202_v16 = vstv %s2210_s26  ;;  %s2279_s26 = sld [smem:[#allocation8 + $0x59]] }
 0x1aa   :  { %v1052_v62 = vadd.f32 %v1047_v49, %v1038_v37  ;;  %v1004_v63 = vsel %vm795_vm8, %v1002_v12, 0.0  ;;  %v1203_v24 = vmul.f32 %v1202_v16, %v3079_v23  ;;  %v1204_v12 = vmul.f32 %v1202_v16, %v3083_v58 }
 0x1ab   :  { %v1049_v29 = vpop.permute.xlu1 %1048  ;;  %989 = vadd.xlane.f32.xlu0 %v988_v35  ;;  %v1005_v46 = vadd.f32 %v1004_v63, %v1003_v5  ;;  %v1238_v49 = vstv %s3299_s11  ;;  %s3408_s11 = sld [smem:[#allocation8 + $0x37]] }
 0x1ac   :  { %v1053_v39 = vadd.f32 %v1049_v29, %v1039_v32  ;;  %v1060_v13 = vadd.f32 %v1058_v20, %v1052_v62  ;;  %v1240_v38 = vmul.f32 %v1238_v49, %v3093_v54 }
 0x1ad   :  { %1006 = vadd.xlane.f32.xlu1 %v1005_v46  ;;  %v1069_v0 = vpop.permute.xlu0 %1068 }
 0x1ae   :  { %v1061_v43 = vadd.f32 %v1059_v44, %v1053_v39  ;;  %v1074_v27 = vadd.f32 %v1069_v0, %v1060_v13  ;;  %v1239_v13 = vmul.f32 %v1238_v49, %v3089_v25  ;;  %v1389_v49 = vstv %s2227_s23 }
 0x1af   :  { %v1071_v34 = vpop.permute.xlu1 %1070 }
 0x1b0   :  { %v1075_v14 = vadd.f32 %v1071_v34, %v1061_v43 }
 0x1b1   :  { %v1083_v57 = vpop.permute.xlu0 %1082 }
 0x1b2   :  { %v1088_v17 = vadd.f32 %v1083_v57, %v1074_v27 }
 0x1b3   :  { %v1085_v50 = vpop.permute.xlu1 %1084 }
 0x1b4   :  { %v1089_v7 = vadd.f32 %v1085_v50, %v1075_v14  ;;  %v1096_v53 = vadd.f32 %v1094_v48, %v1088_v17  ;;  %v1274_v48 = vstv %s2216_s16  ;;  %s2250_s16 = sld [smem:[#allocation8 + $0x44]] }
 0x1b5   :  { %v1105_v18 = vpop.permute.xlu0 %1104 }
 0x1b6   :  { %v1097_v4 = vadd.f32 %v1095_v28, %v1089_v7  ;;  %v1110_v40 = vadd.f32 %v1105_v18, %v1096_v53  ;;  %v1275_v18 = vmul.f32 %v1274_v48, %v3101_v52 }
 0x1b7   :  { %v1107_v19 = vpop.permute.xlu1 %1106 }
 0x1b8   :  { %v1111_v6 = vadd.f32 %v1107_v19, %v1097_v4  ;;  %v1276_v19 = vmul.f32 %v1274_v48, %v3105_v55  ;;  %v1946_v48 = vstv %s2276_s4  ;;  %s2264_s4 = sld [smem:[#allocation8 + $0x4e]] }
 0x1b9   :  { %v1119_v26 = vpop.permute.xlu0 %1118 }
 0x1ba   :  { %v1124_v56 = vadd.f32 %v1119_v26, %v1110_v40 }
 0x1bb   :  { %v1121_v9 = vpop.permute.xlu1 %1120 }
 0x1bc   :  { %v1125_v1 = vadd.f32 %v1121_v9, %v1111_v6  ;;  %v1132_v41 = vadd.f32 %v1130_v8, %v1124_v56  ;;  %v1310_v6 = vstv %s2219_s18  ;;  %s2266_s18 = sld [smem:[#allocation8 + $0x50]] }
 0x1bd   :  { %v1141_v36 = vpop.permute.xlu0 %1140 }
 0x1be   :  { %v1133_v21 = vadd.f32 %v1131_v59, %v1125_v1  ;;  %v1146_v10 = vadd.f32 %v1141_v36, %v1132_v41  ;;  %v1311_v59 = vmul.f32 %v1310_v6, %v3113_v45 }
 0x1bf   :  { %v1143_v30 = vpop.permute.xlu1 %1142 }
 0x1c0   :  { %v1147_v47 = vadd.f32 %v1143_v30, %v1133_v21  ;;  %v1312_v21 = vmul.f32 %v1310_v6, %v3117_v3 }
 0x1c1   :  { %v1155_v31 = vpop.permute.xlu0 %1154 }
 0x1c2   :  { %v1160_v60 = vadd.f32 %v1155_v31, %v1146_v10 }
 0x1c3   :  { %v1157_v42 = vpop.permute.xlu1 %1156 }
 0x1c4   :  { %v1161_v2 = vadd.f32 %v1157_v42, %v1147_v47  ;;  %2206 = vst.msk [vmem:[%s3850_s7 + $0x31] sm:$0xff] %vm795_vm8, %v1160_v60  ;;  %v1165_v22 = vmul.f32 %v3249_v15, %v1160_v60 }
 0x1c5   :  { %v1214_v61 = vpop.permute.xlu0 %1213 }
 0x1c6   :  { %2207 = vst.msk [vmem:[%s3850_s7 + $0x39] sm:$0xff] %vm795_vm8, %v1161_v2  ;;  %v1166_v51 = vmul.f32 %v3249_v15, %v1161_v2  ;;  %v1167_v37 = vsel %vm795_vm8, %v1165_v22, 0.0  ;;  %v1182_v11 = vmul.f32 %v1165_v22, %v1160_v60  ;;  %v1219_v35 = vadd.f32 %v1214_v61, %v1203_v24 }
 0x1c7   :  { %v1216_v5 = vpop.permute.xlu1 %1215 }
 0x1c8   :  { %v1168_v32 = vsel %vm795_vm8, %v1166_v51, 0.0  ;;  %v1183_v62 = vmul.f32 %v1166_v51, %v1161_v2  ;;  %v1184_v63 = vsel %vm795_vm8, %v1182_v11, 0.0  ;;  %v1220_v46 = vadd.f32 %v1216_v5, %v1204_v12 }
 0x1c9   :  { %v1228_v20 = vpop.permute.xlu0 %1227  ;;  %v1169_v29 = vadd.f32 %v1168_v32, %v1167_v37  ;;  %v1390_v32 = vmul.f32 %v1389_v49, %v3079_v23 }
 0x1ca   :  { %v1233_v39 = vadd.f32 %v1228_v20, %v1219_v35  ;;  %v1185_v44 = vsel %vm795_vm8, %v1183_v62, 0.0  ;;  %v1403_v35 = vstv %s2228_s5  ;;  %v1570_v20 = vstv %s2243_s2  ;;  %s3851_s2 = sld [smem:[#allocation47_spill]] }
 0x1cb   :  { %v1230_v0 = vpop.permute.xlu1 %1229  ;;  %1170 = vadd.xlane.f32.xlu0 %v1169_v29  ;;  %v1186_v43 = vadd.f32 %v1185_v44, %v1184_v63  ;;  %v1405_v62 = vmul.f32 %v1403_v35, %v3083_v58  ;;  %v3343_v63 = vld [vmem:[#allocation3 + $0x8] sm:$0xff]  ;;  %v1404_v29 = vmul.f32 %v1403_v35, %v3079_v23  ;;  %v1751_v44 = vstv %s2259_s1  ;;  %s3475_s1 = sld [smem:[#allocation8 + $0x52]] }
 0x1cc   :  { %v1234_v34 = vadd.f32 %v1230_v0, %v1220_v46  ;;  %v1241_v27 = vadd.f32 %v1239_v13, %v1233_v39  ;;  %v1572_v46 = vmul.f32 %v1570_v20, %v3343_v63  ;;  %v3348_v39 = vld [vmem:[#allocation3] sm:$0xff]  ;;  %v1753_v13 = vmul.f32 %v1751_v44, %v3343_v63 }
 0x1cd   :  { %1187 = vadd.xlane.f32.xlu1 %v1186_v43  ;;  %v1250_v57 = vpop.permute.xlu0 %1249  ;;  %v1932_v0 = vstv %s2275_s25  ;;  %v1752_v23 = vmul.f32 %v1751_v44, %v3348_v39  ;;  %v3420_v44 = vld [vmem:[#allocation3 + $0x28] sm:$0xff] }
 0x1ce   :  { %v1242_v14 = vadd.f32 %v1240_v38, %v1234_v34  ;;  %v1255_v50 = vadd.f32 %v1250_v57, %v1241_v27  ;;  %v1934_v43 = vmul.f32 %v1932_v0, %v3343_v63  ;;  %v1584_v34 = vstv %s2244_s27  ;;  %s2284_s27 = sld [smem:[#allocation8 + $0x5e]] }
 0x1cf   :  { %v1252_v17 = vpop.permute.xlu1 %1251  ;;  %v1933_v38 = vmul.f32 %v1932_v0, %v3348_v39  ;;  %v1586_v27 = vmul.f32 %v1584_v34, %v3343_v63  ;;  %v1765_v57 = vstv %s2260_s28  ;;  %s2248_s28 = sld [smem:[#allocation8 + $0x42]] }
 0x1d0   :  { %v1256_v28 = vadd.f32 %v1252_v17, %v1242_v14  ;;  %v1585_v14 = vmul.f32 %v1584_v34, %v3348_v39  ;;  %v1767_v17 = vmul.f32 %v1765_v57, %v3343_v63  ;;  %v3428_v34 = vld [vmem:[#allocation3 + $0x20] sm:$0xff] }
 0x1d1   :  { %v1264_v7 = vpop.permute.xlu0 %1263 }
 0x1d2   :  { %v1269_v53 = vadd.f32 %v1264_v7, %v1255_v50  ;;  %v1766_v50 = vmul.f32 %v1765_v57, %v3348_v39 }
 0x1d3   :  { %v1266_v25 = vpop.permute.xlu1 %1265 }
 0x1d4   :  { %v1270_v4 = vadd.f32 %v1266_v25, %v1256_v28  ;;  %v1277_v33 = vadd.f32 %v1275_v18, %v1269_v53  ;;  %v1948_v53 = vmul.f32 %v1946_v48, %v3343_v63  ;;  %v3373_v18 = vld [vmem:[#allocation3 + $0x18] sm:$0xff]  ;;  %v1425_v25 = vstv %s2230_s10  ;;  %s3852_s10 = sld [smem:[#allocation48_spill]] }
 0x1d5   :  { %v1286_v40 = vpop.permute.xlu0 %1285 }
 0x1d6   :  { %v1278_v54 = vadd.f32 %v1276_v19, %v1270_v4  ;;  %v1291_v56 = vadd.f32 %v1286_v40, %v1277_v33  ;;  %v1947_v19 = vmul.f32 %v1946_v48, %v3348_v39  ;;  %v1427_v40 = vmul.f32 %v1425_v25, %v3373_v18 }
 0x1d7   :  { %v1288_v26 = vpop.permute.xlu1 %1287 }
 0x1d8   :  { %v1292_v9 = vadd.f32 %v1288_v26, %v1278_v54  ;;  %v3380_v54 = vld [vmem:[#allocation3 + $0x10] sm:$0xff]  ;;  %v1606_v26 = vstv %s3367_s0  ;;  %s2237_s0 = sld [smem:[#allocation8 + $0x3b]] }
 0x1d9   :  { %v1300_v8 = vpop.permute.xlu0 %1299 }
 0x1da   :  { %v1305_v1 = vadd.f32 %v1300_v8, %v1291_v56 }
 0x1db   :  { %v1302_v41 = vpop.permute.xlu1 %1301 }
 0x1dc   :  { %v1306_v36 = vadd.f32 %v1302_v41, %v1292_v9  ;;  %v1313_v52 = vadd.f32 %v1311_v59, %v1305_v1  ;;  %v1426_v9 = vmul.f32 %v1425_v25, %v3380_v54  ;;  %v1608_v1 = vmul.f32 %v1606_v26, %v3373_v18 }
 0x1dd   :  { %v1322_v30 = vpop.permute.xlu0 %1321 }
 0x1de   :  { %v1314_v10 = vadd.f32 %v1312_v21, %v1306_v36  ;;  %v1327_v55 = vadd.f32 %v1322_v30, %v1313_v52  ;;  %v1787_v36 = vstv %s3375_s15  ;;  %v1607_v30 = vmul.f32 %v1606_v26, %v3380_v54  ;;  %s2253_s15 = sld [smem:[#allocation8 + $0x47]] }
 0x1df   :  { %v1324_v31 = vpop.permute.xlu1 %1323 }
 0x1e0   :  { %v1328_v60 = vadd.f32 %v1324_v31, %v1314_v10  ;;  %v1789_v10 = vmul.f32 %v1787_v36, %v3373_v18  ;;  %v1968_v31 = vstv %s3384_s29  ;;  %s3501_s29 = sld [smem:[#allocation8 + $0x53]] }
 0x1e1   :  { %v1336_v47 = vpop.permute.xlu0 %1335 }
 0x1e2   :  { %v1341_v42 = vadd.f32 %v1336_v47, %v1327_v55  ;;  %v1788_v47 = vmul.f32 %v1787_v36, %v3380_v54 }
 0x1e3   :  { %v1338_v16 = vpop.permute.xlu1 %1337 }
 0x1e4   :  { %v1342_v2 = vadd.f32 %v1338_v16, %v1328_v60  ;;  %2222 = vst.msk [vmem:[%s3850_s7 + $0x49] sm:$0xff] %vm795_vm8, %v1341_v42  ;;  %v1346_v45 = vmul.f32 %v3249_v15, %v1341_v42 }
 0x1e6   :  { %2223 = vst.msk [vmem:[%s3850_s7 + $0x51] sm:$0xff] %vm795_vm8, %v1342_v2  ;;  %v1347_v3 = vmul.f32 %v3249_v15, %v1342_v2  ;;  %v1348_v22 = vsel %vm795_vm8, %v1346_v45, 0.0  ;;  %v1363_v61 = vmul.f32 %v1346_v45, %v1341_v42  ;;  %v1391_v15 = vmul.f32 %v1389_v49, %v3083_v58 }
 0x1e7   :  { %v1571_v58 = vmul.f32 %v1570_v20, %v3348_v39  ;;  %v1970_v42 = vmul.f32 %v1968_v31, %v3373_v18  ;;  %v1969_v45 = vmul.f32 %v1968_v31, %v3380_v54  ;;  %v1982_v49 = vstv %s2279_s26 }
 0x1e8   :  { %v1349_v24 = vsel %vm795_vm8, %v1347_v3, 0.0  ;;  %v1364_v51 = vmul.f32 %v1347_v3, %v1342_v2  ;;  %v1365_v37 = vsel %vm795_vm8, %v1363_v61, 0.0  ;;  %v1439_v2 = vstv %s2231_s6  ;;  %s3506_s6 = sld [smem:[#allocation8 + $0x30]] }
 0x1e9   :  { %v1350_v11 = vadd.f32 %v1349_v24, %v1348_v22  ;;  %v1441_v3 = vmul.f32 %v1439_v2, %v3373_v18  ;;  %v1620_v22 = vstv %s2247_s9  ;;  %v1440_v61 = vmul.f32 %v1439_v2, %v3380_v54  ;;  %v3472_v2 = vld [vmem:[#allocation3 + $0x38] sm:$0xff]  ;;  %s3509_s9 = sld [smem:[#allocation8 + $0x5f]] }
 0x1ea   :  { %v1366_v12 = vsel %vm795_vm8, %v1364_v51, 0.0  ;;  %v1622_v24 = vmul.f32 %v1620_v22, %v3373_v18  ;;  %v1801_v51 = vstv %s2263_s8  ;;  %v1984_v20 = vmul.f32 %v1982_v49, %v3373_v18  ;;  %s3516_s8 = sld [smem:[#allocation8 + $0x3c]] }
 0x1eb   :  { %1351 = vadd.xlane.f32.xlu0 %v1350_v11  ;;  %v1367_v5 = vadd.f32 %v1366_v12, %v1365_v37  ;;  %v1621_v37 = vmul.f32 %v1620_v22, %v3380_v54  ;;  %v1803_v12 = vmul.f32 %v1801_v51, %v3373_v18  ;;  %v1983_v0 = vmul.f32 %v1982_v49, %v3380_v54 }
 0x1ed   :  { %1368 = vadd.xlane.f32.xlu1 %v1367_v5 }
 0x1fe   :  { %1396 = vrot.lane.b32.xlu1 %v1391_v15, %s2393_s14 }
 0x201   :  { %1394 = vrot.lane.b32.xlu0 %v1390_v32, %s2393_s14 }
 0x202   :  { %1410 = vrot.lane.b32.xlu1 %v1405_v62, %s2394_s17  ;;  %v1802_v62 = vmul.f32 %v1801_v51, %v3380_v54  ;;  %v3480_v51 = vld [vmem:[#allocation3 + $0x30] sm:$0xff] }
 0x205   :  { %1408 = vrot.lane.b32.xlu0 %v1404_v29, %s2394_s17 }
 0x206   :  { %1577 = vrot.lane.b32.xlu1 %v1572_v46, %s2393_s14 }
 0x209   :  { %1575 = vrot.lane.b32.xlu0 %v1571_v58, %s2393_s14  ;;  %v1461_v58 = vstv %s3408_s11  ;;  %s2251_s11 = sld [smem:[#allocation8 + $0x45]] }
 0x20a   :  { %1758 = vrot.lane.b32.xlu1 %v1753_v13, %s2393_s14 }
 0x20d   :  { %1756 = vrot.lane.b32.xlu0 %v1752_v23, %s2393_s14 }
 0x20e   :  { %1939 = vrot.lane.b32.xlu1 %v1934_v43, %s2393_s14  ;;  %v1463_v43 = vmul.f32 %v1461_v58, %v3420_v44 }
 0x211   :  { %1937 = vrot.lane.b32.xlu0 %v1933_v38, %s2393_s14 }
 0x212   :  { %1591 = vrot.lane.b32.xlu1 %v1586_v27, %s2394_s17  ;;  %v1642_v27 = vstv %s3414_s12  ;;  %s3593_s12 = sld [smem:[#allocation8 + $0x51]] }
 0x215   :  { %1589 = vrot.lane.b32.xlu0 %v1585_v14, %s2394_s17  ;;  %v1462_v14 = vmul.f32 %v1461_v58, %v3428_v34  ;;  %v2040_v58 = vstv %s2284_s27  ;;  %s2232_s27 = sld [smem:[#allocation8 + $0x36]] }
 0x216   :  { %1772 = vrot.lane.b32.xlu1 %v1767_v17, %s2394_s17 }
 0x217   :  { %v810_v7 = vpop.xlane.xlu0 %809 }
 0x218   :  { %v811_v28 = vrot.slane %v810_v7, 4 }
 0x219   :  { %1770 = vrot.lane.b32.xlu0 %v1766_v50, %s2394_s17  ;;  %v1644_v50 = vmul.f32 %v1642_v27, %v3420_v44 }
 0x21a   :  { %v812_v4 = vadd.f32 %v811_v28, %v810_v7  ;;  %1953 = vrot.lane.b32.xlu1 %v1948_v53, %s2394_s17  ;;  %v1823_v28 = vstv %s3423_s3  ;;  %v1643_v53 = vmul.f32 %v1642_v27, %v3428_v34  ;;  %v1692_v27 = vstv %s2253_s15 }
 0x21b   :  { %v1825_v25 = vmul.f32 %v1823_v28, %v3420_v44 }
 0x21c   :  { %v813_v33 = vrot.slane %v812_v4, 2 }
 0x21d   :  { %1951 = vrot.lane.b32.xlu0 %v1947_v19, %s2394_s17  ;;  %v1824_v19 = vmul.f32 %v1823_v28, %v3428_v34 }
 0x21e   :  { %1432 = vrot.lane.b32.xlu1 %v1427_v40, %s2393_s14  ;;  %v827_v6 = vpop.xlane.xlu1 %826  ;;  %v814_v56 = vadd.f32 %v813_v33, %v812_v4  ;;  %v2004_v4 = vstv %s2281_s30  ;;  %v1475_v40 = vstv %s2234_s13 }
 0x21f   :  { %v828_v8 = vrot.slane %v827_v6, 4  ;;  %v2006_v33 = vmul.f32 %v2004_v4, %v3420_v44  ;;  %v2005_v26 = vmul.f32 %v2004_v4, %v3428_v34 }
 0x220   :  { %v815_v59 = vrot.slane %v814_v56, 1 }
 0x221   :  { %v829_v41 = vadd.f32 %v828_v8, %v827_v6  ;;  %1430 = vrot.lane.b32.xlu0 %v1426_v9, %s2393_s14  ;;  %v1477_v6 = vmul.f32 %v1475_v40, %v3420_v44  ;;  %v1476_v8 = vmul.f32 %v1475_v40, %v3428_v34 }
 0x222   :  { %1613 = vrot.lane.b32.xlu1 %v1608_v1, %s2393_s14  ;;  %v816_v21 = vadd.f32 %v815_v59, %v814_v56  ;;  %v1656_v56 = vstv %s2250_s16  ;;  %v1837_v1 = vstv %s2266_s18  ;;  %s3537_s16 = sld [smem:[#allocation8 + $0x48]] }
 0x223   :  { %v830_v52 = vrot.slane %v829_v41, 2  ;;  %v1658_v9 = vmul.f32 %v1656_v56, %v3420_v44  ;;  %v1657_v59 = vmul.f32 %v1656_v56, %v3428_v34  ;;  %v1839_v36 = vmul.f32 %v1837_v1, %v3420_v44  ;;  %s3544_s18 = sld [smem:[#allocation8 + $0x54]] }
 0x224   :  { %2290 = vpush %v816_v21 }
 0x225   :  { %1611 = vrot.lane.b32.xlu0 %v1607_v30, %s2393_s14  ;;  %v831_v55 = vadd.f32 %v830_v52, %v829_v41  ;;  %v2018_v52 = vstv %s3449_s19  ;;  %s2261_s19 = sld [smem:[#allocation8 + $0x4b]] }
 0x226   :  { %1794 = vrot.lane.b32.xlu1 %v1789_v10, %s2393_s14  ;;  %v2019_v22 = vmul.f32 %v2018_v52, %v3428_v34 }
 0x227   :  { %v832_v60 = vrot.slane %v831_v55, 1 }
 0x229   :  { %1792 = vrot.lane.b32.xlu0 %v1788_v47, %s2393_s14  ;;  %v833_v16 = vadd.f32 %v832_v60, %v831_v55  ;;  %v1838_v47 = vmul.f32 %v1837_v1, %v3428_v34  ;;  %v2020_v60 = vmul.f32 %v2018_v52, %v3420_v44 }
 0x22a   :  { %1975 = vrot.lane.b32.xlu1 %v1970_v42, %s2393_s14 }
 0x22b   :  { %2292 = vpush %v833_v16 }
 0x22d   :  { %1973 = vrot.lane.b32.xlu0 %v1969_v45, %s2393_s14  ;;  %v1497_v45 = vstv %s3455_s20  ;;  %s3557_s20 = sld [smem:[#allocation8 + $0x57]] }
 0x22e   :  { %1446 = vrot.lane.b32.xlu1 %v1441_v3, %s2394_s17  ;;  %v1498_v49 = vmul.f32 %v1497_v45, %v3480_v51 }
 0x231   :  { %1444 = vrot.lane.b32.xlu0 %v1440_v61, %s2394_s17 }
 0x232   :  { %1627 = vrot.lane.b32.xlu1 %v1622_v24, %s2394_s17  ;;  %v1499_v24 = vmul.f32 %v1497_v45, %v3472_v2 }
 0x234   :  { %v990_v11 = vpop.xlane.xlu0 %989 }
 0x235   :  { %v991_v5 = vrot.slane %v990_v11, 4  ;;  %1625 = vrot.lane.b32.xlu0 %v1621_v37, %s2394_s17 }
 0x236   :  { %1808 = vrot.lane.b32.xlu1 %v1803_v12, %s2394_s17  ;;  %v1007_v15 = vpop.xlane.xlu1 %1006  ;;  %v1678_v12 = vstv %s3462_s22 }
 0x237   :  { %v992_v35 = vadd.f32 %v991_v5, %v990_v11  ;;  %v1008_v32 = vrot.slane %v1007_v15, 4 }
 0x239   :  { %v993_v29 = vrot.slane %v992_v35, 2  ;;  %v1009_v46 = vadd.f32 %v1008_v32, %v1007_v15  ;;  %1806 = vrot.lane.b32.xlu0 %v1802_v62, %s2394_s17  ;;  %v1680_v32 = vmul.f32 %v1678_v12, %v3472_v2 }
 0x23a   :  { %1989 = vrot.lane.b32.xlu1 %v1984_v20, %s2394_s17  ;;  %v1859_v20 = vstv %s3475_s1 }
 0x23b   :  { %v1010_v13 = vrot.slane %v1009_v46, 2  ;;  %v994_v23 = vadd.f32 %v993_v29, %v992_v35  ;;  %v1679_v29 = vmul.f32 %v1678_v12, %v3480_v51 }
 0x23d   :  { %1987 = vrot.lane.b32.xlu0 %v1983_v0, %s2394_s17  ;;  %v995_v38 = vrot.slane %v994_v23, 1  ;;  %v1011_v57 = vadd.f32 %v1010_v13, %v1009_v46  ;;  %v1861_v46 = vmul.f32 %v1859_v20, %v3472_v2  ;;  %v1860_v13 = vmul.f32 %v1859_v20, %v3480_v51 }
 0x23e   :  { %1468 = vrot.lane.b32.xlu1 %v1463_v43, %s2393_s14  ;;  %v2042_v0 = vmul.f32 %v2040_v58, %v3472_v2  ;;  %v2041_v43 = vmul.f32 %v2040_v58, %v3480_v51 }
 0x23f   :  { %v996_v17 = vadd.f32 %v995_v38, %v994_v23  ;;  %v1012_v48 = vrot.slane %v1011_v57, 1  ;;  %v1511_v23 = vstv %s2237_s0  ;;  %s3575_s0 = sld [smem:[#allocation8 + $0x5a]] }
 0x240   :  { %v1513_v38 = vmul.f32 %v1511_v23, %v3472_v2 }
 0x241   :  { %1466 = vrot.lane.b32.xlu0 %v1462_v14, %s2393_s14  ;;  %2294 = vpush %v996_v17  ;;  %v1013_v7 = vadd.f32 %v1012_v48, %v1011_v57  ;;  %v1512_v57 = vmul.f32 %v1511_v23, %v3480_v51  ;;  %v1694_v14 = vmul.f32 %v1692_v27, %v3472_v2  ;;  %v1873_v17 = vstv %s3501_s29 }
 0x242   :  { %1649 = vrot.lane.b32.xlu1 %v1644_v50, %s2393_s14  ;;  %v1693_v50 = vmul.f32 %v1692_v27, %v3480_v51  ;;  %v1875_v28 = vmul.f32 %v1873_v17, %v3472_v2 }
 0x243   :  { %2296 = vpush %v1013_v7 }
 0x245   :  { %1647 = vrot.lane.b32.xlu0 %v1643_v53, %s2393_s14  ;;  %v1383_v53 = vstv %s3506_s6 }
 0x246   :  { %1830 = vrot.lane.b32.xlu1 %v1825_v25, %s2393_s14 }
 0x249   :  { %1828 = vrot.lane.b32.xlu0 %v1824_v19, %s2393_s14  ;;  %v2054_v19 = vstv %s3509_s9 }
 0x24a   :  { %2011 = vrot.lane.b32.xlu1 %v2006_v33, %s2393_s14  ;;  %v2056_v1 = vmul.f32 %v2054_v19, %v3472_v2 }
 0x24d   :  { %2009 = vrot.lane.b32.xlu0 %v2005_v26, %s2393_s14 }
 0x24e   :  { %1482 = vrot.lane.b32.xlu1 %v1477_v6, %s2394_s17  ;;  %v2332_v6 = vld [vmem:[#allocation3] sm:$0xff] }
 0x24f   :  { %v1384_v56 = vmul.f32 %v2332_v6, %v1383_v53 }
 0x251   :  { %1480 = vrot.lane.b32.xlu0 %v1476_v8, %s2394_s17  ;;  %v1874_v8 = vmul.f32 %v1873_v17, %v3480_v51 }
 0x252   :  { %1663 = vrot.lane.b32.xlu1 %v1658_v9, %s2394_s17 }
 0x254   :  { %v1171_v41 = vpop.xlane.xlu0 %1170 }
 0x255   :  { %v1172_v21 = vrot.slane %v1171_v41, 4  ;;  %1661 = vrot.lane.b32.xlu0 %v1657_v59, %s2394_s17  ;;  %s2291_s21 = spop %2290 }
 0x256   :  { %1844 = vrot.lane.b32.xlu1 %v1839_v36, %s2394_s17  ;;  %v1188_v30 = vpop.xlane.xlu1 %1187  ;;  %v818_v10 = vstv %s2291_s21 }
 0x257   :  { %v1173_v31 = vadd.f32 %v1172_v21, %v1171_v41  ;;  %v1189_v55 = vrot.slane %v1188_v30, 4  ;;  %820 = vst.msk [vmem:[%s3851_s2] sm:$0x1] %vm819_vm9, %v818_v10  ;;  %v2333_v21 = vld [vmem:[#allocation3 + $0x8] sm:$0xff]  ;;  %v1564_v10 = vstv %s3516_s8 }
 0x258   :  { %v1385_v52 = vmul.f32 %v2333_v21, %v1383_v53  ;;  %v1566_v20 = vmul.f32 %v1564_v10, %v3343_v63 }
 0x259   :  { %v1174_v42 = vrot.slane %v1173_v31, 2  ;;  %v1190_v16 = vadd.f32 %v1189_v55, %v1188_v30  ;;  %1842 = vrot.lane.b32.xlu0 %v1838_v47, %s2394_s17 }
 0x25a   :  { %2025 = vrot.lane.b32.xlu1 %v2020_v60, %s2394_s17  ;;  %v2055_v60 = vmul.f32 %v2054_v19, %v3480_v51 }
 0x25b   :  { %v1191_v3 = vrot.slane %v1190_v16, 2  ;;  %v1175_v61 = vadd.f32 %v1174_v42, %v1173_v31 }
 0x25c   :  { %s2293_s25 = spop %2292 }
 0x25d   :  { %v835_v37 = vstv %s2293_s25  ;;  %2023 = vrot.lane.b32.xlu0 %v2019_v22, %s2394_s17  ;;  %v1176_v11 = vrot.slane %v1175_v61, 1  ;;  %v1192_v5 = vadd.f32 %v1191_v3, %v1190_v16 }
 0x25e   :  { %836 = vst.msk [vmem:[%s3852_s10] sm:$0x1] %vm819_vm9, %v835_v37  ;;  %1504 = vrot.lane.b32.xlu1 %v1499_v24, %s2393_s14  ;;  %v1565_v37 = vmul.f32 %v1564_v10, %v3348_v39 }
 0x25f   :  { %v1177_v15 = vadd.f32 %v1176_v11, %v1175_v61  ;;  %v1193_v35 = vrot.slane %v1192_v5, 1 }
 0x261   :  { %1502 = vrot.lane.b32.xlu0 %v1498_v49, %s2393_s14  ;;  %2298 = vpush %v1177_v15  ;;  %v1194_v62 = vadd.f32 %v1193_v35, %v1192_v5 }
 0x262   :  { %1685 = vrot.lane.b32.xlu1 %v1680_v32, %s2393_s14  ;;  %v1745_v32 = vstv %s3537_s16 }
 0x263   :  { %2300 = vpush %v1194_v62  ;;  %v1747_v27 = vmul.f32 %v1745_v32, %v3343_v63 }
 0x265   :  { %1683 = vrot.lane.b32.xlu0 %v1679_v29, %s2393_s14 }
 0x266   :  { %1866 = vrot.lane.b32.xlu1 %v1861_v46, %s2393_s14 }
 0x269   :  { %1864 = vrot.lane.b32.xlu0 %v1860_v13, %s2393_s14 }
 0x26a   :  { %2047 = vrot.lane.b32.xlu1 %v2042_v0, %s2393_s14  ;;  %v1746_v0 = vmul.f32 %v1745_v32, %v3348_v39 }
 0x26d   :  { %2045 = vrot.lane.b32.xlu0 %v2041_v43, %s2393_s14  ;;  %s3519_s14 = sld [smem:[#allocation8 + $0x33]]  ;;  %v1926_v43 = vstv %s3544_s18 }
 0x26e   :  { %1518 = vrot.lane.b32.xlu1 %v1513_v38, %s2394_s17  ;;  %v1927_v17 = vmul.f32 %v1926_v43, %v3348_v39 }
 0x271   :  { %1516 = vrot.lane.b32.xlu0 %v1512_v57, %s2394_s17 }
 0x272   :  { %1699 = vrot.lane.b32.xlu1 %v1694_v14, %s2394_s17  ;;  %s2295_s26 = spop %2294 }
 0x273   :  { %v998_v48 = vstv %s2295_s26  ;;  %v1419_v31 = vstv %s3519_s14  ;;  %s2235_s14 = sld [smem:[#allocation8 + $0x39]] }
 0x274   :  { %2192 = vst.msk [vmem:[%s3851_s2 + $0x1] sm:$0x1] %vm819_vm9, %v998_v48  ;;  %s2297_s3 = spop %2296  ;;  %v1352_v7 = vpop.xlane.xlu0 %1351  ;;  %v1420_v61 = vmul.f32 %v1419_v31, %v3380_v54  ;;  %v1421_v11 = vmul.f32 %v1419_v31, %v3373_v18 }
 0x275   :  { %v1015_v25 = vstv %s2297_s3  ;;  %v1353_v4 = vrot.slane %v1352_v7, 4  ;;  %1697 = vrot.lane.b32.xlu0 %v1693_v50, %s2394_s17  ;;  %s3596_s3 = sld [smem:[#allocation8 + $0x5d]] }
 0x276   :  { %2193 = vst.msk [vmem:[%s3852_s10 + $0x1] sm:$0x1] %vm819_vm9, %v1015_v25  ;;  %1880 = vrot.lane.b32.xlu1 %v1875_v28, %s2394_s17  ;;  %v1369_v33 = vpop.xlane.xlu1 %1368 }
 0x277   :  { %v1354_v40 = vadd.f32 %v1353_v4, %v1352_v7  ;;  %v1370_v26 = vrot.slane %v1369_v33, 4  ;;  %v1928_v7 = vmul.f32 %v1926_v43, %v3343_v63 }
 0x278   :  { %v1395_v9 = vpop.permute.xlu0 %1394 }
 0x279   :  { %v1355_v59 = vrot.slane %v1354_v40, 2  ;;  %v1371_v41 = vadd.f32 %v1370_v26, %v1369_v33  ;;  %v1400_v36 = vadd.f32 %v1395_v9, %v1384_v56  ;;  %1878 = vrot.lane.b32.xlu0 %v1874_v8, %s2394_s17  ;;  %v1781_v26 = vstv %s2261_s19 }
 0x27a   :  { %2061 = vrot.lane.b32.xlu1 %v2056_v1, %s2394_s17  ;;  %v1397_v30 = vpop.permute.xlu1 %1396  ;;  %v1782_v63 = vmul.f32 %v1781_v26, %v3380_v54 }
 0x27b   :  { %v1372_v55 = vrot.slane %v1371_v41, 2  ;;  %v1401_v47 = vadd.f32 %v1397_v30, %v1385_v52  ;;  %v1356_v42 = vadd.f32 %v1355_v59, %v1354_v40  ;;  %v1783_v30 = vmul.f32 %v1781_v26, %v3373_v18 }
 0x27c   :  { %v1409_v16 = vpop.permute.xlu0 %1408 }
 0x27d   :  { %v1414_v45 = vadd.f32 %v1409_v16, %v1400_v36  ;;  %2059 = vrot.lane.b32.xlu0 %v2055_v60, %s2394_s17  ;;  %v1357_v3 = vrot.slane %v1356_v42, 1  ;;  %v1373_v22 = vadd.f32 %v1372_v55, %v1371_v41  ;;  %s2245_s17 = sld [smem:[#allocation8 + $0x3f]]  ;;  %v1962_v41 = vstv %s3557_s20 }
 0x27e   :  { %v1411_v24 = vpop.permute.xlu1 %1410  ;;  %v1963_v60 = vmul.f32 %v1962_v41, %v3380_v54 }
 0x27f   :  { %v1415_v12 = vadd.f32 %v1411_v24, %v1401_v47  ;;  %v1358_v5 = vadd.f32 %v1357_v3, %v1356_v42  ;;  %v1374_v49 = vrot.slane %v1373_v22, 1  ;;  %v1422_v15 = vadd.f32 %v1420_v61, %v1414_v45 }
 0x280   :  { %v1576_v35 = vpop.permute.xlu0 %1575  ;;  %v1964_v3 = vmul.f32 %v1962_v41, %v3373_v18 }
 0x281   :  { %v1581_v62 = vadd.f32 %v1576_v35, %v1565_v37  ;;  %2302 = vpush %v1358_v5  ;;  %v1375_v29 = vadd.f32 %v1374_v49, %v1373_v22  ;;  %v1423_v46 = vadd.f32 %v1421_v11, %v1415_v12 }
 0x282   :  { %v1578_v58 = vpop.permute.xlu1 %1577 }
 0x283   :  { %v1582_v13 = vadd.f32 %v1578_v58, %v1566_v20  ;;  %2304 = vpush %v1375_v29  ;;  %v1600_v53 = vstv %s2245_s17 }
 0x284   :  { %v1757_v23 = vpop.permute.xlu0 %1756  ;;  %v1601_v33 = vmul.f32 %v1600_v53, %v3380_v54  ;;  %v1602_v39 = vmul.f32 %v1600_v53, %v3373_v18  ;;  %v1817_v53 = vstv %s2264_s4 }
 0x285   :  { %v1762_v38 = vadd.f32 %v1757_v23, %v1746_v0  ;;  %v1455_v0 = vstv %s2232_s27 }
 0x286   :  { %v1759_v57 = vpop.permute.xlu1 %1758 }
 0x287   :  { %v1763_v14 = vadd.f32 %v1759_v57, %v1747_v27 }
 0x288   :  { %v1938_v48 = vpop.permute.xlu0 %1937 }
 0x289   :  { %v1943_v50 = vadd.f32 %v1938_v48, %v1927_v17 }
 0x28a   :  { %v1940_v28 = vpop.permute.xlu1 %1939 }
 0x28b   :  { %v1944_v25 = vadd.f32 %v1940_v28, %v1928_v7 }
 0x28c   :  { %v1590_v4 = vpop.permute.xlu0 %1589 }
 0x28d   :  { %v1595_v19 = vadd.f32 %v1590_v4, %v1581_v62 }
 0x28e   :  { %v1592_v40 = vpop.permute.xlu1 %1591 }
 0x28f   :  { %v1596_v6 = vadd.f32 %v1592_v40, %v1582_v13  ;;  %v1603_v56 = vadd.f32 %v1601_v33, %v1595_v19 }
 0x290   :  { %v1771_v8 = vpop.permute.xlu0 %1770 }
 0x291   :  { %v1776_v9 = vadd.f32 %v1771_v8, %v1762_v38  ;;  %v1604_v1 = vadd.f32 %v1602_v39, %v1596_v6  ;;  %v1636_v38 = vstv %s2248_s28  ;;  %v1818_v6 = vmul.f32 %v1817_v53, %v3428_v34 }
 0x292   :  { %v1773_v59 = vpop.permute.xlu1 %1772  ;;  %s2299_s21 = spop %2298  ;;  %v1637_v7 = vmul.f32 %v1636_v38, %v3428_v34  ;;  %v1638_v19 = vmul.f32 %v1636_v38, %v3420_v44  ;;  %v1998_v39 = vstv %s3575_s0 }
 0x293   :  { %v1777_v36 = vadd.f32 %v1773_v59, %v1763_v14  ;;  %v1179_v21 = vstv %s2299_s21  ;;  %v1784_v52 = vadd.f32 %v1782_v63, %v1776_v9  ;;  %v1457_v14 = vmul.f32 %v1455_v0, %v3420_v44 }
 0x294   :  { %2208 = vst.msk [vmem:[%s3851_s2 + $0x2] sm:$0x1] %vm819_vm9, %v1179_v21  ;;  %s2301_s5 = spop %2300  ;;  %v1952_v10 = vpop.permute.xlu0 %1951  ;;  %v1819_v63 = vmul.f32 %v1817_v53, %v3420_v44 }
 0x295   :  { %v1196_v31 = vstv %s2301_s5  ;;  %v1957_v55 = vadd.f32 %v1952_v10, %v1943_v50  ;;  %v1785_v47 = vadd.f32 %v1783_v30, %v1777_v36 }
 0x296   :  { %2209 = vst.msk [vmem:[%s3852_s10 + $0x2] sm:$0x1] %vm819_vm9, %v1196_v31  ;;  %v1954_v42 = vpop.permute.xlu1 %1953 }
 0x297   :  { %v1958_v16 = vadd.f32 %v1954_v42, %v1944_v25  ;;  %v1965_v45 = vadd.f32 %v1963_v60, %v1957_v55  ;;  %v2000_v55 = vmul.f32 %v1998_v39, %v3420_v44 }
 0x298   :  { %v1431_v22 = vpop.permute.xlu0 %1430 }
 0x299   :  { %v1436_v61 = vadd.f32 %v1431_v22, %v1422_v15  ;;  %v1966_v24 = vadd.f32 %v1964_v3, %v1958_v16 }
 0x29a   :  { %v1433_v37 = vpop.permute.xlu1 %1432 }
 0x29b   :  { %v1437_v11 = vadd.f32 %v1433_v37, %v1423_v46  ;;  %v1456_v46 = vmul.f32 %v1455_v0, %v3428_v34 }
 0x29c   :  { %v1612_v12 = vpop.permute.xlu0 %1611 }
 0x29d   :  { %v1617_v5 = vadd.f32 %v1612_v12, %v1603_v56 }
 0x29e   :  { %v1614_v49 = vpop.permute.xlu1 %1613 }
 0x29f   :  { %v1618_v54 = vadd.f32 %v1614_v49, %v1604_v1 }
 0x2a0   :  { %v1793_v35 = vpop.permute.xlu0 %1792 }
 0x2a1   :  { %v1798_v32 = vadd.f32 %v1793_v35, %v1784_v52  ;;  %v1999_v52 = vmul.f32 %v1998_v39, %v3428_v34 }
 0x2a2   :  { %v1795_v62 = vpop.permute.xlu1 %1794 }
 0x2a3   :  { %v1799_v20 = vadd.f32 %v1795_v62, %v1785_v47 }
 0x2a4   :  { %v1974_v29 = vpop.permute.xlu0 %1973 }
 0x2a5   :  { %v1979_v58 = vadd.f32 %v1974_v29, %v1965_v45 }
 0x2a6   :  { %v1976_v13 = vpop.permute.xlu1 %1975 }
 0x2a7   :  { %v1980_v18 = vadd.f32 %v1976_v13, %v1966_v24  ;;  %v1491_v24 = vstv %s2235_s14 }
 0x2a8   :  { %v1445_v15 = vpop.permute.xlu0 %1444  ;;  %v1492_v44 = vmul.f32 %v1491_v24, %v3480_v51 }
 0x2a9   :  { %v1450_v23 = vadd.f32 %v1445_v15, %v1436_v61 }
 0x2aa   :  { %v1447_v43 = vpop.permute.xlu1 %1446 }
 0x2ab   :  { %v1451_v27 = vadd.f32 %v1447_v43, %v1437_v11  ;;  %v1458_v57 = vadd.f32 %v1456_v46, %v1450_v23  ;;  %v1853_v23 = vstv %s3593_s12 }
 0x2ac   :  { %v1626_v17 = vpop.permute.xlu0 %1625 }
 0x2ad   :  { %v1631_v48 = vadd.f32 %v1626_v17, %v1617_v5  ;;  %v1459_v50 = vadd.f32 %v1457_v14, %v1451_v27 }
 0x2ae   :  { %v1628_v28 = vpop.permute.xlu1 %1627 }
 0x2af   :  { %v1632_v25 = vadd.f32 %v1628_v28, %v1618_v54  ;;  %v1639_v4 = vadd.f32 %v1637_v7, %v1631_v48  ;;  %v1672_v54 = vstv %s2251_s11  ;;  %v2034_v28 = vstv %s3596_s3 }
 0x2b0   :  { %v1807_v33 = vpop.permute.xlu0 %1806  ;;  %v1674_v27 = vmul.f32 %v1672_v54, %v3472_v2 }
 0x2b1   :  { %v1812_v40 = vadd.f32 %v1807_v33, %v1798_v32  ;;  %v1640_v26 = vadd.f32 %v1638_v19, %v1632_v25  ;;  %v1855_v19 = vmul.f32 %v1853_v23, %v3472_v2 }
 0x2b2   :  { %v1809_v56 = vpop.permute.xlu1 %1808  ;;  %s2303_s15 = spop %2302 }
 0x2b3   :  { %v1813_v8 = vadd.f32 %v1809_v56, %v1799_v20  ;;  %v1360_v9 = vstv %s2303_s15  ;;  %v1820_v1 = vadd.f32 %v1818_v6, %v1812_v40  ;;  %v1493_v20 = vmul.f32 %v1491_v24, %v3472_v2 }
 0x2b4   :  { %2224 = vst.msk [vmem:[%s3851_s2 + $0x3] sm:$0x1] %vm819_vm9, %v1360_v9  ;;  %s2305_s9 = spop %2304  ;;  %v1988_v59 = vpop.permute.xlu0 %1987  ;;  %v2035_v56 = vmul.f32 %v2034_v28, %v3480_v51 }
 0x2b5   :  { %v1377_v41 = vstv %s2305_s9  ;;  %v1993_v36 = vadd.f32 %v1988_v59, %v1979_v58  ;;  %v1821_v21 = vadd.f32 %v1819_v63, %v1813_v8 }
 0x2b6   :  { %2225 = vst.msk [vmem:[%s3852_s10 + $0x3] sm:$0x1] %vm819_vm9, %v1377_v41  ;;  %v1990_v30 = vpop.permute.xlu1 %1989 }
 0x2b7   :  { %v1994_v10 = vadd.f32 %v1990_v30, %v1980_v18  ;;  %v2001_v31 = vadd.f32 %v1999_v52, %v1993_v36  ;;  %v1673_v18 = vmul.f32 %v1672_v54, %v3480_v51 }
 0x2b8   :  { %v1467_v47 = vpop.permute.xlu0 %1466 }
 0x2b9   :  { %v2002_v60 = vadd.f32 %v2000_v55, %v1994_v10  ;;  %v1472_v37 = vadd.f32 %v1467_v47, %v1458_v57 }
 0x2ba   :  { %v1469_v42 = vpop.permute.xlu1 %1468 }
 0x2bb   :  { %v1473_v12 = vadd.f32 %v1469_v42, %v1459_v50  ;;  %v1854_v50 = vmul.f32 %v1853_v23, %v3480_v51 }
 0x2bc   :  { %v1648_v16 = vpop.permute.xlu0 %1647 }
 0x2bd   :  { %v1653_v35 = vadd.f32 %v1648_v16, %v1639_v4 }
 0x2be   :  { %v1650_v45 = vpop.permute.xlu1 %1649 }
 0x2bf   :  { %v1654_v58 = vadd.f32 %v1650_v45, %v1640_v26 }
 0x2c0   :  { %v1829_v3 = vpop.permute.xlu0 %1828 }
 0x2c1   :  { %v1834_v46 = vadd.f32 %v1829_v3, %v1820_v1  ;;  %v2036_v1 = vmul.f32 %v2034_v28, %v3472_v2  ;;  %v2334_v2 = vld [vmem:[%s3849_s24] ss:$0 sm:$0xff] }
 0x2c2   :  { %v1831_v22 = vpop.permute.xlu1 %1830 }
 0x2c3   :  { %v1835_v14 = vadd.f32 %v1831_v22, %v1821_v21 }
 0x2c4   :  { %v2010_v34 = vpop.permute.xlu0 %2009 }
 0x2c5   :  { %v2015_v53 = vadd.f32 %v2010_v34, %v2001_v31 }
 0x2c6   :  { %v2012_v61 = vpop.permute.xlu1 %2011 }
 0x2c7   :  { %v2016_v40 = vadd.f32 %v2012_v61, %v2002_v60 }
 0x2c8   :  { %v1481_v11 = vpop.permute.xlu0 %1480 }
 0x2c9   :  { %v1486_v5 = vadd.f32 %v1481_v11, %v1472_v37 }
 0x2ca   :  { %v1483_v49 = vpop.permute.xlu1 %1482 }
 0x2cb   :  { %v1487_v32 = vadd.f32 %v1483_v49, %v1473_v12  ;;  %v1494_v62 = vadd.f32 %v1492_v44, %v1486_v5 }
 0x2cc   :  { %v1662_v29 = vpop.permute.xlu0 %1661 }
 0x2cd   :  { %v1667_v13 = vadd.f32 %v1662_v29, %v1653_v35  ;;  %v1495_v0 = vadd.f32 %v1493_v20, %v1487_v32 }
 0x2ce   :  { %v1664_v15 = vpop.permute.xlu1 %1663 }
 0x2cf   :  { %v1668_v43 = vadd.f32 %v1664_v15, %v1654_v58  ;;  %v1675_v38 = vadd.f32 %v1673_v18, %v1667_v13 }
 0x2d0   :  { %v1843_v57 = vpop.permute.xlu0 %1842 }
 0x2d1   :  { %v1848_v17 = vadd.f32 %v1843_v57, %v1834_v46  ;;  %v1676_v48 = vadd.f32 %v1674_v27, %v1668_v43 }
 0x2d2   :  { %v1845_v7 = vpop.permute.xlu1 %1844 }
 0x2d3   :  { %v1849_v25 = vadd.f32 %v1845_v7, %v1835_v14  ;;  %v1856_v4 = vadd.f32 %v1854_v50, %v1848_v17 }
 0x2d4   :  { %v2024_v33 = vpop.permute.xlu0 %2023 }
 0x2d5   :  { %v2029_v26 = vadd.f32 %v2024_v33, %v2015_v53  ;;  %v1857_v6 = vadd.f32 %v1855_v19, %v1849_v25 }
 0x2d6   :  { %v2026_v39 = vpop.permute.xlu1 %2025 }
 0x2d7   :  { %v2030_v8 = vadd.f32 %v2026_v39, %v2016_v40  ;;  %v2037_v9 = vadd.f32 %v2035_v56, %v2029_v26 }
 0x2d8   :  { %v1503_v63 = vpop.permute.xlu0 %1502 }
 0x2d9   :  { %v2038_v59 = vadd.f32 %v2036_v1, %v2030_v8  ;;  %v1508_v55 = vadd.f32 %v1503_v63, %v1494_v62 }
 0x2da   :  { %v1505_v41 = vpop.permute.xlu1 %1504 }
 0x2db   :  { %v1509_v60 = vadd.f32 %v1505_v41, %v1495_v0 }
 0x2dc   :  { %v1684_v36 = vpop.permute.xlu0 %1683 }
 0x2dd   :  { %v1689_v51 = vadd.f32 %v1684_v36, %v1675_v38 }
 0x2de   :  { %v1686_v21 = vpop.permute.xlu1 %1685 }
 0x2df   :  { %v1690_v34 = vadd.f32 %v1686_v21, %v1676_v48 }
 0x2e0   :  { %v1865_v52 = vpop.permute.xlu0 %1864 }
 0x2e1   :  { %v1870_v11 = vadd.f32 %v1865_v52, %v1856_v4 }
 0x2e2   :  { %v1867_v30 = vpop.permute.xlu1 %1866 }
 0x2e3   :  { %v1871_v32 = vadd.f32 %v1867_v30, %v1857_v6 }
 0x2e4   :  { %v2046_v10 = vpop.permute.xlu0 %2045 }
 0x2e5   :  { %v2051_v15 = vadd.f32 %v2046_v10, %v2037_v9 }
 0x2e6   :  { %v2048_v31 = vpop.permute.xlu1 %2047 }
 0x2e7   :  { %v2052_v17 = vadd.f32 %v2048_v31, %v2038_v59 }
 0x2e8   :  { %v1517_v47 = vpop.permute.xlu0 %1516 }
 0x2e9   :  { %v1522_v42 = vadd.f32 %v1517_v47, %v1508_v55 }
 0x2ea   :  { %v1519_v16 = vpop.permute.xlu1 %1518 }
 0x2eb   :  { %2238 = vst.msk [vmem:[%s3850_s7 + $0x61] sm:$0xff] %vm795_vm8, %v1522_v42  ;;  %v1527_v45 = vmul.f32 %v2334_v2, %v1522_v42  ;;  %v1523_v3 = vadd.f32 %v1519_v16, %v1509_v60 }
 0x2ec   :  { %v1698_v22 = vpop.permute.xlu0 %1697 }
 0x2ed   :  { %v1544_v61 = vmul.f32 %v1527_v45, %v1522_v42  ;;  %2239 = vst.msk [vmem:[%s3850_s7 + $0x69] sm:$0xff] %vm795_vm8, %v1523_v3  ;;  %v1528_v24 = vmul.f32 %v2334_v2, %v1523_v3  ;;  %v1703_v37 = vadd.f32 %v1698_v22, %v1689_v51  ;;  %v1529_v5 = vsel %vm795_vm8, %v1527_v45, 0.0 }
 0x2ee   :  { %v1700_v12 = vpop.permute.xlu1 %1699 }
 0x2ef   :  { %v1545_v44 = vmul.f32 %v1528_v24, %v1523_v3  ;;  %2254 = vst.msk [vmem:[%s3850_s7 + $0x79] sm:$0xff] %vm795_vm8, %v1703_v37  ;;  %v1708_v49 = vmul.f32 %v2334_v2, %v1703_v37  ;;  %v1704_v54 = vadd.f32 %v1700_v12, %v1690_v34  ;;  %v1530_v35 = vsel %vm795_vm8, %v1528_v24, 0.0 }
 0x2f0   :  { %v1879_v62 = vpop.permute.xlu0 %1878  ;;  %v1531_v20 = vadd.f32 %v1530_v35, %v1529_v5  ;;  %v1546_v29 = vsel %vm795_vm8, %v1544_v61, 0.0 }
 0x2f1   :  { %v1725_v58 = vmul.f32 %v1708_v49, %v1703_v37  ;;  %2255 = vst.msk [vmem:[%s3850_s7 + $0x81] sm:$0xff] %vm795_vm8, %v1704_v54  ;;  %v1709_v13 = vmul.f32 %v2334_v2, %v1704_v54  ;;  %v1884_v0 = vadd.f32 %v1879_v62, %v1870_v11  ;;  %v1547_v18 = vsel %vm795_vm8, %v1545_v44, 0.0 }
 0x2f2   :  { %v1881_v23 = vpop.permute.xlu1 %1880  ;;  %1532 = vadd.xlane.f32.xlu0 %v1531_v20  ;;  %v1548_v46 = vadd.f32 %v1547_v18, %v1546_v29  ;;  %v1710_v43 = vsel %vm795_vm8, %v1708_v49, 0.0 }
 0x2f3   :  { %v1726_v38 = vmul.f32 %v1709_v13, %v1704_v54  ;;  %2270 = vst.msk [vmem:[%s3850_s7 + $0x91] sm:$0xff] %vm795_vm8, %v1884_v0  ;;  %v1889_v27 = vmul.f32 %v2334_v2, %v1884_v0  ;;  %v1885_v57 = vadd.f32 %v1881_v23, %v1871_v32  ;;  %v1711_v14 = vsel %vm795_vm8, %v1709_v13, 0.0 }
 0x2f4   :  { %1549 = vadd.xlane.f32.xlu1 %v1548_v46  ;;  %v2060_v48 = vpop.permute.xlu0 %2059  ;;  %v1712_v50 = vadd.f32 %v1711_v14, %v1710_v43  ;;  %v1727_v7 = vsel %vm795_vm8, %v1725_v58, 0.0 }
 0x2f5   :  { %v1906_v28 = vmul.f32 %v1889_v27, %v1884_v0  ;;  %2271 = vst.msk [vmem:[%s3850_s7 + $0x99] sm:$0xff] %vm795_vm8, %v1885_v57  ;;  %v1890_v53 = vmul.f32 %v2334_v2, %v1885_v57  ;;  %v2065_v25 = vadd.f32 %v2060_v48, %v2051_v15  ;;  %v1728_v4 = vsel %vm795_vm8, %v1726_v38, 0.0 }
 0x2f6   :  { %v2062_v19 = vpop.permute.xlu1 %2061  ;;  %1713 = vadd.xlane.f32.xlu0 %v1712_v50  ;;  %v1729_v33 = vadd.f32 %v1728_v4, %v1727_v7  ;;  %v1891_v40 = vsel %vm795_vm8, %v1889_v27, 0.0 }
 0x2f7   :  { %v1907_v26 = vmul.f32 %v1890_v53, %v1885_v57  ;;  %2286 = vst.msk [vmem:[%s3850_s7 + $0xa9] sm:$0xff] %vm795_vm8, %v2065_v25  ;;  %v2070_v6 = vmul.f32 %v2334_v2, %v2065_v25  ;;  %v2066_v56 = vadd.f32 %v2062_v19, %v2052_v17  ;;  %v1892_v39 = vsel %vm795_vm8, %v1890_v53, 0.0 }
 0x2f8   :  { %v1893_v8 = vadd.f32 %v1892_v39, %v1891_v40  ;;  %v1908_v63 = vsel %vm795_vm8, %v1906_v28, 0.0 }
 0x2f9   :  { %v2087_v9 = vmul.f32 %v2070_v6, %v2065_v25  ;;  %2287 = vst.msk [vmem:[%s3850_s7 + $0xb1] sm:$0xff] %vm795_vm8, %v2066_v56  ;;  %v2071_v1 = vmul.f32 %v2334_v2, %v2066_v56  ;;  %v1909_v59 = vsel %vm795_vm8, %v1907_v26, 0.0  ;;  %v2072_v21 = vsel %vm795_vm8, %v2070_v6, 0.0 }
 0x2fa   :  { %1730 = vadd.xlane.f32.xlu0 %v1729_v33  ;;  %1894 = vadd.xlane.f32.xlu1 %v1893_v8  ;;  %v1910_v41 = vadd.f32 %v1909_v59, %v1908_v63 }
 0x2fb   :  { %v2088_v36 = vmul.f32 %v2071_v1, %v2066_v56  ;;  %v2073_v52 = vsel %vm795_vm8, %v2071_v1, 0.0  ;;  %v2089_v10 = vsel %vm795_vm8, %v2087_v9, 0.0 }
 0x2fc   :  { %v2074_v30 = vadd.f32 %v2073_v52, %v2072_v21 }
 0x2fd   :  { %v2090_v31 = vsel %vm795_vm8, %v2088_v36, 0.0 }
 0x2fe   :  { %1911 = vadd.xlane.f32.xlu0 %v1910_v41  ;;  %2075 = vadd.xlane.f32.xlu1 %v2074_v30  ;;  %v2091_v55 = vadd.f32 %v2090_v31, %v2089_v10 }
 0x302   :  { %2092 = vadd.xlane.f32.xlu0 %v2091_v55 }
 0x37b   :  { %v1533_v47 = vpop.xlane.xlu0 %1532 }
 0x37c   :  { %v1534_v60 = vrot.slane %v1533_v47, 4 }
 0x37d   :  { %v1550_v42 = vpop.xlane.xlu1 %1549 }
 0x37e   :  { %v1535_v16 = vadd.f32 %v1534_v60, %v1533_v47  ;;  %v1551_v51 = vrot.slane %v1550_v42, 4 }
 0x37f   :  { %v1714_v2 = vpop.xlane.xlu0 %1713 }
 0x380   :  { %v1536_v45 = vrot.slane %v1535_v16, 2  ;;  %v1552_v3 = vadd.f32 %v1551_v51, %v1550_v42  ;;  %v1715_v22 = vrot.slane %v1714_v2, 4 }
 0x382   :  { %v1553_v34 = vrot.slane %v1552_v3, 2  ;;  %v1716_v61 = vadd.f32 %v1715_v22, %v1714_v2  ;;  %v1537_v24 = vadd.f32 %v1536_v45, %v1535_v16 }
 0x383   :  { %v1895_v37 = vpop.xlane.xlu1 %1894  ;;  %v1731_v11 = vpop.xlane.xlu0 %1730 }
 0x384   :  { %v1717_v12 = vrot.slane %v1716_v61, 2  ;;  %v1896_v5 = vrot.slane %v1895_v37, 4  ;;  %v1732_v44 = vrot.slane %v1731_v11, 4  ;;  %v1538_v49 = vrot.slane %v1537_v24, 1 }
 0x385   :  { %v1554_v54 = vadd.f32 %v1553_v34, %v1552_v3 }
 0x386   :  { %v1897_v35 = vadd.f32 %v1896_v5, %v1895_v37  ;;  %v1733_v32 = vadd.f32 %v1732_v44, %v1731_v11  ;;  %v1539_v62 = vadd.f32 %v1538_v49, %v1537_v24  ;;  %v1718_v20 = vadd.f32 %v1717_v12, %v1716_v61 }
 0x387   :  { %v2076_v29 = vpop.xlane.xlu1 %2075  ;;  %v1912_v58 = vpop.xlane.xlu0 %1911  ;;  %v1555_v13 = vrot.slane %v1554_v54, 1 }
 0x388   :  { %v1898_v0 = vrot.slane %v1897_v35, 2  ;;  %v1734_v18 = vrot.slane %v1733_v32, 2  ;;  %v2077_v15 = vrot.slane %v2076_v29, 4  ;;  %v1913_v23 = vrot.slane %v1912_v58, 4  ;;  %2306 = vpush %v1539_v62 }
 0x389   :  { %v1556_v46 = vadd.f32 %v1555_v13, %v1554_v54  ;;  %v1719_v43 = vrot.slane %v1718_v20, 1 }
 0x38a   :  { %v2078_v38 = vadd.f32 %v2077_v15, %v2076_v29  ;;  %v1914_v27 = vadd.f32 %v1913_v23, %v1912_v58  ;;  %v1735_v57 = vadd.f32 %v1734_v18, %v1733_v32  ;;  %v1899_v14 = vadd.f32 %v1898_v0, %v1897_v35 }
 0x38b   :  { %2308 = vpush %v1556_v46  ;;  %v2093_v17 = vpop.xlane.xlu0 %2092  ;;  %v1720_v48 = vadd.f32 %v1719_v43, %v1718_v20 }
 0x38c   :  { %v2079_v50 = vrot.slane %v2078_v38, 2  ;;  %v1915_v7 = vrot.slane %v1914_v27, 2  ;;  %v2094_v28 = vrot.slane %v2093_v17, 4  ;;  %v1736_v53 = vrot.slane %v1735_v57, 1 }
 0x38d   :  { %2310 = vpush %v1720_v48  ;;  %v1900_v25 = vrot.slane %v1899_v14, 1 }
 0x38e   :  { %v2080_v4 = vadd.f32 %v2079_v50, %v2078_v38  ;;  %v2095_v19 = vadd.f32 %v2094_v28, %v2093_v17  ;;  %v1737_v33 = vadd.f32 %v1736_v53, %v1735_v57  ;;  %v1916_v40 = vadd.f32 %v1915_v7, %v1914_v27 }
 0x38f   :  { %v1901_v26 = vadd.f32 %v1900_v25, %v1899_v14 }
 0x390   :  { %v2096_v6 = vrot.slane %v2095_v19, 2  ;;  %2312 = vpush %v1737_v33  ;;  %v1917_v56 = vrot.slane %v1916_v40, 1  ;;  %v2081_v39 = vrot.slane %v2080_v4, 1 }
 0x391   :  { %2314 = vpush %v1901_v26 }
 0x392   :  { %v2097_v8 = vadd.f32 %v2096_v6, %v2095_v19  ;;  %v1918_v9 = vadd.f32 %v1917_v56, %v1916_v40  ;;  %v2082_v1 = vadd.f32 %v2081_v39, %v2080_v4 }
 0x394   :  { %2316 = vpush %v1918_v9  ;;  %v2098_v63 = vrot.slane %v2097_v8, 1 }
 0x395   :  { %2318 = vpush %v2082_v1 }
 0x396   :  { %v2099_v59 = vadd.f32 %v2098_v63, %v2097_v8 }
 0x398   :  { %2320 = vpush %v2099_v59 }
 0x3b9   :  { %s2307_s7 = spop %2306 }
 0x3ba   :  { %v1541_v41 = vstv %s2307_s7 }
 0x3bb   :  { %2240 = vst.msk [vmem:[%s3851_s2 + $0x4] sm:$0x1] %vm819_vm9, %v1541_v41 }
 0x3bc   :  { %s2309_s6 = spop %2308 }
 0x3bd   :  { %v1558_v36 = vstv %s2309_s6 }
 0x3be   :  { %2241 = vst.msk [vmem:[%s3852_s10 + $0x4] sm:$0x1] %vm819_vm9, %v1558_v36  ;;  %s2311_s26 = spop %2310 }
 0x3bf   :  { %v1722_v21 = vstv %s2311_s26 }
 0x3c0   :  { %2256 = vst.msk [vmem:[%s3851_s2 + $0x5] sm:$0x1] %vm819_vm9, %v1722_v21 }
 0x3c1   :  { %s2313_s12 = spop %2312 }
 0x3c2   :  { %v1739_v52 = vstv %s2313_s12  ;;  %s2315_s3 = spop %2314 }
 0x3c3   :  { %2257 = vst.msk [vmem:[%s3852_s10 + $0x5] sm:$0x1] %vm819_vm9, %v1739_v52  ;;  %v1903_v30 = vstv %s2315_s3 }
 0x3c4   :  { %2272 = vst.msk [vmem:[%s3851_s2 + $0x6] sm:$0x1] %vm819_vm9, %v1903_v30 }
 0x3c5   :  { %s2317_s17 = spop %2316 }
 0x3c6   :  { %v1920_v10 = vstv %s2317_s17  ;;  %s2319_s19 = spop %2318 }
 0x3c7   :  { %2273 = vst.msk [vmem:[%s3852_s10 + $0x6] sm:$0x1] %vm819_vm9, %v1920_v10  ;;  %v2084_v31 = vstv %s2319_s19 }
 0x3c8   :  { %2288 = vst.msk [vmem:[%s3851_s2 + $0x7] sm:$0x1] %vm819_vm9, %v2084_v31 }
 0x3c9   :  { %s2321_s23 = spop %2320 }
 0x3ca   :  { %v2101_v55 = vstv %s2321_s23 }
 0x3cb   :  { %2289 = vst.msk [vmem:[%s3852_s10 + $0x7] sm:$0x1] %vm819_vm9, %v2101_v55 }
 0x3cc   :  { %2116 = vsyncpa [#allocation5], 1 }
 0x3cd   :  { %2117 = vsyncpa [#allocation6], 1 }
 0x3ce   :  { %2118 = vsyncpa [#allocation9], 1 }

</bundles_post_ra>
